<compile_context>
chip_gen: v6e
topology: v6e:2x2x1
jax: 0.10.0
libtpu: 0.0.40
codegen_flags: <defaults>
</compile_context>

<pallas_src>
import functools
import math

import jax
import jax.numpy as jnp
from jax.experimental import pallas as pl
from jax.experimental.pallas import tpu as pltpu


# ----------------------------- small helpers -----------------------------

def _round_up(x, m):
    return ((x + m - 1) // m) * m


def _row_tiles(n, max_rows=512):
    """Row tile (multiple of 8, <= max_rows); prefer >=2 grid steps (v7x 2TCs)."""
    tm = min(max_rows, _round_up(n, 8))
    if _round_up(n, tm) // tm < 2 and n > 8:
        tm = _round_up(pl.cdiv(n, 2), 8)
    n_pad = _round_up(n, tm)
    return tm, n_pad


def _pad_rows(x2d, n_pad):
    n = x2d.shape[0]
    if n_pad > n:
        x2d = jnp.pad(x2d, ((0, n_pad - n), (0, 0)))
    return x2d


def _layernorm_f32(x, gamma, beta, eps):
    mean = jnp.mean(x, axis=-1, keepdims=True)
    xc = x - mean
    var = jnp.mean(xc * xc, axis=-1, keepdims=True)
    return xc * jax.lax.rsqrt(var + eps) * gamma + beta


def _erf_poly(x):
    # Abramowitz & Stegun 7.1.26, |err| < 1.5e-7 (f32). The reciprocal is
    # routed to the otherwise-idle EUP slot.
    sign = jnp.where(x >= 0.0, 1.0, -1.0)
    ax = jnp.abs(x)
    t = pl.reciprocal(1.0 + 0.3275911 * ax, approx=True)
    poly = t * (0.254829592 + t * (-0.284496736 + t * (1.421413741
               + t * (-1.453152027 + t * 1.061405429))))
    return sign * (1.0 - poly * jnp.exp(-ax * ax))


def _gelu_erf(x):
    # nn.GELU() default (exact erf form): 0.5 * x * (1 + erf(x / sqrt(2)))
    return 0.5 * x * (1.0 + _erf_poly(x * 0.7071067811865476))


# ------------------- kernel 1: norm1 + qkv (+ shortcut proj) -------------------

def _norm1_qkv_kernel(x_ref, g_ref, b_ref, wq_ref, bq_ref, *rest, eps, has_proj):
    if has_proj:
        wp_ref, bp_ref, qkv_ref, sc_ref = rest
    else:
        (qkv_ref,) = rest
    x = x_ref[...].astype(jnp.float32)
    xn = _layernorm_f32(x, g_ref[...], b_ref[...], eps)          # f32 stats
    xn_bf = xn.astype(jnp.bfloat16)                              # bf16 MXU operands
    qkv = jnp.dot(xn_bf, wq_ref[...],
                  preferred_element_type=jnp.float32) + bq_ref[...]
    qkv_ref[...] = qkv.astype(qkv_ref.dtype)
    if has_proj:
        sc = jnp.dot(xn_bf, wp_ref[...],
                     preferred_element_type=jnp.float32) + bp_ref[...]
        sc_ref[...] = sc.astype(sc_ref.dtype)


def norm1_qkv_proj(x2d, gamma, beta, wqkv, bqkv, wproj=None, bproj=None,
                   *, eps=1e-6, block_rows=512):
    n, dim = x2d.shape
    c_qkv = wqkv.shape[1]
    has_proj = wproj is not None
    tm, n_pad = _row_tiles(n, block_rows)
    xp = _pad_rows(x2d, n_pad)
    grid = (n_pad // tm,)

    in_specs = [
        pl.BlockSpec((tm, dim), lambda i: (i, 0)),
        pl.BlockSpec((1, dim), lambda i: (0, 0)),
        pl.BlockSpec((1, dim), lambda i: (0, 0)),
        pl.BlockSpec((dim, c_qkv), lambda i: (0, 0)),
        pl.BlockSpec((1, c_qkv), lambda i: (0, 0)),
    ]
    args = [xp, gamma.reshape(1, dim), beta.reshape(1, dim),
            wqkv.astype(jnp.bfloat16), bqkv.reshape(1, c_qkv)]
    out_shapes = [jax.ShapeDtypeStruct((n_pad, c_qkv), jnp.bfloat16)]
    out_specs = [pl.BlockSpec((tm, c_qkv), lambda i: (i, 0))]
    flops = 2 * n_pad * dim * c_qkv
    bytes_acc = n_pad * dim * 4 + wqkv.size * 2 + n_pad * c_qkv * 2
    if has_proj:
        c_out = wproj.shape[1]
        in_specs += [pl.BlockSpec((dim, c_out), lambda i: (0, 0)),
                     pl.BlockSpec((1, c_out), lambda i: (0, 0))]
        args += [wproj.astype(jnp.bfloat16), bproj.reshape(1, c_out)]
        out_shapes.append(jax.ShapeDtypeStruct((n_pad, c_out), jnp.float32))
        out_specs.append(pl.BlockSpec((tm, c_out), lambda i: (i, 0)))
        flops += 2 * n_pad * dim * c_out
        bytes_acc += wproj.size * 2 + n_pad * c_out * 4

    outs = pl.pallas_call(
        functools.partial(_norm1_qkv_kernel, eps=eps, has_proj=has_proj),
        out_shape=tuple(out_shapes),
        grid=grid,
        in_specs=in_specs,
        out_specs=tuple(out_specs),
        compiler_params=pltpu.CompilerParams(dimension_semantics=("parallel",)),
        cost_estimate=pl.CostEstimate(flops=flops, transcendentals=n_pad,
                                      bytes_accessed=bytes_acc),
    )(*args)
    if has_proj:
        qkv, sc = outs
        return qkv[:n], sc[:n]
    return outs[0][:n], None


# --------------- kernel 2: batched windowed attention + out-proj ---------------

def _attention_kernel(q_ref, k_ref, v_ref, wp_ref, bp_ref, o_ref, *, scale):
    g, nh, lq, dh = q_ref.shape
    lk = k_ref.shape[2]
    q = q_ref[...].reshape(g * nh, lq, dh)          # bf16
    k = k_ref[...].reshape(g * nh, lk, dh)
    v = v_ref[...].reshape(g * nh, lk, dh)
    s = jnp.einsum("bqd,bkd->bqk", q, k,
                   preferred_element_type=jnp.float32) * scale   # f32 scores
    m = jnp.max(s, axis=-1, keepdims=True)
    p = jnp.exp(s - m)
    denom = jnp.sum(p, axis=-1, keepdims=True)
    o = jnp.einsum("bqk,bkd->bqd", p.astype(v.dtype), v,
                   preferred_element_type=jnp.float32)
    o = o * pl.reciprocal(denom, approx=True)        # EUP reciprocal
    o = o.reshape(g, nh, lq, dh)
    # Head-merge fused with the output projection: accumulate per-head partial
    # matmuls (avoids any lane concatenation / relayout).
    wp = wp_ref[...]                                 # (nh*dh, nh*dh) bf16
    acc = None
    for h in range(nh):
        oh = o[:, h].reshape(g * lq, dh).astype(jnp.bfloat16)
        part = jnp.dot(oh, wp[h * dh:(h + 1) * dh, :],
                       preferred_element_type=jnp.float32)
        acc = part if acc is None else acc + part
    y = acc + bp_ref[...]
    o_ref[...] = y.reshape(g, lq, nh * dh).astype(o_ref.dtype)


def _pick_window_group(n_win, max_group=8):
    g = min(max_group, n_win)
    while n_win % g:
        g -= 1
    if n_win // g < 2:
        for cand in range(g, 0, -1):
            if n_win % cand == 0 and n_win // cand >= 2:
                g = cand
                break
    return g


def attention_with_proj(q, k, v, wproj, bproj):
    # q: (nW, nH, Lq, Dh) bf16, k/v: (nW, nH, Lk, Dh) bf16 -> (nW, Lq, nH*Dh) f32
    # TODO(synk): for window_size=0 global-attention stages at large resolution
    # the full (Lq, Lk) score tile exceeds VMEM; needs an online-softmax variant.
    n_win, nh, lq, dh = q.shape
    lk = k.shape[2]
    dim_out = nh * dh
    scale = 1.0 / math.sqrt(dh)
    g = _pick_window_group(n_win)
    grid = (n_win // g,)
    flops = 4 * n_win * nh * lq * lk * dh + 2 * n_win * lq * dim_out * dim_out
    bytes_acc = ((q.size + k.size + v.size) * 2 + wproj.size * 2
                 + n_win * lq * dim_out * 4)
    return pl.pallas_call(
        functools.partial(_attention_kernel, scale=scale),
        out_shape=jax.ShapeDtypeStruct((n_win, lq, dim_out), jnp.float32),
        grid=grid,
        in_specs=[
            pl.BlockSpec((g, nh, lq, dh), lambda i: (i, 0, 0, 0)),
            pl.BlockSpec((g, nh, lk, dh), lambda i: (i, 0, 0, 0)),
            pl.BlockSpec((g, nh, lk, dh), lambda i: (i, 0, 0, 0)),
            pl.BlockSpec((dim_out, dim_out), lambda i: (0, 0)),
            pl.BlockSpec((1, dim_out), lambda i: (0, 0)),
        ],
        out_specs=pl.BlockSpec((g, lq, dim_out), lambda i: (i, 0, 0)),
        compiler_params=pltpu.CompilerParams(dimension_semantics=("parallel",)),
        cost_estimate=pl.CostEstimate(flops=flops,
                                      transcendentals=n_win * nh * lq * lk,
                                      bytes_accessed=bytes_acc),
    )(q, k, v, wproj.astype(jnp.bfloat16), bproj.reshape(1, dim_out))


# ----------------- kernel 3: residual + norm2 + MLP + residual -----------------

def _add_norm2_mlp_kernel(a_ref, b_ref, g_ref, be_ref, w1_ref, b1_ref,
                          w2_ref, b2_ref, o_ref, *, eps):
    x = a_ref[...].astype(jnp.float32) + b_ref[...].astype(jnp.float32)
    xn = _layernorm_f32(x, g_ref[...], be_ref[...], eps)
    h = jnp.dot(xn.astype(jnp.bfloat16), w1_ref[...],
                preferred_element_type=jnp.float32) + b1_ref[...]
    h = _gelu_erf(h)                                    # f32 elementwise
    y = jnp.dot(h.astype(jnp.bfloat16), w2_ref[...],
                preferred_element_type=jnp.float32) + b2_ref[...]
    o_ref[...] = (x + y).astype(o_ref.dtype)


def add_norm2_mlp(a2d, b2d, gamma, beta, w1, b1, w2, b2, *, eps=1e-6,
                  block_rows=512):
    n, c = a2d.shape
    hidden = w1.shape[1]
    tm, n_pad = _row_tiles(n, block_rows)
    ap = _pad_rows(a2d, n_pad)
    bp = _pad_rows(b2d, n_pad)
    grid = (n_pad // tm,)
    flops = 4 * n_pad * c * hidden
    bytes_acc = 3 * n_pad * c * 4 + (w1.size + w2.size) * 2
    out = pl.pallas_call(
        functools.partial(_add_norm2_mlp_kernel, eps=eps),
        out_shape=jax.ShapeDtypeStruct((n_pad, c), jnp.float32),
        grid=grid,
        in_specs=[
            pl.BlockSpec((tm, c), lambda i: (i, 0)),
            pl.BlockSpec((tm, c), lambda i: (i, 0)),
            pl.BlockSpec((1, c), lambda i: (0, 0)),
            pl.BlockSpec((1, c), lambda i: (0, 0)),
            pl.BlockSpec((c, hidden), lambda i: (0, 0)),
            pl.BlockSpec((1, hidden), lambda i: (0, 0)),
            pl.BlockSpec((hidden, c), lambda i: (0, 0)),
            pl.BlockSpec((1, c), lambda i: (0, 0)),
        ],
        out_specs=pl.BlockSpec((tm, c), lambda i: (i, 0)),
        compiler_params=pltpu.CompilerParams(dimension_semantics=("parallel",)),
        cost_estimate=pl.CostEstimate(flops=flops,
                                      transcendentals=n_pad * (hidden + 1),
                                      bytes_accessed=bytes_acc),
    )(ap, bp, gamma.reshape(1, c), beta.reshape(1, c),
      w1.astype(jnp.bfloat16), b1.reshape(1, hidden),
      w2.astype(jnp.bfloat16), b2.reshape(1, c))
    return out[:n]


# ------------------------------ JAX glue ------------------------------

def maxpool_nhwc(x, stride):
    # nn.MaxPool2d(kernel_size=stride, stride=stride, ceil_mode=False), NHWC.
    b, h, w, c = x.shape
    sh, sw = stride
    x = x.reshape(b, h // sh, sh, w // sw, sw, c)
    return jnp.max(x, axis=(2, 4))


def window_partition(x, ws, pad_value=None):
    b, h, w, c = x.shape
    pad_h = (ws - h % ws) % ws
    pad_w = (ws - w % ws) % ws
    if pad_h or pad_w:
        x = jnp.pad(x, ((0, 0), (0, pad_h), (0, pad_w), (0, 0)))
        if pad_value is not None:
            row_ok = (jnp.arange(h + pad_h) < h)[None, :, None, None]
            col_ok = (jnp.arange(w + pad_w) < w)[None, None, :, None]
            x = jnp.where(row_ok & col_ok, x, pad_value.astype(x.dtype))
    hp, wp = h + pad_h, w + pad_w
    x = x.reshape(b, hp // ws, ws, wp // ws, ws, c)
    windows = x.transpose(0, 1, 3, 2, 4, 5).reshape(-1, ws, ws, c)
    return windows, (hp, wp)


def window_unpartition(windows, ws, pad_hw, hw):
    hp, wp = pad_hw
    h, w = hw
    b = windows.shape[0] // (hp * wp // ws // ws)
    x = windows.reshape(b, hp // ws, wp // ws, ws, ws, -1)
    x = x.transpose(0, 1, 3, 2, 4, 5).reshape(b, hp, wp, -1)
    if hp > h or wp > w:
        x = x[:, :h, :w, :]
    return x


# --------------------------- module forward ---------------------------

def multiscale_block(x, p, *, dim, dim_out, num_heads, q_stride, window_size,
                     eps=1e-6):
    b, h0, w0, _ = x.shape
    n1 = b * h0 * w0
    dh = dim_out // num_heads
    has_proj = dim != dim_out

    # kernel 1: norm1 + qkv (+ shortcut projection), all on full-image tokens
    qkv2d, sc2d = norm1_qkv_proj(
        x.reshape(n1, dim), p["norm1_w"], p["norm1_b"],
        p["qkv_w"].T, p["qkv_b"],
        p["proj_w"].T if has_proj else None,
        p["proj_b"] if has_proj else None, eps=eps)

    if has_proj:
        sc = sc2d.reshape(b, h0, w0, dim_out)
        shortcut = maxpool_nhwc(sc, q_stride) if q_stride is not None else sc
    else:
        shortcut = x

    # window partition of the qkv activations (XLA reshape/transpose glue)
    qkv_img = qkv2d.reshape(b, h0, w0, 3 * dim_out)
    if window_size > 0:
        # Padded tokens must equal qkv(zero-padded normalized x) = qkv bias.
        pad_val = p["qkv_b"].reshape(1, 1, 1, 3 * dim_out)
        qkv_win, pad_hw = window_partition(qkv_img, window_size, pad_val)
        ws_h = ws_w = window_size
    else:
        qkv_win, pad_hw = qkv_img, (h0, w0)
        ws_h, ws_w = h0, w0
    n_win = qkv_win.shape[0]

    qkv_win = qkv_win.reshape(n_win, ws_h, ws_w, 3, num_heads, dh)
    q = qkv_win[:, :, :, 0]
    k = qkv_win[:, :, :, 1]
    v = qkv_win[:, :, :, 2]
    if q_stride is not None:
        q = maxpool_nhwc(q.reshape(n_win, ws_h, ws_w, dim_out), q_stride)
        hq, wq = q.shape[1], q.shape[2]
        q = q.reshape(n_win, hq, wq, num_heads, dh)
    else:
        hq, wq = ws_h, ws_w
    lq, lk = hq * wq, ws_h * ws_w
    qh = q.reshape(n_win, lq, num_heads, dh).transpose(0, 2, 1, 3)
    kh = k.reshape(n_win, lk, num_heads, dh).transpose(0, 2, 1, 3)
    vh = v.reshape(n_win, lk, num_heads, dh).transpose(0, 2, 1, 3)

    # kernel 2: batched windowed attention fused with the output projection
    xa = attention_with_proj(qh, kh, vh, p["attn_proj_w"].T, p["attn_proj_b"])
    xa = xa.reshape(n_win, hq, wq, dim_out)

    # window unpartition (XLA glue), following the PyTorch q_stride logic
    ws_cur = window_size
    if q_stride is not None:
        ws_cur = window_size // q_stride[0]
        hs, wsf = shortcut.shape[1], shortcut.shape[2]
        if ws_cur > 0:
            pad_h = (ws_cur - hs % ws_cur) % ws_cur
            pad_w = (ws_cur - wsf % ws_cur) % ws_cur
            pad_hw = (hs + pad_h, wsf + pad_w)
    else:
        hs, wsf = h0, w0
    if window_size > 0:
        xa = window_unpartition(xa, ws_cur, pad_hw, (hs, wsf))

    # kernel 3: residual + norm2 + MLP + residual (drop_path = Identity)
    bo, ho, wo, _ = shortcut.shape
    n2 = bo * ho * wo
    out2d = add_norm2_mlp(
        shortcut.reshape(n2, dim_out), xa.reshape(n2, dim_out),
        p["norm2_w"], p["norm2_b"],
        p["fc1_w"].T, p["fc1_b"], p["fc2_w"].T, p["fc2_b"], eps=eps)
    return out2d.reshape(bo, ho, wo, dim_out)


# ---------------------- pure-JAX reference (check) ----------------------

def _ref_ln(x, g, b, eps=1e-6):
    m = x.mean(-1, keepdims=True)
    v = ((x - m) ** 2).mean(-1, keepdims=True)
    return (x - m) / jnp.sqrt(v + eps) * g + b


def _ref_lin(x, w, b):   # w is torch-shaped (out, in)
    return x @ w.T + b


def _ref_attn(q, k, v):  # (B, nH, L, Dh)
    s = (q @ jnp.swapaxes(k, -1, -2)) / jnp.sqrt(jnp.float32(q.shape[-1]))
    return jax.nn.softmax(s, axis=-1) @ v


def reference_block(x, p, *, dim, dim_out, num_heads, q_stride, window_size):
    b, h0, w0, _ = x.shape
    shortcut = x
    xn = _ref_ln(x, p["norm1_w"], p["norm1_b"])
    if dim != dim_out:
        sc = _ref_lin(xn, p["proj_w"], p["proj_b"])
        shortcut = maxpool_nhwc(sc, q_stride) if q_stride is not None else sc
    h, w = h0, w0
    pad_hw = None
    if window_size > 0:
        xw, pad_hw = window_partition(xn, window_size)
    else:
        xw = xn
    bw, hh, ww, _ = xw.shape
    L = hh * ww
    dh = dim_out // num_heads
    qkv = _ref_lin(xw.reshape(bw, L, dim), p["qkv_w"], p["qkv_b"])
    qkv = qkv.reshape(bw, L, 3, num_heads, dh)
    q, k, v = qkv[:, :, 0], qkv[:, :, 1], qkv[:, :, 2]
    if q_stride is not None:
        q = maxpool_nhwc(q.reshape(bw, hh, ww, dim_out), q_stride)
        hh, ww = q.shape[1], q.shape[2]
        q = q.reshape(bw, hh * ww, num_heads, dh)
    o = _ref_attn(q.transpose(0, 2, 1, 3), k.transpose(0, 2, 1, 3),
                  v.transpose(0, 2, 1, 3))
    o = o.transpose(0, 2, 1, 3).reshape(bw, hh, ww, dim_out)
    xa = _ref_lin(o, p["attn_proj_w"], p["attn_proj_b"])
    ws = window_size
    if q_stride is not None:
        ws = window_size // q_stride[0]
        h, w = shortcut.shape[1], shortcut.shape[2]
        pad_hw = (h + ((ws - h % ws) % ws if ws else 0),
                  w + ((ws - w % ws) % ws if ws else 0))
    if window_size > 0:
        xa = window_unpartition(xa, ws, pad_hw, (h, w))
    x = shortcut + xa
    xn2 = _ref_ln(x, p["norm2_w"], p["norm2_b"])
    hid = jax.nn.gelu(_ref_lin(xn2, p["fc1_w"], p["fc1_b"]), approximate=False)
    return x + _ref_lin(hid, p["fc2_w"], p["fc2_b"])


# ------------------------------ params ------------------------------

def init_params(key, dim, dim_out, num_heads, mlp_ratio):
    hidden = int(dim_out * mlp_ratio)
    ks = jax.random.split(key, 14)

    def w(k, o, i):
        return jax.random.normal(k, (o, i), jnp.float32) * 0.02

    def bvec(k, o):
        return jax.random.normal(k, (o,), jnp.float32) * 0.02

    p = {
        "norm1_w": 1.0 + 0.1 * jax.random.normal(ks[0], (dim,), jnp.float32),
        "norm1_b": 0.1 * jax.random.normal(ks[1], (dim,), jnp.float32),
        "qkv_w": w(ks[2], 3 * dim_out, dim),
        "qkv_b": bvec(ks[3], 3 * dim_out),
        "attn_proj_w": w(ks[4], dim_out, dim_out),
        "attn_proj_b": bvec(ks[5], dim_out),
        "norm2_w": 1.0 + 0.1 * jax.random.normal(ks[6], (dim_out,), jnp.float32),
        "norm2_b": 0.1 * jax.random.normal(ks[7], (dim_out,), jnp.float32),
        "fc1_w": w(ks[8], hidden, dim_out),
        "fc1_b": bvec(ks[9], hidden),
        "fc2_w": w(ks[10], dim_out, hidden),
        "fc2_b": bvec(ks[11], dim_out),
    }
    if dim != dim_out:
        p["proj_w"] = w(ks[12], dim_out, dim)
        p["proj_b"] = bvec(ks[13], dim_out)
    return p


# ------------------------------- main -------------------------------

if __name__ == "__main__":
    # Block config: dim 32 -> dim_out 64, 2 heads (head_dim=32),
    # window_size=8, q_stride=(2,2), mlp_ratio=4, drop_path=0 (Identity).
    dim, dim_out, num_heads = 32, 64, 2
    q_stride = (2, 2)
    window_size = 8
    mlp_ratio = 4.0
    B, H, W = 2, 16, 16

    key = jax.random.PRNGKey(0)
    kx, kp = jax.random.split(key)
    x = jax.random.normal(kx, (B, H, W, dim), jnp.float32)
    params = init_params(kp, dim, dim_out, num_heads, mlp_ratio)

    fwd = jax.jit(functools.partial(
        multiscale_block, dim=dim, dim_out=dim_out, num_heads=num_heads,
        q_stride=q_stride, window_size=window_size))
    out = jax.block_until_ready(fwd(x, params))
    assert out.shape == (B, H // q_stride[0], W // q_stride[1], dim_out), out.shape

    ref = reference_block(x, params, dim=dim, dim_out=dim_out,
                          num_heads=num_heads, q_stride=q_stride,
                          window_size=window_size)
    max_err = float(jnp.max(jnp.abs(out - ref)))
    # bf16 MXU operands with f32 accumulation -> slightly looser tolerance.
    assert max_err < 1e-2, max_err

    print("KERNEL_OK")
</pallas_src>

<mosaic_0001>
module attributes {stable_mosaic.version = 11 : i64} {
  func.func @_norm1_qkv_kernel(%arg0: i32, %arg1: memref<256x32xf32, #tpu.memory_space<vmem>>, %arg2: memref<1x32xf32, #tpu.memory_space<vmem>>, %arg3: memref<1x32xf32, #tpu.memory_space<vmem>>, %arg4: memref<32x192xbf16, #tpu.memory_space<vmem>>, %arg5: memref<1x192xf32, #tpu.memory_space<vmem>>, %arg6: memref<32x64xbf16, #tpu.memory_space<vmem>>, %arg7: memref<1x64xf32, #tpu.memory_space<vmem>>, %arg8: memref<256x192xbf16, #tpu.memory_space<vmem>>, %arg9: memref<256x64xf32, #tpu.memory_space<vmem>>) attributes {dimension_semantics = [#tpu.dimension_semantics<parallel>], iteration_bounds = array<i64: 2>, scalar_prefetch = 0 : i64, scratch_operands = 0 : i64, tpu.core_type = #tpu.core_type<tc>, window_params = [{transform_indices = @transform_0, window_bounds = array<i64: 256, 32>}, {pipeline_mode = #tpu.pipeline_mode<synchronous>, transform_indices = @transform_1, window_bounds = array<i64: 1, 32>}, {pipeline_mode = #tpu.pipeline_mode<synchronous>, transform_indices = @transform_2, window_bounds = array<i64: 1, 32>}, {pipeline_mode = #tpu.pipeline_mode<synchronous>, transform_indices = @transform_3, window_bounds = array<i64: 32, 192>}, {pipeline_mode = #tpu.pipeline_mode<synchronous>, transform_indices = @transform_4, window_bounds = array<i64: 1, 192>}, {pipeline_mode = #tpu.pipeline_mode<synchronous>, transform_indices = @transform_5, window_bounds = array<i64: 32, 64>}, {pipeline_mode = #tpu.pipeline_mode<synchronous>, transform_indices = @transform_6, window_bounds = array<i64: 1, 64>}, {transform_indices = @transform_7, window_bounds = array<i64: 256, 192>}, {transform_indices = @transform_8, window_bounds = array<i64: 256, 64>}]} {
    %c0 = arith.constant 0 : index
    %c0_0 = arith.constant 0 : index
    %0 = vector.load %arg1[%c0, %c0_0] : memref<256x32xf32, #tpu.memory_space<vmem>>, vector<256x32xf32>
    %c0_1 = arith.constant 0 : index
    %c0_2 = arith.constant 0 : index
    %1 = vector.load %arg2[%c0_1, %c0_2] : memref<1x32xf32, #tpu.memory_space<vmem>>, vector<1x32xf32>
    %c0_3 = arith.constant 0 : index
    %c0_4 = arith.constant 0 : index
    %2 = vector.load %arg3[%c0_3, %c0_4] : memref<1x32xf32, #tpu.memory_space<vmem>>, vector<1x32xf32>
    %cst = arith.constant dense<0.000000e+00> : vector<256xf32>
    %3 = vector.multi_reduction <add>, %0, %cst [1] : vector<256x32xf32> to vector<256xf32>
    %4 = vector.shape_cast %3 : vector<256xf32> to vector<256x1xf32>
    %cst_5 = arith.constant 3.200000e+01 : f32
    %5 = vector.broadcast %cst_5 : f32 to vector<256x1xf32>
    %6 = arith.divf %4, %5 : vector<256x1xf32>
    %7 = vector.broadcast %6 : vector<256x1xf32> to vector<256x32xf32>
    %8 = arith.subf %0, %7 : vector<256x32xf32>
    %9 = arith.mulf %8, %8 : vector<256x32xf32>
    %cst_6 = arith.constant dense<0.000000e+00> : vector<256xf32>
    %10 = vector.multi_reduction <add>, %9, %cst_6 [1] : vector<256x32xf32> to vector<256xf32>
    %11 = vector.shape_cast %10 : vector<256xf32> to vector<256x1xf32>
    %cst_7 = arith.constant 3.200000e+01 : f32
    %12 = vector.broadcast %cst_7 : f32 to vector<256x1xf32>
    %13 = arith.divf %11, %12 : vector<256x1xf32>
    %cst_8 = arith.constant 9.99999997E-7 : f32
    %14 = vector.broadcast %cst_8 : f32 to vector<256x1xf32>
    %15 = arith.addf %13, %14 : vector<256x1xf32>
    %16 = math.rsqrt %15 : vector<256x1xf32>
    %17 = vector.broadcast %16 : vector<256x1xf32> to vector<256x32xf32>
    %18 = arith.mulf %8, %17 : vector<256x32xf32>
    %19 = vector.broadcast %1 : vector<1x32xf32> to vector<256x32xf32>
    %20 = arith.mulf %18, %19 : vector<256x32xf32>
    %21 = vector.broadcast %2 : vector<1x32xf32> to vector<256x32xf32>
    %22 = arith.addf %20, %21 : vector<256x32xf32>
    %23 = arith.truncf %22 : vector<256x32xf32> to vector<256x32xbf16>
    %c0_9 = arith.constant 0 : index
    %c0_10 = arith.constant 0 : index
    %24 = vector.load %arg4[%c0_9, %c0_10] : memref<32x192xbf16, #tpu.memory_space<vmem>>, vector<32x192xbf16>
    %cst_11 = arith.constant dense<0.000000e+00> : vector<256x192xf32>
    %25 = tpu.matmul %23, %24, %cst_11 {dimension_numbers = #tpu.dot_dimension_numbers<[1], [0], [0], [1], [0, 0, 1, 1], [], []>} : vector<256x32xbf16>, vector<32x192xbf16>, vector<256x192xf32> -> vector<256x192xf32>
    %c0_12 = arith.constant 0 : index
    %c0_13 = arith.constant 0 : index
    %26 = vector.load %arg5[%c0_12, %c0_13] : memref<1x192xf32, #tpu.memory_space<vmem>>, vector<1x192xf32>
    %27 = vector.broadcast %26 : vector<1x192xf32> to vector<256x192xf32>
    %28 = arith.addf %25, %27 : vector<256x192xf32>
    %29 = arith.truncf %28 : vector<256x192xf32> to vector<256x192xbf16>
    %c0_14 = arith.constant 0 : index
    %c0_15 = arith.constant 0 : index
    %30 = vector.load %arg8[%c0_14, %c0_15] : memref<256x192xbf16, #tpu.memory_space<vmem>>, vector<256x192xbf16>
    tpu.vector_store %arg8[%c0_14, %c0_15], %29 {strides = array<i32>} : memref<256x192xbf16, #tpu.memory_space<vmem>>, vector<256x192xbf16>,
    %c0_16 = arith.constant 0 : index
    %c0_17 = arith.constant 0 : index
    %31 = vector.load %arg6[%c0_16, %c0_17] : memref<32x64xbf16, #tpu.memory_space<vmem>>, vector<32x64xbf16>
    %cst_18 = arith.constant dense<0.000000e+00> : vector<256x64xf32>
    %32 = tpu.matmul %23, %31, %cst_18 {dimension_numbers = #tpu.dot_dimension_numbers<[1], [0], [0], [1], [0, 0, 1, 1], [], []>} : vector<256x32xbf16>, vector<32x64xbf16>, vector<256x64xf32> -> vector<256x64xf32>
    %c0_19 = arith.constant 0 : index
    %c0_20 = arith.constant 0 : index
    %33 = vector.load %arg7[%c0_19, %c0_20] : memref<1x64xf32, #tpu.memory_space<vmem>>, vector<1x64xf32>
    %34 = vector.broadcast %33 : vector<1x64xf32> to vector<256x64xf32>
    %35 = arith.addf %32, %34 : vector<256x64xf32>
    %c0_21 = arith.constant 0 : index
    %c0_22 = arith.constant 0 : index
    %36 = vector.load %arg9[%c0_21, %c0_22] : memref<256x64xf32, #tpu.memory_space<vmem>>, vector<256x64xf32>
    tpu.vector_store %arg9[%c0_21, %c0_22], %35 {strides = array<i32>} : memref<256x64xf32, #tpu.memory_space<vmem>>, vector<256x64xf32>,
    return
  }
  func.func @transform_0(%arg0: i32) -> (i32, i32) {
    %c0_i32 = arith.constant 0 : i32
    %c0_i32_0 = arith.constant 0 : i32
    return %arg0, %c0_i32 : i32, i32
  }
  func.func @transform_1(%arg0: i32) -> (i32, i32) {
    %c0_i32 = arith.constant 0 : i32
    %c0_i32_0 = arith.constant 0 : i32
    %c0_i32_1 = arith.constant 0 : i32
    return %c0_i32, %c0_i32_0 : i32, i32
  }
  func.func @transform_2(%arg0: i32) -> (i32, i32) {
    %c0_i32 = arith.constant 0 : i32
    %c0_i32_0 = arith.constant 0 : i32
    %c0_i32_1 = arith.constant 0 : i32
    return %c0_i32, %c0_i32_0 : i32, i32
  }
  func.func @transform_3(%arg0: i32) -> (i32, i32) {
    %c0_i32 = arith.constant 0 : i32
    %c0_i32_0 = arith.constant 0 : i32
    %c0_i32_1 = arith.constant 0 : i32
    return %c0_i32, %c0_i32_0 : i32, i32
  }
  func.func @transform_4(%arg0: i32) -> (i32, i32) {
    %c0_i32 = arith.constant 0 : i32
    %c0_i32_0 = arith.constant 0 : i32
    %c0_i32_1 = arith.constant 0 : i32
    return %c0_i32, %c0_i32_0 : i32, i32
  }
  func.func @transform_5(%arg0: i32) -> (i32, i32) {
    %c0_i32 = arith.constant 0 : i32
    %c0_i32_0 = arith.constant 0 : i32
    %c0_i32_1 = arith.constant 0 : i32
    return %c0_i32, %c0_i32_0 : i32, i32
  }
  func.func @transform_6(%arg0: i32) -> (i32, i32) {
    %c0_i32 = arith.constant 0 : i32
    %c0_i32_0 = arith.constant 0 : i32
    %c0_i32_1 = arith.constant 0 : i32
    return %c0_i32, %c0_i32_0 : i32, i32
  }
  func.func @transform_7(%arg0: i32) -> (i32, i32) {
    %c0_i32 = arith.constant 0 : i32
    %c0_i32_0 = arith.constant 0 : i32
    return %arg0, %c0_i32 : i32, i32
  }
  func.func @transform_8(%arg0: i32) -> (i32, i32) {
    %c0_i32 = arith.constant 0 : i32
    %c0_i32_0 = arith.constant 0 : i32
    return %arg0, %c0_i32 : i32, i32
  }
}

module attributes {stable_mosaic.version = 11 : i64} {
  func.func @_attention_kernel(%arg0: i32, %arg1: memref<4x2x16x32xbf16, #tpu.memory_space<vmem>>, %arg2: memref<4x2x64x32xbf16, #tpu.memory_space<vmem>>, %arg3: memref<4x2x64x32xbf16, #tpu.memory_space<vmem>>, %arg4: memref<64x64xbf16, #tpu.memory_space<vmem>>, %arg5: memref<1x64xf32, #tpu.memory_space<vmem>>, %arg6: memref<4x16x64xf32, #tpu.memory_space<vmem>>) attributes {dimension_semantics = [#tpu.dimension_semantics<parallel>], iteration_bounds = array<i64: 2>, scalar_prefetch = 0 : i64, scratch_operands = 0 : i64, tpu.core_type = #tpu.core_type<tc>, window_params = [{transform_indices = @transform_0, window_bounds = array<i64: 4, 2, 16, 32>}, {transform_indices = @transform_1, window_bounds = array<i64: 4, 2, 64, 32>}, {transform_indices = @transform_2, window_bounds = array<i64: 4, 2, 64, 32>}, {pipeline_mode = #tpu.pipeline_mode<synchronous>, transform_indices = @transform_3, window_bounds = array<i64: 64, 64>}, {pipeline_mode = #tpu.pipeline_mode<synchronous>, transform_indices = @transform_4, window_bounds = array<i64: 1, 64>}, {transform_indices = @transform_5, window_bounds = array<i64: 4, 16, 64>}]} {
    %c0 = arith.constant 0 : index
    %c0_0 = arith.constant 0 : index
    %c0_1 = arith.constant 0 : index
    %c0_2 = arith.constant 0 : index
    %0 = vector.load %arg1[%c0, %c0_0, %c0_1, %c0_2] : memref<4x2x16x32xbf16, #tpu.memory_space<vmem>>, vector<4x2x16x32xbf16>
    %1 = vector.shape_cast %0 : vector<4x2x16x32xbf16> to vector<8x16x32xbf16>
    %c0_3 = arith.constant 0 : index
    %c0_4 = arith.constant 0 : index
    %c0_5 = arith.constant 0 : index
    %c0_6 = arith.constant 0 : index
    %2 = vector.load %arg2[%c0_3, %c0_4, %c0_5, %c0_6] : memref<4x2x64x32xbf16, #tpu.memory_space<vmem>>, vector<4x2x64x32xbf16>
    %3 = vector.shape_cast %2 : vector<4x2x64x32xbf16> to vector<8x64x32xbf16>
    %c0_7 = arith.constant 0 : index
    %c0_8 = arith.constant 0 : index
    %c0_9 = arith.constant 0 : index
    %c0_10 = arith.constant 0 : index
    %4 = vector.load %arg3[%c0_7, %c0_8, %c0_9, %c0_10] : memref<4x2x64x32xbf16, #tpu.memory_space<vmem>>, vector<4x2x64x32xbf16>
    %5 = vector.shape_cast %4 : vector<4x2x64x32xbf16> to vector<8x64x32xbf16>
    "tpu.trace_start"() <{level = 10 : i32, message = "bqd,bkd->bqk"}> : () -> ()
    %cst = arith.constant dense<0.000000e+00> : vector<8x16x64xf32>
    %6 = tpu.matmul %1, %3, %cst {dimension_numbers = #tpu.dot_dimension_numbers<[2], [2], [1], [1], [0, 0, 0, 1, 1, 1], [0], [0]>} : vector<8x16x32xbf16>, vector<8x64x32xbf16>, vector<8x16x64xf32> -> vector<8x16x64xf32>
    "tpu.trace_stop"() : () -> ()
    %cst_11 = arith.constant 0.176776692 : f32
    %7 = vector.broadcast %cst_11 : f32 to vector<8x16x64xf32>
    %8 = arith.mulf %6, %7 : vector<8x16x64xf32>
    %cst_12 = arith.constant dense<0xFF800000> : vector<8x16xf32>
    %9 = vector.multi_reduction <maximumf>, %8, %cst_12 [2] : vector<8x16x64xf32> to vector<8x16xf32>
    %10 = vector.shape_cast %9 : vector<8x16xf32> to vector<8x16x1xf32>
    %11 = vector.broadcast %10 : vector<8x16x1xf32> to vector<8x16x64xf32>
    %12 = arith.subf %8, %11 : vector<8x16x64xf32>
    %13 = math.exp %12 : vector<8x16x64xf32>
    %cst_13 = arith.constant dense<0.000000e+00> : vector<8x16xf32>
    %14 = vector.multi_reduction <add>, %13, %cst_13 [2] : vector<8x16x64xf32> to vector<8x16xf32>
    %15 = vector.shape_cast %14 : vector<8x16xf32> to vector<8x16x1xf32>
    %16 = arith.truncf %13 : vector<8x16x64xf32> to vector<8x16x64xbf16>
    "tpu.trace_start"() <{level = 10 : i32, message = "bqk,bkd->bqd"}> : () -> ()
    %cst_14 = arith.constant dense<0.000000e+00> : vector<8x16x32xf32>
    %17 = tpu.matmul %16, %5, %cst_14 {dimension_numbers = #tpu.dot_dimension_numbers<[2], [1], [1], [2], [0, 0, 0, 1, 1, 2], [0], [0]>} : vector<8x16x64xbf16>, vector<8x64x32xbf16>, vector<8x16x32xf32> -> vector<8x16x32xf32>
    "tpu.trace_stop"() : () -> ()
    %18 = tpu.reciprocal %15 {approx = true} : vector<8x16x1xf32> -> vector<8x16x1xf32>
    %19 = vector.broadcast %18 : vector<8x16x1xf32> to vector<8x16x32xf32>
    %20 = arith.mulf %17, %19 : vector<8x16x32xf32>
    %21 = vector.shape_cast %20 : vector<8x16x32xf32> to vector<4x2x16x32xf32>
    %c0_15 = arith.constant 0 : index
    %c0_16 = arith.constant 0 : index
    %22 = vector.load %arg4[%c0_15, %c0_16] : memref<64x64xbf16, #tpu.memory_space<vmem>>, vector<64x64xbf16>
    %23 = vector.extract_strided_slice %21 {offsets = [0, 0, 0, 0], sizes = [4, 1, 16, 32], strides = [1, 1, 1, 1]} : vector<4x2x16x32xf32> to vector<4x1x16x32xf32>
    %24 = vector.shape_cast %23 : vector<4x1x16x32xf32> to vector<4x16x32xf32>
    %25 = vector.shape_cast %24 : vector<4x16x32xf32> to vector<64x32xf32>
    %26 = arith.truncf %25 : vector<64x32xf32> to vector<64x32xbf16>
    %27 = vector.extract_strided_slice %22 {offsets = [0, 0], sizes = [32, 64], strides = [1, 1]} : vector<64x64xbf16> to vector<32x64xbf16>
    %cst_17 = arith.constant dense<0.000000e+00> : vector<64x64xf32>
    %28 = tpu.matmul %26, %27, %cst_17 {dimension_numbers = #tpu.dot_dimension_numbers<[1], [0], [0], [1], [0, 0, 1, 1], [], []>} : vector<64x32xbf16>, vector<32x64xbf16>, vector<64x64xf32> -> vector<64x64xf32>
    %29 = vector.extract_strided_slice %21 {offsets = [0, 1, 0, 0], sizes = [4, 1, 16, 32], strides = [1, 1, 1, 1]} : vector<4x2x16x32xf32> to vector<4x1x16x32xf32>
    %30 = vector.shape_cast %29 : vector<4x1x16x32xf32> to vector<4x16x32xf32>
    %31 = vector.shape_cast %30 : vector<4x16x32xf32> to vector<64x32xf32>
    %32 = arith.truncf %31 : vector<64x32xf32> to vector<64x32xbf16>
    %33 = vector.extract_strided_slice %22 {offsets = [32, 0], sizes = [32, 64], strides = [1, 1]} : vector<64x64xbf16> to vector<32x64xbf16>
    %cst_18 = arith.constant dense<0.000000e+00> : vector<64x64xf32>
    %34 = tpu.matmul %32, %33, %cst_18 {dimension_numbers = #tpu.dot_dimension_numbers<[1], [0], [0], [1], [0, 0, 1, 1], [], []>} : vector<64x32xbf16>, vector<32x64xbf16>, vector<64x64xf32> -> vector<64x64xf32>
    %35 = arith.addf %28, %34 : vector<64x64xf32>
    %c0_19 = arith.constant 0 : index
    %c0_20 = arith.constant 0 : index
    %36 = vector.load %arg5[%c0_19, %c0_20] : memref<1x64xf32, #tpu.memory_space<vmem>>, vector<1x64xf32>
    %37 = vector.broadcast %36 : vector<1x64xf32> to vector<64x64xf32>
    %38 = arith.addf %35, %37 : vector<64x64xf32>
    %39 = vector.shape_cast %38 : vector<64x64xf32> to vector<4x16x64xf32>
    %c0_21 = arith.constant 0 : index
    %c0_22 = arith.constant 0 : index
    %c0_23 = arith.constant 0 : index
    %40 = vector.load %arg6[%c0_21, %c0_22, %c0_23] : memref<4x16x64xf32, #tpu.memory_space<vmem>>, vector<4x16x64xf32>
    tpu.vector_store %arg6[%c0_21, %c0_22, %c0_23], %39 {strides = array<i32>} : memref<4x16x64xf32, #tpu.memory_space<vmem>>, vector<4x16x64xf32>,
    return
  }
  func.func @transform_0(%arg0: i32) -> (i32, i32, i32, i32) {
    %c0_i32 = arith.constant 0 : i32
    %c0_i32_0 = arith.constant 0 : i32
    %c0_i32_1 = arith.constant 0 : i32
    %c0_i32_2 = arith.constant 0 : i32
    return %arg0, %c0_i32, %c0_i32_0, %c0_i32_1 : i32, i32, i32, i32
  }
  func.func @transform_1(%arg0: i32) -> (i32, i32, i32, i32) {
    %c0_i32 = arith.constant 0 : i32
    %c0_i32_0 = arith.constant 0 : i32
    %c0_i32_1 = arith.constant 0 : i32
    %c0_i32_2 = arith.constant 0 : i32
    return %arg0, %c0_i32, %c0_i32_0, %c0_i32_1 : i32, i32, i32, i32
  }
  func.func @transform_2(%arg0: i32) -> (i32, i32, i32, i32) {
    %c0_i32 = arith.constant 0 : i32
    %c0_i32_0 = arith.constant 0 : i32
    %c0_i32_1 = arith.constant 0 : i32
    %c0_i32_2 = arith.constant 0 : i32
    return %arg0, %c0_i32, %c0_i32_0, %c0_i32_1 : i32, i32, i32, i32
  }
  func.func @transform_3(%arg0: i32) -> (i32, i32) {
    %c0_i32 = arith.constant 0 : i32
    %c0_i32_0 = arith.constant 0 : i32
    %c0_i32_1 = arith.constant 0 : i32
    return %c0_i32, %c0_i32_0 : i32, i32
  }
  func.func @transform_4(%arg0: i32) -> (i32, i32) {
    %c0_i32 = arith.constant 0 : i32
    %c0_i32_0 = arith.constant 0 : i32
    %c0_i32_1 = arith.constant 0 : i32
    return %c0_i32, %c0_i32_0 : i32, i32
  }
  func.func @transform_5(%arg0: i32) -> (i32, i32, i32) {
    %c0_i32 = arith.constant 0 : i32
    %c0_i32_0 = arith.constant 0 : i32
    %c0_i32_1 = arith.constant 0 : i32
    return %arg0, %c0_i32, %c0_i32_0 : i32, i32, i32
  }
}

module attributes {stable_mosaic.version = 11 : i64} {
  func.func @_add_norm2_mlp_kernel(%arg0: i32, %arg1: memref<64x64xf32, #tpu.memory_space<vmem>>, %arg2: memref<64x64xf32, #tpu.memory_space<vmem>>, %arg3: memref<1x64xf32, #tpu.memory_space<vmem>>, %arg4: memref<1x64xf32, #tpu.memory_space<vmem>>, %arg5: memref<64x256xbf16, #tpu.memory_space<vmem>>, %arg6: memref<1x256xf32, #tpu.memory_space<vmem>>, %arg7: memref<256x64xbf16, #tpu.memory_space<vmem>>, %arg8: memref<1x64xf32, #tpu.memory_space<vmem>>, %arg9: memref<64x64xf32, #tpu.memory_space<vmem>>) attributes {dimension_semantics = [#tpu.dimension_semantics<parallel>], iteration_bounds = array<i64: 2>, scalar_prefetch = 0 : i64, scratch_operands = 0 : i64, tpu.core_type = #tpu.core_type<tc>, window_params = [{transform_indices = @transform_0, window_bounds = array<i64: 64, 64>}, {transform_indices = @transform_1, window_bounds = array<i64: 64, 64>}, {pipeline_mode = #tpu.pipeline_mode<synchronous>, transform_indices = @transform_2, window_bounds = array<i64: 1, 64>}, {pipeline_mode = #tpu.pipeline_mode<synchronous>, transform_indices = @transform_3, window_bounds = array<i64: 1, 64>}, {pipeline_mode = #tpu.pipeline_mode<synchronous>, transform_indices = @transform_4, window_bounds = array<i64: 64, 256>}, {pipeline_mode = #tpu.pipeline_mode<synchronous>, transform_indices = @transform_5, window_bounds = array<i64: 1, 256>}, {pipeline_mode = #tpu.pipeline_mode<synchronous>, transform_indices = @transform_6, window_bounds = array<i64: 256, 64>}, {pipeline_mode = #tpu.pipeline_mode<synchronous>, transform_indices = @transform_7, window_bounds = array<i64: 1, 64>}, {transform_indices = @transform_8, window_bounds = array<i64: 64, 64>}]} {
    %c0 = arith.constant 0 : index
    %c0_0 = arith.constant 0 : index
    %0 = vector.load %arg1[%c0, %c0_0] : memref<64x64xf32, #tpu.memory_space<vmem>>, vector<64x64xf32>
    %c0_1 = arith.constant 0 : index
    %c0_2 = arith.constant 0 : index
    %1 = vector.load %arg2[%c0_1, %c0_2] : memref<64x64xf32, #tpu.memory_space<vmem>>, vector<64x64xf32>
    %2 = arith.addf %0, %1 : vector<64x64xf32>
    %c0_3 = arith.constant 0 : index
    %c0_4 = arith.constant 0 : index
    %3 = vector.load %arg3[%c0_3, %c0_4] : memref<1x64xf32, #tpu.memory_space<vmem>>, vector<1x64xf32>
    %c0_5 = arith.constant 0 : index
    %c0_6 = arith.constant 0 : index
    %4 = vector.load %arg4[%c0_5, %c0_6] : memref<1x64xf32, #tpu.memory_space<vmem>>, vector<1x64xf32>
    %cst = arith.constant dense<0.000000e+00> : vector<64xf32>
    %5 = vector.multi_reduction <add>, %2, %cst [1] : vector<64x64xf32> to vector<64xf32>
    %6 = vector.shape_cast %5 : vector<64xf32> to vector<64x1xf32>
    %cst_7 = arith.constant 6.400000e+01 : f32
    %7 = vector.broadcast %cst_7 : f32 to vector<64x1xf32>
    %8 = arith.divf %6, %7 : vector<64x1xf32>
    %9 = vector.broadcast %8 : vector<64x1xf32> to vector<64x64xf32>
    %10 = arith.subf %2, %9 : vector<64x64xf32>
    %11 = arith.mulf %10, %10 : vector<64x64xf32>
    %cst_8 = arith.constant dense<0.000000e+00> : vector<64xf32>
    %12 = vector.multi_reduction <add>, %11, %cst_8 [1] : vector<64x64xf32> to vector<64xf32>
    %13 = vector.shape_cast %12 : vector<64xf32> to vector<64x1xf32>
    %cst_9 = arith.constant 6.400000e+01 : f32
    %14 = vector.broadcast %cst_9 : f32 to vector<64x1xf32>
    %15 = arith.divf %13, %14 : vector<64x1xf32>
    %cst_10 = arith.constant 9.99999997E-7 : f32
    %16 = vector.broadcast %cst_10 : f32 to vector<64x1xf32>
    %17 = arith.addf %15, %16 : vector<64x1xf32>
    %18 = math.rsqrt %17 : vector<64x1xf32>
    %19 = vector.broadcast %18 : vector<64x1xf32> to vector<64x64xf32>
    %20 = arith.mulf %10, %19 : vector<64x64xf32>
    %21 = vector.broadcast %3 : vector<1x64xf32> to vector<64x64xf32>
    %22 = arith.mulf %20, %21 : vector<64x64xf32>
    %23 = vector.broadcast %4 : vector<1x64xf32> to vector<64x64xf32>
    %24 = arith.addf %22, %23 : vector<64x64xf32>
    %25 = arith.truncf %24 : vector<64x64xf32> to vector<64x64xbf16>
    %c0_11 = arith.constant 0 : index
    %c0_12 = arith.constant 0 : index
    %26 = vector.load %arg5[%c0_11, %c0_12] : memref<64x256xbf16, #tpu.memory_space<vmem>>, vector<64x256xbf16>
    %cst_13 = arith.constant dense<0.000000e+00> : vector<64x256xf32>
    %27 = tpu.matmul %25, %26, %cst_13 {dimension_numbers = #tpu.dot_dimension_numbers<[1], [0], [0], [1], [0, 0, 1, 1], [], []>} : vector<64x64xbf16>, vector<64x256xbf16>, vector<64x256xf32> -> vector<64x256xf32>
    %c0_14 = arith.constant 0 : index
    %c0_15 = arith.constant 0 : index
    %28 = vector.load %arg6[%c0_14, %c0_15] : memref<1x256xf32, #tpu.memory_space<vmem>>, vector<1x256xf32>
    %29 = vector.broadcast %28 : vector<1x256xf32> to vector<64x256xf32>
    %30 = arith.addf %27, %29 : vector<64x256xf32>
    %cst_16 = arith.constant 5.000000e-01 : f32
    %31 = vector.broadcast %cst_16 : f32 to vector<64x256xf32>
    %32 = arith.mulf %31, %30 : vector<64x256xf32>
    %cst_17 = arith.constant 0.707106769 : f32
    %33 = vector.broadcast %cst_17 : f32 to vector<64x256xf32>
    %34 = arith.mulf %30, %33 : vector<64x256xf32>
    %cst_18 = arith.constant 0.000000e+00 : f32
    %35 = vector.broadcast %cst_18 : f32 to vector<64x256xf32>
    %36 = arith.cmpf oge, %34, %35 : vector<64x256xf32>
    %cst_19 = arith.constant 1.000000e+00 : f32
    %cst_20 = arith.constant -1.000000e+00 : f32
    %37 = vector.broadcast %cst_19 : f32 to vector<64x256xf32>
    %38 = vector.broadcast %cst_20 : f32 to vector<64x256xf32>
    %39 = arith.select %36, %37, %38 : vector<64x256xi1>, vector<64x256xf32>
    %40 = math.absf %34 : vector<64x256xf32>
    %cst_21 = arith.constant 0.327591091 : f32
    %41 = vector.broadcast %cst_21 : f32 to vector<64x256xf32>
    %42 = arith.mulf %41, %40 : vector<64x256xf32>
    %cst_22 = arith.constant 1.000000e+00 : f32
    %43 = vector.broadcast %cst_22 : f32 to vector<64x256xf32>
    %44 = arith.addf %43, %42 : vector<64x256xf32>
    %45 = tpu.reciprocal %44 {approx = true} : vector<64x256xf32> -> vector<64x256xf32>
    %cst_23 = arith.constant 1.06140542 : f32
    %46 = vector.broadcast %cst_23 : f32 to vector<64x256xf32>
    %47 = arith.mulf %45, %46 : vector<64x256xf32>
    %cst_24 = arith.constant -1.45315206 : f32
    %48 = vector.broadcast %cst_24 : f32 to vector<64x256xf32>
    %49 = arith.addf %48, %47 : vector<64x256xf32>
    %50 = arith.mulf %45, %49 : vector<64x256xf32>
    %cst_25 = arith.constant 1.42141378 : f32
    %51 = vector.broadcast %cst_25 : f32 to vector<64x256xf32>
    %52 = arith.addf %51, %50 : vector<64x256xf32>
    %53 = arith.mulf %45, %52 : vector<64x256xf32>
    %cst_26 = arith.constant -0.284496725 : f32
    %54 = vector.broadcast %cst_26 : f32 to vector<64x256xf32>
    %55 = arith.addf %54, %53 : vector<64x256xf32>
    %56 = arith.mulf %45, %55 : vector<64x256xf32>
    %cst_27 = arith.constant 0.254829586 : f32
    %57 = vector.broadcast %cst_27 : f32 to vector<64x256xf32>
    %58 = arith.addf %57, %56 : vector<64x256xf32>
    %59 = arith.mulf %45, %58 : vector<64x256xf32>
    %cst_28 = arith.constant 0.000000e+00 : f32
    %60 = vector.broadcast %cst_28 : f32 to vector<64x256xf32>
    %61 = arith.subf %60, %40 : vector<64x256xf32>
    %62 = arith.mulf %61, %40 : vector<64x256xf32>
    %63 = math.exp %62 : vector<64x256xf32>
    %64 = arith.mulf %59, %63 : vector<64x256xf32>
    %cst_29 = arith.constant 1.000000e+00 : f32
    %65 = vector.broadcast %cst_29 : f32 to vector<64x256xf32>
    %66 = arith.subf %65, %64 : vector<64x256xf32>
    %67 = arith.mulf %39, %66 : vector<64x256xf32>
    %cst_30 = arith.constant 1.000000e+00 : f32
    %68 = vector.broadcast %cst_30 : f32 to vector<64x256xf32>
    %69 = arith.addf %68, %67 : vector<64x256xf32>
    %70 = arith.mulf %32, %69 : vector<64x256xf32>
    %71 = arith.truncf %70 : vector<64x256xf32> to vector<64x256xbf16>
    %c0_31 = arith.constant 0 : index
    %c0_32 = arith.constant 0 : index
    %72 = vector.load %arg7[%c0_31, %c0_32] : memref<256x64xbf16, #tpu.memory_space<vmem>>, vector<256x64xbf16>
    %cst_33 = arith.constant dense<0.000000e+00> : vector<64x64xf32>
    %73 = tpu.matmul %71, %72, %cst_33 {dimension_numbers = #tpu.dot_dimension_numbers<[1], [0], [0], [1], [0, 0, 1, 1], [], []>} : vector<64x256xbf16>, vector<256x64xbf16>, vector<64x64xf32> -> vector<64x64xf32>
    %c0_34 = arith.constant 0 : index
    %c0_35 = arith.constant 0 : index
    %74 = vector.load %arg8[%c0_34, %c0_35] : memref<1x64xf32, #tpu.memory_space<vmem>>, vector<1x64xf32>
    %75 = vector.broadcast %74 : vector<1x64xf32> to vector<64x64xf32>
    %76 = arith.addf %73, %75 : vector<64x64xf32>
    %77 = arith.addf %2, %76 : vector<64x64xf32>
    %c0_36 = arith.constant 0 : index
    %c0_37 = arith.constant 0 : index
    %78 = vector.load %arg9[%c0_36, %c0_37] : memref<64x64xf32, #tpu.memory_space<vmem>>, vector<64x64xf32>
    tpu.vector_store %arg9[%c0_36, %c0_37], %77 {strides = array<i32>} : memref<64x64xf32, #tpu.memory_space<vmem>>, vector<64x64xf32>,
    return
  }
  func.func @transform_0(%arg0: i32) -> (i32, i32) {
    %c0_i32 = arith.constant 0 : i32
    %c0_i32_0 = arith.constant 0 : i32
    return %arg0, %c0_i32 : i32, i32
  }
  func.func @transform_1(%arg0: i32) -> (i32, i32) {
    %c0_i32 = arith.constant 0 : i32
    %c0_i32_0 = arith.constant 0 : i32
    return %arg0, %c0_i32 : i32, i32
  }
  func.func @transform_2(%arg0: i32) -> (i32, i32) {
    %c0_i32 = arith.constant 0 : i32
    %c0_i32_0 = arith.constant 0 : i32
    %c0_i32_1 = arith.constant 0 : i32
    return %c0_i32, %c0_i32_0 : i32, i32
  }
  func.func @transform_3(%arg0: i32) -> (i32, i32) {
    %c0_i32 = arith.constant 0 : i32
    %c0_i32_0 = arith.constant 0 : i32
    %c0_i32_1 = arith.constant 0 : i32
    return %c0_i32, %c0_i32_0 : i32, i32
  }
  func.func @transform_4(%arg0: i32) -> (i32, i32) {
    %c0_i32 = arith.constant 0 : i32
    %c0_i32_0 = arith.constant 0 : i32
    %c0_i32_1 = arith.constant 0 : i32
    return %c0_i32, %c0_i32_0 : i32, i32
  }
  func.func @transform_5(%arg0: i32) -> (i32, i32) {
    %c0_i32 = arith.constant 0 : i32
    %c0_i32_0 = arith.constant 0 : i32
    %c0_i32_1 = arith.constant 0 : i32
    return %c0_i32, %c0_i32_0 : i32, i32
  }
  func.func @transform_6(%arg0: i32) -> (i32, i32) {
    %c0_i32 = arith.constant 0 : i32
    %c0_i32_0 = arith.constant 0 : i32
    %c0_i32_1 = arith.constant 0 : i32
    return %c0_i32, %c0_i32_0 : i32, i32
  }
  func.func @transform_7(%arg0: i32) -> (i32, i32) {
    %c0_i32 = arith.constant 0 : i32
    %c0_i32_0 = arith.constant 0 : i32
    %c0_i32_1 = arith.constant 0 : i32
    return %c0_i32, %c0_i32_0 : i32, i32
  }
  func.func @transform_8(%arg0: i32) -> (i32, i32) {
    %c0_i32 = arith.constant 0 : i32
    %c0_i32_0 = arith.constant 0 : i32
    return %arg0, %c0_i32 : i32, i32
  }
}

</mosaic_0001>

<bundles_post_ra>
// kernel: multiscale_block.3
= control target key start
LH: loop header
LB: loop body
LE: loop exit
PB: predicated region body
PF: predicated region fallthrough
CT: control target
= control target key end

     0   :  { %14 = vsyncpa [#allocation3], 0  ;;  %s3069_s0 = inlined_call_operand.hbm [shape: f32[512,32], index: 0, kind: input, shape index: {}]   ;;  %s3070_s1 = inlined_call_operand.vmem [shape: f32[1,32], index: 1, kind: input, shape index: {}]   ;;  %s3071_s2 = inlined_call_operand.vmem [shape: f32[1,32], index: 2, kind: input, shape index: {}]   ;;  %s3072_s3 = inlined_call_operand.vmem [shape: bf16[32,192], index: 3, kind: input, shape index: {}]   ;;  %s3073_s4 = inlined_call_operand.vmem [shape: f32[1,192], index: 4, kind: input, shape index: {}]   ;;  %s3074_s5 = inlined_call_operand.vmem [shape: bf16[32,64], index: 5, kind: input, shape index: {}]   ;;  %s3075_s6 = inlined_call_operand.vmem [shape: f32[1,64], index: 6, kind: input, shape index: {}]   ;;  %s3076_s7 = inlined_call_operand.vmem [shape: bf16[512,192], index: 7, kind: output, shape index: {0}]   ;;  %s3077_s8 = inlined_call_operand.vmem [shape: f32[512,64], index: 8, kind: output, shape index: {1}]  }
   0x1   :  { %16 = vsyncpa [#allocation3 + $0x1], 0  ;;  %s2121_s27 = smov 0   ;;  %s2123_s28 = smov 0  }
   0x2   :  { %s2125_s29 = smov 0   ;;  %s2127_s30 = smov 0  }
   0x3 LB: > { %s1713_s9 = sadd.s32 4294967295, %s2070_s30   ;;  %s2141_s10 = sadd.s32 1, %s2070_s30   ;;  %s2070_s30 = sphi %s2127_s30, %s3088_s30   ;;  %s2066_s29 = sphi %s2125_s29, %s3087_s29   ;;  %s2062_s28 = sphi %s2123_s28, %s3086_s28   ;;  %s2058_s27 = sphi %s2121_s27, %s3085_s27  }
   0x4   : > { %s26_s11 = ssub.s32 %s2070_s30, %s2141_s10  ;;  %s29_s12 = sadd.s32 1, %s2066_s29 }
   0x5   : > { %p27_p0 = scmp.eq.s32.totalorder %s26_s11, 0  ;;  %p36_p1 = scmp.ne.s32.totalorder %s2066_s29, %s2062_s28 }
   0x6   : > { %p37_p2 = scmp.eq.s32.totalorder %s2070_s30, 0  ;;  %p42_p3 = scmp.ne.s32.totalorder %s2062_s28, %s2058_s27 }
   0x7   : > { %s2151_s13 = scalar_select %p27_p0, %s2066_s29, %s29_s12  }
   0x8   : > { %p38_p4 = por %p37_p2, %p36_p1  ;;  %p43_p5 = scmp.eq.s32.totalorder %s1713_s9, 0 }
   0x9   : > { %p1900_p6 = scmp.lt.s32.totalorder %s2070_s30, 2  ;;  %s262_s15 = sand.u32 1, %s2066_s29  }
   0xa   : > { %p2156_p7 = por %p43_p5, %p42_p3  ;;  %s1717_s16 = sshll.u32 %s262_s15, 8 }
   0xb   : > { %s1802_s17 = sshll.u32 %s2070_s30, 12  ;;  %s266_s21 = scalar_lea.vmem [#allocation2], %s1717_s16 }
   0xc   : > { %s3079_s14 = scalar_select %p2156_p7, 1, 0 }
   0xd   : > { %s2165_s20 = scalar_lea.hbm %s3069_s0, %s1802_s17  ;;  %s273_s22 = sshll.u32 %s266_s21, 4  ;;  %s2167_s22 = int_to_ptr.vmem [resolvable:$true] %s273_s22 }
   0xe   : > { %p2169_p8 = pnand %p1900_p6, %p38_p4  ;;  %s2174_s24 = scalar_lea.sflag [#allocation3], %s262_s15 }
   0xf   : > { %s2008_s25 = scalar_lea.hbm %s2165_s20, 4096  ;;  %s2013_s11 = scalar_lea.hbm %s3069_s0, 8192 }
  0x10   : > { %p2009_p10 = scmp.ne.s32.totalorder %s2165_s20, %s2008_s25  ;;  %p2010_p11 = pneg %p2169_p8 }
  0x11   : > { %p2014_p0 = scmp.lt.s32.totalorder %s2165_s20, %s3069_s0  ;;  %p2015_p1 = scmp.lt.s32.totalorder %s2013_s11, %s2008_s25 }
  0x12   : > { %p2011_p12 = pnand %p2010_p11, %p2009_p10 }
  0x13   : > { %p2016_p2 = por %p2015_p1, %p2014_p0 }
  0x14   : > { %p2012_p13 = pneg %p2011_p12 }
  0x16   : > { %p2017_p3 = pnand %p2016_p2, %p2012_p13 }
  0x18   : > { %2020 = shalt.err (!%p2017_p3)
}
  0x19   : > { %s2021_s15 = scalar_lea.vmem %s2167_s22, 4096  ;;  %s2072_s17 = smov [#allocation2]  }
  0x1a   : > { %p2022_p4 = scmp.ne.s32.totalorder %s2167_s22, %s2021_s15  ;;  %s2026_s18 = sshll.u32 %s2072_s17, 4  ;;  %s2027_s18 = int_to_ptr.vmem [resolvable:$false] %s2026_s18 }
  0x1b   : > { %s2028_s19 = scalar_lea.vmem %s2027_s18, 8192  ;;  %p2029_p10 = scmp.lt.s32.totalorder %s2167_s22, %s2027_s18 }
  0x1c   : > { %p2024_p5 = pnand %p2022_p4, %p2010_p11  ;;  %p2030_p12 = scmp.lt.s32.totalorder %s2028_s19, %s2021_s15 }
  0x1e   : > { %p2025_p6 = pneg %p2024_p5  ;;  %p2031_p9 = por %p2030_p12, %p2029_p10 }
  0x20   : > { %p2032_p7 = pnand %p2031_p9, %p2025_p6 }
  0x22   : > { %2035 = shalt.err (!%p2032_p7)
}
  0x23   : > { %s2073_s21 = smov 128   ;;  %s2074_s25 = smov 8  }
  0x24   : > { %1899 = dma.hbm_to_vmem [thread:$0]  (!%p2169_p8), %s2165_s20, 4096, %s2167_s22, %s2174_s24, %s2073_s21, %s2073_s21, %s2074_s25  }
  0x25   : > { %p281_p11 = scmp.lt.s32.totalorder %s2070_s30, 3  ;;  %p3081_p13 = scmp.ge.s32.totalorder %s2070_s30, 1 }
  0x27   : > { %p282_p0 = pnand %p3081_p13, %p281_p11 }
  0x28   : > { %s287_s26 = sand.u32 (!%p282_p0), 1, %s2062_s28   ;;  %p3082_p7 = scmp.ne.s32.totalorder (!%p282_p0), %s3079_s14, 0 }
  0x29   : > { %285 = sbr.rel (%p282_p0) target bundleno = 657 (0x291), region = 48  ;;  %s1721_s27 = sshll.u32 (!%p282_p0), %s287_s26, 8 }
  0x2a   : > { %s288_s11 = scalar_lea.sflag (!%p282_p0), [#allocation3], %s287_s26  ;;  %s2199_s12 = scalar_lea.vmem (!%p282_p0), [#allocation2], %s1721_s27 }
  0x2e   : > { %2053 = dma.done.wait (%p3082_p7), %s288_s11, 4096  }
  0x2f   : > { %2055 = vsyncadd (%p3082_p7), %s288_s11, 4294963200  ;;  %vm379_vm0 = vcmask 261120   ;;  %v2206_v0 = vld [vmem:[%s2199_s12] sm:$0xff]  ;;  %v2212_v2 = vld [vmem:[%s2199_s12 + $0x8] sm:$0xff]  ;;  %s1722_s14 = sshll.u32 %s1713_s9, 5  ;;  %vm1358_vm1 = vcmask 1043456  }
  0x30   : > { %v2209_v1 = vld [vmem:[%s2199_s12 + $0xc0] sm:$0xff]  ;;  %v380_v3 = vsel %vm379_vm0, %v2206_v0, 0.0  ;;  %v2219_v5 = vld [vmem:[%s2199_s12 + $0xc8] sm:$0xff]  ;;  %v383_v6 = vsel %vm379_vm0, %v2212_v2, 0.0  ;;  %v2226_v8 = vld [vmem:[%s2199_s12 + $0x10] sm:$0xff]  ;;  %p332_p8 = scmp.lt.s32.totalorder %s1722_s14, 63 }
  0x31   : > { %v452_v4 = vsel %vm379_vm0, %v2209_v1, 0.0  ;;  %381 = vadd.xlane.f32.xlu0 %v380_v3  ;;  %v455_v7 = vsel %vm379_vm0, %v2219_v5, 0.0  ;;  %v2229_v9 = vld [vmem:[%s2199_s12 + $0x18] sm:$0xff]  ;;  %v386_v10 = vsel %vm379_vm0, %v2226_v8, 0.0  ;;  %v2236_v12 = vld [vmem:[%s2199_s12 + $0xd0] sm:$0xff]  ;;  %v2242_v14 = vld [vmem:[%s2199_s12 + $0x20] sm:$0xff] }
  0x32   : > { %453 = vadd.xlane.f32.xlu1 %v452_v4  ;;  %v389_v11 = vsel %vm379_vm0, %v2229_v9, 0.0  ;;  %v2239_v13 = vld [vmem:[%s2199_s12 + $0xd8] sm:$0xff]  ;;  %v2245_v15 = vld [vmem:[%s2199_s12 + $0x28] sm:$0xff]  ;;  %v458_v16 = vsel %vm379_vm0, %v2236_v12, 0.0  ;;  %v392_v18 = vsel %vm379_vm0, %v2242_v14, 0.0  ;;  %v2256_v20 = vld [vmem:[%s2199_s12 + $0xe0] sm:$0xff] }
  0x33   : > { %v461_v17 = vsel %vm379_vm0, %v2239_v13, 0.0  ;;  %v395_v19 = vsel %vm379_vm0, %v2245_v15, 0.0  ;;  %v2259_v21 = vld [vmem:[%s2199_s12 + $0xe8] sm:$0xff]  ;;  %v464_v22 = vsel %vm379_vm0, %v2256_v20, 0.0  ;;  %v2266_v24 = vld [vmem:[%s2199_s12 + $0x30] sm:$0xff]  ;;  %v2269_v25 = vld [vmem:[%s2199_s12 + $0x38] sm:$0xff] }
  0x34   : > { %v467_v23 = vsel %vm379_vm0, %v2259_v21, 0.0  ;;  %v398_v26 = vsel %vm379_vm0, %v2266_v24, 0.0  ;;  %v401_v27 = vsel %vm379_vm0, %v2269_v25, 0.0  ;;  %v2276_v28 = vld [vmem:[%s2199_s12 + $0xf0] sm:$0xff]  ;;  %v2279_v29 = vld [vmem:[%s2199_s12 + $0xf8] sm:$0xff]  ;;  %v2286_v32 = vld [vmem:[%s2199_s12 + $0x40] sm:$0xff] }
  0x35   : > { %384 = vadd.xlane.f32.xlu0 %v383_v6  ;;  %v470_v30 = vsel %vm379_vm0, %v2276_v28, 0.0  ;;  %v473_v31 = vsel %vm379_vm0, %v2279_v29, 0.0  ;;  %v2289_v33 = vld [vmem:[%s2199_s12 + $0x48] sm:$0xff]  ;;  %v404_v34 = vsel %vm379_vm0, %v2286_v32, 0.0  ;;  %v2296_v36 = vld [vmem:[%s2199_s12 + $0x50] sm:$0xff]  ;;  %v2299_v37 = vld [vmem:[%s2199_s12 + $0x58] sm:$0xff] }
  0x36   : > { %456 = vadd.xlane.f32.xlu1 %v455_v7  ;;  %v407_v35 = vsel %vm379_vm0, %v2289_v33, 0.0  ;;  %v410_v38 = vsel %vm379_vm0, %v2296_v36, 0.0  ;;  %v413_v39 = vsel %vm379_vm0, %v2299_v37, 0.0  ;;  %v2306_v40 = vld [vmem:[%s2199_s12 + $0x60] sm:$0xff]  ;;  %v2309_v41 = vld [vmem:[%s2199_s12 + $0x68] sm:$0xff]  ;;  %v2316_v44 = vld [vmem:[%s2199_s12 + $0x70] sm:$0xff] }
  0x37   : > { %v416_v42 = vsel %vm379_vm0, %v2306_v40, 0.0  ;;  %v419_v43 = vsel %vm379_vm0, %v2309_v41, 0.0  ;;  %v2319_v45 = vld [vmem:[%s2199_s12 + $0x78] sm:$0xff]  ;;  %v422_v46 = vsel %vm379_vm0, %v2316_v44, 0.0  ;;  %v2326_v48 = vld [vmem:[%s2199_s12 + $0x80] sm:$0xff]  ;;  %v2329_v49 = vld [vmem:[%s2199_s12 + $0x88] sm:$0xff] }
  0x38   : > { %v425_v47 = vsel %vm379_vm0, %v2319_v45, 0.0  ;;  %v428_v50 = vsel %vm379_vm0, %v2326_v48, 0.0  ;;  %v431_v51 = vsel %vm379_vm0, %v2329_v49, 0.0  ;;  %v2336_v52 = vld [vmem:[%s2199_s12 + $0x90] sm:$0xff]  ;;  %v2339_v53 = vld [vmem:[%s2199_s12 + $0x98] sm:$0xff]  ;;  %v2346_v56 = vld [vmem:[%s2199_s12 + $0xa0] sm:$0xff] }
  0x39   : > { %387 = vadd.xlane.f32.xlu0 %v386_v10  ;;  %v434_v54 = vsel %vm379_vm0, %v2336_v52, 0.0  ;;  %v437_v55 = vsel %vm379_vm0, %v2339_v53, 0.0  ;;  %v2349_v57 = vld [vmem:[%s2199_s12 + $0xa8] sm:$0xff]  ;;  %v440_v58 = vsel %vm379_vm0, %v2346_v56, 0.0  ;;  %v2356_v60 = vld [vmem:[%s2199_s12 + $0xb0] sm:$0xff]  ;;  %v2359_v61 = vld [vmem:[%s2199_s12 + $0xb8] sm:$0xff] }
  0x3a   : > { %390 = vadd.xlane.f32.xlu1 %v389_v11  ;;  %v443_v59 = vsel %vm379_vm0, %v2349_v57, 0.0  ;;  %v446_v62 = vsel %vm379_vm0, %v2356_v60, 0.0  ;;  %v449_v63 = vsel %vm379_vm0, %v2359_v61, 0.0  ;;  %s3090_s14 = smov (!%p332_p8, %s1722_s14), 63  ;;  %vm1359_vm2 = vcmask 523268  }
  0x3b   : > { %s1803_s23 = sshll.u32 %s3090_s14, 3  ;;  %vm2786_vm3 = vmor %vm1359_vm2, %vm1358_vm1  ;;  %vm1577_vm4 = vcmask 523264  }
  0x3c   : > { %s2784_s24 = scalar_lea.vmem %s3076_s7, %s1803_s23  ;;  %s2877_s19 = scalar_lea.vmem %s3077_s8, %s1803_s23 }
  0x3d   : > { %459 = vadd.xlane.f32.xlu0 %v458_v16 }
  0x3e   : > { %462 = vadd.xlane.f32.xlu1 %v461_v17 }
  0x41   : > { %393 = vadd.xlane.f32.xlu0 %v392_v18 }
  0x42   : > { %396 = vadd.xlane.f32.xlu1 %v395_v19 }
  0x45   : > { %465 = vadd.xlane.f32.xlu0 %v464_v22 }
  0x46   : > { %468 = vadd.xlane.f32.xlu1 %v467_v23 }
  0x49   : > { %399 = vadd.xlane.f32.xlu0 %v398_v26 }
  0x4a   : > { %402 = vadd.xlane.f32.xlu1 %v401_v27 }
  0x4d   : > { %471 = vadd.xlane.f32.xlu0 %v470_v30 }
  0x4e   : > { %474 = vadd.xlane.f32.xlu1 %v473_v31 }
  0x51   : > { %405 = vadd.xlane.f32.xlu0 %v404_v34 }
  0x52   : > { %408 = vadd.xlane.f32.xlu1 %v407_v35 }
  0x55   : > { %411 = vadd.xlane.f32.xlu0 %v410_v38 }
  0x56   : > { %414 = vadd.xlane.f32.xlu1 %v413_v39 }
  0x59   : > { %417 = vadd.xlane.f32.xlu0 %v416_v42 }
  0x5a   : > { %420 = vadd.xlane.f32.xlu1 %v419_v43 }
  0x5d   : > { %423 = vadd.xlane.f32.xlu0 %v422_v46 }
  0x5e   : > { %426 = vadd.xlane.f32.xlu1 %v425_v47 }
  0x61   : > { %429 = vadd.xlane.f32.xlu0 %v428_v50 }
  0x62   : > { %432 = vadd.xlane.f32.xlu1 %v431_v51 }
  0x65   : > { %435 = vadd.xlane.f32.xlu0 %v434_v54 }
  0x66   : > { %438 = vadd.xlane.f32.xlu1 %v437_v55 }
  0x69   : > { %441 = vadd.xlane.f32.xlu0 %v440_v58 }
  0x6a   : > { %444 = vadd.xlane.f32.xlu1 %v443_v59 }
  0x6d   : > { %447 = vadd.xlane.f32.xlu0 %v446_v62 }
  0x6e   : > { %450 = vadd.xlane.f32.xlu1 %v449_v63 }
  0xba   : > { %v382_v3 = vpop.xlane.xlu0 %381 }
  0xbb   : > { %v454_v4 = vpop.xlane.xlu1 %453  ;;  %v477_v6 = vmul.f32 0.03125, %v382_v3 }
  0xbc   : > { %v501_v7 = vmul.f32 0.03125, %v454_v4 }
  0xbd   : > { %v2366_v10 = vsub.f32 %v2206_v0, %v477_v6 }
  0xbe   : > { %v2369_v11 = vsub.f32 %v2209_v1, %v501_v7  ;;  %v385_v16 = vpop.xlane.xlu0 %384 }
  0xbf   : > { %v457_v17 = vpop.xlane.xlu1 %456  ;;  %v478_v18 = vmul.f32 0.03125, %v385_v16  ;;  %v541_v22 = vmul.f32 %v2366_v10, %v2366_v10 }
  0xc0   : > { %v502_v19 = vmul.f32 0.03125, %v457_v17  ;;  %v565_v23 = vmul.f32 %v2369_v11, %v2369_v11 }
  0xc1   : > { %v2376_v26 = vsub.f32 %v2212_v2, %v478_v18  ;;  %v573_v0 = vsel %vm379_vm0, %v541_v22, 0.0 }
  0xc2   : > { %v2379_v27 = vsub.f32 %v2219_v5, %v502_v19  ;;  %574 = vadd.xlane.f32.xlu0 %v573_v0  ;;  %v388_v1 = vpop.xlane.xlu0 %387  ;;  %v645_v31 = vsel %vm379_vm0, %v565_v23, 0.0 }
  0xc3   : > { %v391_v30 = vpop.xlane.xlu1 %390  ;;  %v479_v34 = vmul.f32 0.03125, %v388_v1  ;;  %v542_v38 = vmul.f32 %v2376_v26, %v2376_v26 }
  0xc4   : > { %v480_v35 = vmul.f32 0.03125, %v391_v30  ;;  %v566_v39 = vmul.f32 %v2379_v27, %v2379_v27 }
  0xc5   : > { %v2388_v2 = vsub.f32 %v2226_v8, %v479_v34  ;;  %v576_v42 = vsel %vm379_vm0, %v542_v38, 0.0 }
  0xc6   : > { %v2391_v5 = vsub.f32 %v2229_v9, %v480_v35  ;;  %646 = vadd.xlane.f32.xlu0 %v645_v31  ;;  %577 = vadd.xlane.f32.xlu1 %v576_v42  ;;  %v460_v43 = vpop.xlane.xlu0 %459  ;;  %v648_v47 = vsel %vm379_vm0, %v566_v39, 0.0 }
  0xc7   : > { %v463_v46 = vpop.xlane.xlu1 %462  ;;  %v503_v50 = vmul.f32 0.03125, %v460_v43  ;;  %v543_v54 = vmul.f32 %v2388_v2, %v2388_v2 }
  0xc8   : > { %v504_v51 = vmul.f32 0.03125, %v463_v46  ;;  %v544_v8 = vmul.f32 %v2391_v5, %v2391_v5 }
  0xc9   : > { %v2400_v55 = vsub.f32 %v2236_v12, %v503_v50  ;;  %v579_v58 = vsel %vm379_vm0, %v543_v54, 0.0 }
  0xca   : > { %v2403_v9 = vsub.f32 %v2239_v13, %v504_v51  ;;  %649 = vadd.xlane.f32.xlu1 %v648_v47  ;;  %580 = vadd.xlane.f32.xlu0 %v579_v58  ;;  %v394_v59 = vpop.xlane.xlu0 %393  ;;  %v582_v63 = vsel %vm379_vm0, %v544_v8, 0.0 }
  0xcb   : > { %v397_v62 = vpop.xlane.xlu1 %396  ;;  %v481_v3 = vmul.f32 0.03125, %v394_v59  ;;  %v567_v6 = vmul.f32 %v2400_v55, %v2400_v55 }
  0xcc   : > { %v482_v4 = vmul.f32 0.03125, %v397_v62  ;;  %v568_v12 = vmul.f32 %v2403_v9, %v2403_v9 }
  0xcd   : > { %v2412_v7 = vsub.f32 %v2242_v14, %v481_v3  ;;  %v651_v16 = vsel %vm379_vm0, %v567_v6, 0.0 }
  0xce   : > { %v2415_v13 = vsub.f32 %v2245_v15, %v482_v4  ;;  %583 = vadd.xlane.f32.xlu1 %v582_v63  ;;  %652 = vadd.xlane.f32.xlu0 %v651_v16  ;;  %v466_v17 = vpop.xlane.xlu0 %465  ;;  %v654_v19 = vsel %vm379_vm0, %v568_v12, 0.0 }
  0xcf   : > { %v469_v18 = vpop.xlane.xlu1 %468  ;;  %v505_v22 = vmul.f32 0.03125, %v466_v17  ;;  %v545_v0 = vmul.f32 %v2412_v7, %v2412_v7 }
  0xd0   : > { %v506_v23 = vmul.f32 0.03125, %v469_v18  ;;  %v546_v14 = vmul.f32 %v2415_v13, %v2415_v13 }
  0xd1   : > { %v2424_v1 = vsub.f32 %v2256_v20, %v505_v22  ;;  %v585_v30 = vsel %vm379_vm0, %v545_v0, 0.0 }
  0xd2   : > { %v2427_v15 = vsub.f32 %v2259_v21, %v506_v23  ;;  %655 = vadd.xlane.f32.xlu1 %v654_v19  ;;  %586 = vadd.xlane.f32.xlu0 %v585_v30  ;;  %v400_v31 = vpop.xlane.xlu0 %399  ;;  %v588_v35 = vsel %vm379_vm0, %v546_v14, 0.0 }
  0xd3   : > { %v403_v34 = vpop.xlane.xlu1 %402  ;;  %v483_v38 = vmul.f32 0.03125, %v400_v31  ;;  %v569_v42 = vmul.f32 %v2424_v1, %v2424_v1 }
  0xd4   : > { %v484_v39 = vmul.f32 0.03125, %v403_v34  ;;  %v570_v20 = vmul.f32 %v2427_v15, %v2427_v15 }
  0xd5   : > { %v2436_v43 = vsub.f32 %v2266_v24, %v483_v38  ;;  %v657_v46 = vsel %vm379_vm0, %v569_v42, 0.0 }
  0xd6   : > { %v2439_v21 = vsub.f32 %v2269_v25, %v484_v39  ;;  %589 = vadd.xlane.f32.xlu1 %v588_v35  ;;  %658 = vadd.xlane.f32.xlu0 %v657_v46  ;;  %v472_v47 = vpop.xlane.xlu0 %471  ;;  %v660_v51 = vsel %vm379_vm0, %v570_v20, 0.0  ;;  %v1936_v35 = vld [vmem:[%s3072_s3 + $0x14] ss:$8 sps:$4 sm:$0xff]  }
  0xd7   : > { %v475_v50 = vpop.xlane.xlu1 %474  ;;  %v507_v54 = vmul.f32 0.03125, %v472_v47  ;;  %v547_v58 = vmul.f32 %v2436_v43, %v2436_v43  ;;  %985 = vmatprep.subr.bf16.mxu0 %v1936_v35  ;;  %1890 = vmatprep.subr.bf16.mxu1 %v1936_v35 }
  0xd8   : > { %v508_v8 = vmul.f32 0.03125, %v475_v50  ;;  %v548_v24 = vmul.f32 %v2439_v21, %v2439_v21 }
  0xd9   : > { %v2448_v59 = vsub.f32 %v2276_v28, %v507_v54  ;;  %v591_v62 = vsel %vm379_vm0, %v547_v58, 0.0 }
  0xda   : > { %v2451_v25 = vsub.f32 %v2279_v29, %v508_v8  ;;  %661 = vadd.xlane.f32.xlu1 %v660_v51  ;;  %592 = vadd.xlane.f32.xlu0 %v591_v62  ;;  %v406_v63 = vpop.xlane.xlu0 %405  ;;  %v594_v4 = vsel %vm379_vm0, %v548_v24, 0.0  ;;  %v1939_v8 = vld [vmem:[%s3072_s3 + $0x4] ss:$8 sps:$4 sm:$0xff]  }
  0xdb   : > { %v409_v3 = vpop.xlane.xlu1 %408  ;;  %v485_v6 = vmul.f32 0.03125, %v406_v63  ;;  %v571_v16 = vmul.f32 %v2448_v59, %v2448_v59 }
  0xdc   : > { %v486_v12 = vmul.f32 0.03125, %v409_v3  ;;  %v572_v28 = vmul.f32 %v2451_v25, %v2451_v25 }
  0xdd   : > { %v2460_v17 = vsub.f32 %v2286_v32, %v485_v6  ;;  %v663_v18 = vsel %vm379_vm0, %v571_v16, 0.0 }
  0xde   : > { %v2463_v29 = vsub.f32 %v2289_v33, %v486_v12  ;;  %595 = vadd.xlane.f32.xlu1 %v594_v4  ;;  %664 = vadd.xlane.f32.xlu0 %v663_v18  ;;  %v412_v19 = vpop.xlane.xlu0 %411  ;;  %v666_v23 = vsel %vm379_vm0, %v572_v28, 0.0 }
  0xdf   : > { %v415_v22 = vpop.xlane.xlu1 %414  ;;  %v487_v0 = vmul.f32 0.03125, %v412_v19  ;;  %v549_v30 = vmul.f32 %v2460_v17, %v2460_v17 }
  0xe0   : > { %v488_v14 = vmul.f32 0.03125, %v415_v22  ;;  %v550_v32 = vmul.f32 %v2463_v29, %v2463_v29 }
  0xe1   : > { %v2472_v31 = vsub.f32 %v2296_v36, %v487_v0  ;;  %v597_v34 = vsel %vm379_vm0, %v549_v30, 0.0  ;;  %v1938_v36 = vld [vmem:[%s3072_s3 + $0x10] ss:$8 sps:$4 sm:$0xff]  }
  0xe2   : > { %v2475_v33 = vsub.f32 %v2299_v37, %v488_v14  ;;  %667 = vadd.xlane.f32.xlu1 %v666_v23  ;;  %598 = vadd.xlane.f32.xlu0 %v597_v34  ;;  %v418_v38 = vpop.xlane.xlu0 %417  ;;  %v600_v42 = vsel %vm379_vm0, %v550_v32, 0.0  ;;  %v2075_v14 = vmov 0  }
  0xe3   : > { %v421_v39 = vpop.xlane.xlu1 %420  ;;  %v489_v20 = vmul.f32 0.03125, %v418_v38  ;;  %v551_v37 = vmul.f32 %v2472_v31, %v2472_v31  ;;  %986 = vmatpush1.bf16.msra.mxu0 %v1938_v36  ;;  %1892 = vmatpush1.bf16.msra.mxu1 %v1938_v36 }
  0xe4   : > { %v490_v46 = vmul.f32 0.03125, %v421_v39  ;;  %v552_v47 = vmul.f32 %v2475_v33, %v2475_v33  ;;  %987 = vmatprep.subr.bf16.mxu0 %v1939_v8  ;;  %1891 = vmatprep.subr.bf16.mxu1 %v1939_v8 }
  0xe5   : > { %v2490_v50 = vsub.f32 %v2306_v40, %v489_v20  ;;  %v603_v54 = vsel %vm379_vm0, %v551_v37, 0.0  ;;  %v1941_v40 = vld [vmem:[%s3072_s3] ss:$8 sps:$4 sm:$0xff]   ;;  %1005 = vmatprep.mubr.bf16.mxu0 %v2075_v14  ;;  %1125 = vmatprep.mubr.bf16.mxu1 %v2075_v14 }
  0xe6   : > { %v2493_v51 = vsub.f32 %v2309_v41, %v490_v46  ;;  %601 = vadd.xlane.f32.xlu1 %v600_v42  ;;  %604 = vadd.xlane.f32.xlu0 %v603_v54  ;;  %v424_v58 = vpop.xlane.xlu0 %423  ;;  %v606_v62 = vsel %vm379_vm0, %v552_v47, 0.0  ;;  %v2543_v37 = vld [vmem:[%s3074_s5 + $0x8] sm:$0xff]  }
  0xe7   : > { %v427_v24 = vpop.xlane.xlu1 %426  ;;  %v491_v63 = vmul.f32 0.03125, %v424_v58  ;;  %v553_v41 = vmul.f32 %v2490_v50, %v2490_v50  ;;  %988 = vmatpush1.bf16.msra.mxu0 %v1941_v40  ;;  %1893 = vmatpush1.bf16.msra.mxu1 %v1941_v40 }
  0xe8   : > { %v492_v3 = vmul.f32 0.03125, %v427_v24  ;;  %v554_v4 = vmul.f32 %v2493_v51, %v2493_v51  ;;  %1854 = vmatprep.subr.bf16.mxu1 %v2543_v37 }
  0xe9   : > { %v2508_v6 = vsub.f32 %v2316_v44, %v491_v63  ;;  %v609_v16 = vsel %vm379_vm0, %v553_v41, 0.0 }
  0xea   : > { %v2511_v12 = vsub.f32 %v2319_v45, %v492_v3  ;;  %607 = vadd.xlane.f32.xlu1 %v606_v62  ;;  %610 = vadd.xlane.f32.xlu0 %v609_v16  ;;  %v430_v28 = vpop.xlane.xlu0 %429  ;;  %v612_v19 = vsel %vm379_vm0, %v554_v4, 0.0 }
  0xeb   : > { %v433_v18 = vpop.xlane.xlu1 %432  ;;  %v493_v22 = vmul.f32 0.03125, %v430_v28  ;;  %v555_v0 = vmul.f32 %v2508_v6, %v2508_v6 }
  0xec   : > { %v494_v23 = vmul.f32 0.03125, %v433_v18  ;;  %v556_v44 = vmul.f32 %v2511_v12, %v2511_v12 }
  0xed   : > { %v2522_v45 = vsub.f32 %v2326_v48, %v493_v22  ;;  %v615_v32 = vsel %vm379_vm0, %v555_v0, 0.0 }
  0xee   : > { %v2525_v30 = vsub.f32 %v2329_v49, %v494_v23  ;;  %613 = vadd.xlane.f32.xlu1 %v612_v19  ;;  %616 = vadd.xlane.f32.xlu0 %v615_v32  ;;  %v436_v34 = vpop.xlane.xlu0 %435  ;;  %v618_v38 = vsel %vm379_vm0, %v556_v44, 0.0 }
  0xef   : > { %v439_v35 = vpop.xlane.xlu1 %438  ;;  %v495_v39 = vmul.f32 0.03125, %v436_v34  ;;  %v557_v36 = vmul.f32 %v2522_v45, %v2522_v45 }
  0xf0   : > { %v496_v42 = vmul.f32 0.03125, %v439_v35  ;;  %v558_v48 = vmul.f32 %v2525_v30, %v2525_v30 }
  0xf1   : > { %v2534_v20 = vsub.f32 %v2336_v52, %v495_v39  ;;  %v621_v46 = vsel %vm379_vm0, %v557_v36, 0.0 }
  0xf2   : > { %v2537_v49 = vsub.f32 %v2339_v53, %v496_v42  ;;  %619 = vadd.xlane.f32.xlu1 %v618_v38  ;;  %622 = vadd.xlane.f32.xlu0 %v621_v46  ;;  %v442_v47 = vpop.xlane.xlu0 %441  ;;  %v624_v8 = vsel %vm379_vm0, %v558_v48, 0.0 }
  0xf3   : > { %v445_v54 = vpop.xlane.xlu1 %444  ;;  %v497_v58 = vmul.f32 0.03125, %v442_v47  ;;  %v559_v52 = vmul.f32 %v2534_v20, %v2534_v20 }
  0xf4   : > { %v498_v24 = vmul.f32 0.03125, %v445_v54  ;;  %v560_v53 = vmul.f32 %v2537_v49, %v2537_v49 }
  0xf5   : > { %v2552_v62 = vsub.f32 %v2346_v56, %v497_v58  ;;  %v627_v63 = vsel %vm379_vm0, %v559_v52, 0.0 }
  0xf6   : > { %v2555_v40 = vsub.f32 %v2349_v57, %v498_v24  ;;  %625 = vadd.xlane.f32.xlu1 %v624_v8  ;;  %628 = vadd.xlane.f32.xlu0 %v627_v63  ;;  %v448_v3 = vpop.xlane.xlu0 %447  ;;  %v630_v4 = vsel %vm379_vm0, %v560_v53, 0.0 }
  0xf7   : > { %v451_v41 = vpop.xlane.xlu1 %450  ;;  %v499_v16 = vmul.f32 0.03125, %v448_v3  ;;  %v561_v18 = vmul.f32 %v2552_v62, %v2552_v62 }
  0xf8   : > { %v500_v28 = vmul.f32 0.03125, %v451_v41  ;;  %v562_v56 = vmul.f32 %v2555_v40, %v2555_v40 }
  0xf9   : > { %v2564_v19 = vsub.f32 %v2356_v60, %v499_v16  ;;  %v633_v22 = vsel %vm379_vm0, %v561_v18, 0.0 }
  0xfa   : > { %v2567_v57 = vsub.f32 %v2359_v61, %v500_v28  ;;  %631 = vadd.xlane.f32.xlu1 %v630_v4  ;;  %634 = vadd.xlane.f32.xlu0 %v633_v22  ;;  %v636_v23 = vsel %vm379_vm0, %v562_v56, 0.0 }
  0xfb   : > { %v563_v0 = vmul.f32 %v2564_v19, %v2564_v19 }
  0xfc   : > { %v564_v44 = vmul.f32 %v2567_v57, %v2567_v57 }
  0xfd   : > { %v639_v32 = vsel %vm379_vm0, %v563_v0, 0.0 }
  0xfe   : > { %637 = vadd.xlane.f32.xlu1 %v636_v23  ;;  %640 = vadd.xlane.f32.xlu0 %v639_v32  ;;  %v642_v60 = vsel %vm379_vm0, %v564_v44, 0.0  ;;  %v2580_v32 = vld [vmem:[%s3070_s1] ss:$0 sm:$0xff] }
 0x102   : > { %643 = vadd.xlane.f32.xlu1 %v642_v60 }
 0x14b   : > { %v575_v61 = vpop.xlane.xlu0 %574 }
 0x14c   : > { %v669_v34 = vmul.f32 0.03125, %v575_v61 }
 0x14e   : > { %v701_v35 = vadd.f32 1e-06, %v669_v34 }
 0x14f   : > { %v578_v38 = vpop.xlane.xlu1 %577  ;;  %v647_v39 = vpop.xlane.xlu0 %646 }
 0x150   : > { %1944 = vrsqrt.f32 %v701_v35  ;;  %v670_v42 = vmul.f32 0.03125, %v578_v38  ;;  %v693_v36 = vmul.f32 0.03125, %v647_v39 }
 0x152   : > { %v702_v48 = vadd.f32 1e-06, %v670_v42  ;;  %v725_v46 = vadd.f32 1e-06, %v693_v36 }
 0x153   : > { %v650_v47 = vpop.xlane.xlu1 %649  ;;  %v581_v54 = vpop.xlane.xlu0 %580 }
 0x154   : > { %1946 = vrsqrt.f32 %v702_v48  ;;  %v694_v8 = vmul.f32 0.03125, %v650_v47  ;;  %v671_v58 = vmul.f32 0.03125, %v581_v54  ;;  %v2587_v47 = vld [vmem:[%s3071_s2] ss:$0 sm:$0xff] }
 0x155   : > { %1948 = vrsqrt.f32 %v725_v46 }
 0x156   : > { %v726_v24 = vadd.f32 1e-06, %v694_v8  ;;  %v703_v52 = vadd.f32 1e-06, %v671_v58 }
 0x157   : > { %v584_v53 = vpop.xlane.xlu1 %583  ;;  %v653_v63 = vpop.xlane.xlu0 %652 }
 0x158   : > { %1950 = vrsqrt.f32 %v726_v24  ;;  %v672_v3 = vmul.f32 0.03125, %v584_v53  ;;  %v695_v41 = vmul.f32 0.03125, %v653_v63 }
 0x159   : > { %1952 = vrsqrt.f32 %v703_v52 }
 0x15a   : > { %v704_v4 = vadd.f32 1e-06, %v672_v3  ;;  %v727_v16 = vadd.f32 1e-06, %v695_v41 }
 0x15b   : > { %v656_v28 = vpop.xlane.xlu1 %655  ;;  %v587_v18 = vpop.xlane.xlu0 %586 }
 0x15c   : > { %1954 = vrsqrt.f32 %v704_v4  ;;  %v696_v56 = vmul.f32 0.03125, %v656_v28  ;;  %v673_v22 = vmul.f32 0.03125, %v587_v18 }
 0x15d   : > { %v1945_v23 = vpop.eup %1944  ;;  %1956 = vrsqrt.f32 %v727_v16 }
 0x15e   : > { %v728_v0 = vadd.f32 1e-06, %v696_v56  ;;  %v705_v44 = vadd.f32 1e-06, %v673_v22  ;;  %v765_v60 = vmul.f32 %v1945_v23, %v2366_v10 }
 0x15f   : > { %v590_v61 = vpop.xlane.xlu1 %589  ;;  %v659_v34 = vpop.xlane.xlu0 %658 }
 0x160   : > { %1958 = vrsqrt.f32 %v728_v0  ;;  %v674_v35 = vmul.f32 0.03125, %v590_v61  ;;  %v697_v38 = vmul.f32 0.03125, %v659_v34  ;;  %v803_v42 = vmul.f32 %v2580_v32, %v765_v60 }
 0x161   : > { %v1947_v39 = vpop.eup %1946  ;;  %1960 = vrsqrt.f32 %v705_v44 }
 0x162   : > { %v1949_v36 = vpop.eup %1948  ;;  %v706_v48 = vadd.f32 1e-06, %v674_v35  ;;  %v729_v46 = vadd.f32 1e-06, %v697_v38  ;;  %v766_v54 = vmul.f32 %v1947_v39, %v2376_v26  ;;  %v841_v3 = vadd.f32 %v2587_v47, %v803_v42 }
 0x163   : > { %v662_v10 = vpop.xlane.xlu1 %661  ;;  %v593_v8 = vpop.xlane.xlu0 %592  ;;  %v789_v58 = vmul.f32 %v1949_v36, %v2369_v11 }
 0x164   : > { %1962 = vrsqrt.f32 %v706_v48  ;;  %v698_v24 = vmul.f32 0.03125, %v662_v10  ;;  %v675_v52 = vmul.f32 0.03125, %v593_v8  ;;  %v804_v53 = vmul.f32 %v2580_v32, %v766_v54 }
 0x165   : > { %v1951_v63 = vpop.eup %1950  ;;  %1964 = vrsqrt.f32 %v729_v46  ;;  %v827_v11 = vmul.f32 %v2580_v32, %v789_v58 }
 0x166   : > { %v1953_v41 = vpop.eup %1952  ;;  %v730_v4 = vadd.f32 1e-06, %v698_v24  ;;  %v707_v16 = vadd.f32 1e-06, %v675_v52  ;;  %v842_v28 = vadd.f32 %v2587_v47, %v804_v53  ;;  %v790_v26 = vmul.f32 %v1951_v63, %v2379_v27  ;;  %v1943_v52 = vld [vmem:[%s3074_s5] sm:$0xff]  }
 0x167   : > { %v596_v18 = vpop.xlane.xlu1 %595  ;;  %v665_v56 = vpop.xlane.xlu0 %664  ;;  %v767_v22 = vmul.f32 %v1953_v41, %v2388_v2  ;;  %v865_v36 = vadd.f32 %v2587_v47, %v827_v11 }
 0x168   : > { %1966 = vrsqrt.f32 %v730_v4  ;;  %v676_v23 = vmul.f32 0.03125, %v596_v18  ;;  %v699_v0 = vmul.f32 0.03125, %v665_v56  ;;  %v2597_v44 = vpack.c.bf16 %v842_v28, %v841_v3 }
 0x169   : > { %v1955_v60 = vpop.eup %1954  ;;  %1968 = vrsqrt.f32 %v707_v16  ;;  %v828_v61 = vmul.f32 %v2580_v32, %v790_v26  ;;  %v805_v34 = vmul.f32 %v2580_v32, %v767_v22 }
 0x16a   : > { %v1957_v35 = vpop.eup %1956  ;;  %v708_v38 = vadd.f32 1e-06, %v676_v23  ;;  %v731_v27 = vadd.f32 1e-06, %v699_v0  ;;  %1733 = vmatmul.mubr.msk.bf16.vlgmr.msra.gmra.mxu0 %vm379_vm0, %v2597_v44  ;;  %v768_v39 = vmul.f32 %v1955_v60, %v2391_v5 }
 0x16b   : > { %v668_v2 = vpop.xlane.xlu1 %667  ;;  %v599_v42 = vpop.xlane.xlu0 %598  ;;  %v866_v48 = vadd.f32 %v2587_v47, %v828_v61  ;;  %1015 = vmatprep.mubr.bf16.mxu0 %v2075_v14  ;;  %v791_v46 = vmul.f32 %v1957_v35, %v2400_v55  ;;  %v843_v5 = vadd.f32 %v2587_v47, %v805_v34 }
 0x16c   : > { %1970 = vrsqrt.f32 %v708_v38  ;;  %v700_v54 = vmul.f32 0.03125, %v668_v2  ;;  %v677_v10 = vmul.f32 0.03125, %v599_v42  ;;  %v806_v8 = vmul.f32 %v2580_v32, %v768_v39 }
 0x16d   : > { %v1959_v58 = vpop.eup %1958  ;;  %1972 = vrsqrt.f32 %v731_v27  ;;  %v2609_v24 = vpack.c.bf16 %v866_v48, %v865_v36  ;;  %v829_v28 = vmul.f32 %v2580_v32, %v791_v46 }
 0x16e   : > { %v1961_v53 = vpop.eup %1960  ;;  %v732_v63 = vadd.f32 1e-06, %v700_v54  ;;  %v709_v3 = vadd.f32 1e-06, %v677_v10  ;;  %v844_v55 = vadd.f32 %v2587_v47, %v806_v8  ;;  %v792_v41 = vmul.f32 %v1959_v58, %v2403_v9 }
 0x16f   : > { %1745 = vmatmul.mubr.msk.bf16.vlgmr.msra.gmra.mxu1 %vm379_vm0, %v2609_v24  ;;  %v602_v4 = vpop.xlane.xlu1 %601  ;;  %v605_v16 = vpop.xlane.xlu0 %604  ;;  %v769_v26 = vmul.f32 %v1961_v53, %v2412_v7  ;;  %v867_v35 = vadd.f32 %v2587_v47, %v829_v28 }
 0x170   : > { %1974 = vrsqrt.f32 %v732_v63  ;;  %1855 = vmatpush3.bf16.msra.mxu1 %v2543_v37  ;;  %v678_v18 = vmul.f32 0.03125, %v602_v4  ;;  %v679_v56 = vmul.f32 0.03125, %v605_v16  ;;  %v2622_v11 = vpack.c.bf16 %v844_v55, %v843_v5  ;;  %1135 = vmatprep.mubr.bf16.mxu1 %v2075_v14 }
 0x171   : > { %v1963_v22 = vpop.eup %1962  ;;  %1976 = vrsqrt.f32 %v709_v3  ;;  %v830_v9 = vmul.f32 %v2580_v32, %v792_v41  ;;  %1856 = vmatprep.subr.bf16.mxu1 %v1943_v52  ;;  %v807_v37 = vmul.f32 %v2580_v32, %v769_v26 }
 0x172   : > { %v1965_v23 = vpop.eup %1964  ;;  %v710_v0 = vadd.f32 1e-06, %v678_v18  ;;  %v711_v60 = vadd.f32 1e-06, %v679_v56  ;;  %1734 = vmatmul.mubr.msk.bf16.gmra.mxu0 %vm379_vm0, %v2622_v11  ;;  %v770_v7 = vmul.f32 %v1963_v22, %v2415_v13 }
 0x173   : > { %v608_v61 = vpop.xlane.xlu1 %607  ;;  %v611_v34 = vpop.xlane.xlu0 %610  ;;  %v868_v38 = vadd.f32 %v2587_v47, %v830_v9  ;;  %1025 = vmatprep.mubr.bf16.mxu0 %v2075_v14  ;;  %v793_v27 = vmul.f32 %v1965_v23, %v2424_v1  ;;  %v845_v54 = vadd.f32 %v2587_v47, %v807_v37 }
 0x174   : > { %1978 = vrsqrt.f32 %v710_v0  ;;  %v680_v39 = vmul.f32 0.03125, %v608_v61  ;;  %v808_v2 = vmul.f32 %v2580_v32, %v770_v7  ;;  %1857 = vmatpush3.bf16.msra.mxu1 %v1943_v52  ;;  %v681_v13 = vmul.f32 0.03125, %v611_v34 }
 0x175   : > { %v1967_v42 = vpop.eup %1966  ;;  %1980 = vrsqrt.f32 %v711_v60  ;;  %v2635_v36 = vpack.c.bf16 %v868_v38, %v867_v35  ;;  %v831_v5 = vmul.f32 %v2580_v32, %v793_v27 }
 0x176   : > { %v1969_v48 = vpop.eup %1968  ;;  %v712_v46 = vadd.f32 1e-06, %v680_v39  ;;  %v846_v10 = vadd.f32 %v2587_v47, %v808_v2  ;;  %v794_v8 = vmul.f32 %v1967_v42, %v2427_v15  ;;  %v713_v55 = vadd.f32 1e-06, %v681_v13 }
 0x177   : > { %1746 = vmatmul.mubr.msk.bf16.gmra.mxu1 %vm379_vm0, %v2635_v36  ;;  %v614_v1 = vpop.xlane.xlu1 %613  ;;  %v617_v58 = vpop.xlane.xlu0 %616  ;;  %v771_v52 = vmul.f32 %v1969_v48, %v2436_v43  ;;  %v869_v56 = vadd.f32 %v2587_v47, %v831_v5 }
 0x178   : > { %1982 = vrsqrt.f32 %v712_v46  ;;  %v682_v53 = vmul.f32 0.03125, %v614_v1  ;;  %v2644_v63 = vpack.c.bf16 %v846_v10, %v845_v54  ;;  %1145 = vmatprep.mubr.bf16.mxu1 %v2075_v14  ;;  %v832_v41 = vmul.f32 %v2580_v32, %v794_v8 }
 0x179   : > { %v1971_v3 = vpop.eup %1970  ;;  %v683_v16 = vmul.f32 0.03125, %v617_v58  ;;  %v809_v43 = vmul.f32 %v2580_v32, %v771_v52 }
 0x17a   : > { %v1973_v15 = vpop.eup %1972  ;;  %v714_v4 = vadd.f32 1e-06, %v682_v53  ;;  %1735 = vmatmul.mubr.msk.bf16.gmra.mxu0 %vm379_vm0, %v2644_v63  ;;  %v772_v28 = vmul.f32 %v1971_v3, %v2439_v21  ;;  %v870_v22 = vadd.f32 %v2587_v47, %v832_v41 }
 0x17b   : > { %v620_v26 = vpop.xlane.xlu1 %619  ;;  %v623_v18 = vpop.xlane.xlu0 %622  ;;  %1035 = vmatprep.mubr.bf16.mxu0 %v2075_v14  ;;  %v795_v9 = vmul.f32 %v1973_v15, %v2448_v59  ;;  %v715_v37 = vadd.f32 1e-06, %v683_v16  ;;  %v847_v61 = vadd.f32 %v2587_v47, %v809_v43 }
 0x17c   : > { %1984 = vrsqrt.f32 %v714_v4  ;;  %v684_v23 = vmul.f32 0.03125, %v620_v26  ;;  %v810_v0 = vmul.f32 %v2580_v32, %v772_v28  ;;  %v2657_v7 = vpack.c.bf16 %v870_v22, %v869_v56 }
 0x17d   : > { %v1975_v60 = vpop.eup %1974  ;;  %1986 = vrsqrt.f32 %v713_v55  ;;  %v833_v39 = vmul.f32 %v2580_v32, %v795_v9 }
 0x17e   : > { %v1977_v21 = vpop.eup %1976  ;;  %v848_v34 = vadd.f32 %v2587_v47, %v810_v0  ;;  %v796_v35 = vmul.f32 %v1975_v60, %v2451_v25  ;;  %v716_v38 = vadd.f32 1e-06, %v684_v23  ;;  %1988 = vrsqrt.f32 %v715_v37 }
 0x17f   : > { %1747 = vmatmul.mubr.msk.bf16.gmra.mxu1 %vm379_vm0, %v2657_v7  ;;  %v626_v59 = vpop.xlane.xlu1 %625  ;;  %v629_v27 = vpop.xlane.xlu0 %628  ;;  %v773_v2 = vmul.f32 %v1977_v21, %v2460_v17  ;;  %v685_v17 = vmul.f32 0.03125, %v623_v18  ;;  %v871_v52 = vadd.f32 %v2587_v47, %v833_v39 }
 0x180   : > { %v686_v42 = vmul.f32 0.03125, %v626_v59  ;;  %v687_v13 = vmul.f32 0.03125, %v629_v27  ;;  %v2666_v48 = vpack.c.bf16 %v848_v34, %v847_v61  ;;  %1155 = vmatprep.mubr.bf16.mxu1 %v2075_v14  ;;  %v834_v54 = vmul.f32 %v2580_v32, %v796_v35 }
 0x181   : > { %v1979_v46 = vpop.eup %1978  ;;  %v811_v25 = vmul.f32 %v2580_v32, %v773_v2  ;;  %1990 = vrsqrt.f32 %v716_v38  ;;  %v717_v22 = vadd.f32 1e-06, %v685_v17 }
 0x182   : > { %v1981_v10 = vpop.eup %1980  ;;  %v719_v8 = vadd.f32 1e-06, %v687_v13  ;;  %1736 = vmatmul.mubr.msk.bf16.gmra.mxu0 %vm379_vm0, %v2666_v48  ;;  %v774_v1 = vmul.f32 %v1979_v46, %v2463_v29  ;;  %v872_v53 = vadd.f32 %v2587_v47, %v834_v54  ;;  %v718_v3 = vadd.f32 1e-06, %v686_v42 }
 0x183   : > { %v632_v58 = vpop.xlane.xlu1 %631  ;;  %v635_v5 = vpop.xlane.xlu0 %634  ;;  %1045 = vmatprep.mubr.bf16.mxu0 %v2075_v14  ;;  %v849_v29 = vadd.f32 %v2587_v47, %v811_v25  ;;  %v775_v28 = vmul.f32 %v1981_v10, %v2472_v31 }
 0x184   : > { %v688_v55 = vmul.f32 0.03125, %v632_v58  ;;  %v689_v41 = vmul.f32 0.03125, %v635_v5  ;;  %v812_v15 = vmul.f32 %v2580_v32, %v774_v1  ;;  %1992 = vrsqrt.f32 %v719_v8 }
 0x185   : > { %v1983_v4 = vpop.eup %1982  ;;  %v2678_v16 = vpack.c.bf16 %v872_v53, %v871_v52  ;;  %v813_v35 = vmul.f32 %v2580_v32, %v775_v28 }
 0x186   : > { %v720_v43 = vadd.f32 1e-06, %v688_v55  ;;  %v721_v26 = vadd.f32 1e-06, %v689_v41  ;;  %v850_v18 = vadd.f32 %v2587_v47, %v812_v15  ;;  %v776_v56 = vmul.f32 %v1983_v4, %v2475_v33 }
 0x187   : > { %1748 = vmatmul.mubr.msk.bf16.gmra.mxu1 %vm379_vm0, %v2678_v16  ;;  %v638_v9 = vpop.xlane.xlu1 %637  ;;  %v641_v23 = vpop.xlane.xlu0 %640  ;;  %v851_v2 = vadd.f32 %v2587_v47, %v813_v35 }
 0x188   : > { %1994 = vrsqrt.f32 %v720_v43  ;;  %v690_v0 = vmul.f32 0.03125, %v638_v9  ;;  %1858 = vmatprep.mubr.msk.bf16.mxu1 %vm379_vm0, %v2597_v44  ;;  %v691_v60 = vmul.f32 0.03125, %v641_v23  ;;  %v877_v21 = vpack.c.bf16 %v850_v18, %v849_v29 }
 0x189   : > { %v1985_v31 = vpop.eup %1984  ;;  %1996 = vrsqrt.f32 %v721_v26  ;;  %v814_v37 = vmul.f32 %v2580_v32, %v776_v56 }
 0x18a   : > { %v1987_v61 = vpop.eup %1986  ;;  %1998 = vrsqrt.f32 %v718_v3  ;;  %v722_v33 = vadd.f32 1e-06, %v690_v0  ;;  %v723_v34 = vadd.f32 1e-06, %v691_v60  ;;  %1737 = vmatmul.mubr.msk.bf16.gmra.mxu0 %vm379_vm0, %v877_v21  ;;  %v778_v27 = vmul.f32 %v1985_v31, %v2493_v51 }
 0x18b   : > { %2000 = vrsqrt.f32 %v717_v22  ;;  %v644_v38 = vpop.xlane.xlu1 %643  ;;  %1055 = vmatprep.mubr.bf16.mxu0 %v2075_v14  ;;  %v852_v59 = vadd.f32 %v2587_v47, %v814_v37  ;;  %v777_v42 = vmul.f32 %v1987_v61, %v2490_v50  ;;  %v1989_v13 = vpop.eup %1988 }
 0x18c   : > { %2002 = vrsqrt.f32 %v722_v33  ;;  %v692_v44 = vmul.f32 0.03125, %v644_v38  ;;  %v816_v25 = vmul.f32 %v2580_v32, %v778_v27  ;;  %v779_v5 = vmul.f32 %v1989_v13, %v2508_v6 }
 0x18d   : > { %2004 = vrsqrt.f32 %v723_v34  ;;  %v878_v54 = vpack.c.bf16 %v852_v59, %v851_v2  ;;  %v815_v51 = vmul.f32 %v2580_v32, %v777_v42 }
 0x18e   : > { %v724_v39 = vadd.f32 1e-06, %v692_v44  ;;  %v1991_v46 = vpop.eup %1990  ;;  %v854_v8 = vadd.f32 %v2587_v47, %v816_v25 }
 0x18f   : > { %1859 = vmatmul.mubr.msk.bf16.vlgmr.msra.gmra.mxu1 %vm379_vm0, %v2622_v11  ;;  %v780_v11 = vmul.f32 %v1991_v46, %v2511_v12  ;;  %v853_v58 = vadd.f32 %v2587_v47, %v815_v51 }
 0x190   : > { %2006 = vrsqrt.f32 %v724_v39  ;;  %1862 = vmatprep.mubr.msk.bf16.mxu1 %vm379_vm0, %v2644_v63 }
 0x191   : > { %v1993_v10 = vpop.eup %1992  ;;  %v879_v12 = vpack.c.bf16 %v854_v8, %v853_v58  ;;  %v818_v41 = vmul.f32 %v2580_v32, %v780_v11 }
 0x192   : > { %1738 = vmatmul.mubr.msk.bf16.gmra.mxu0 %vm379_vm0, %v878_v54  ;;  %v783_v50 = vmul.f32 %v1993_v10, %v2534_v20 }
 0x193   : > { %1065 = vmatprep.mubr.bf16.mxu0 %v2075_v14  ;;  %v856_v18 = vadd.f32 %v2587_v47, %v818_v41 }
 0x194   : > { %v821_v17 = vmul.f32 %v2580_v32, %v783_v50 }
 0x195   : > { %v1995_v1 = vpop.eup %1994 }
 0x196   : > { %v1997_v63 = vpop.eup %1996  ;;  %v784_v52 = vmul.f32 %v1995_v1, %v2537_v49  ;;  %v859_v20 = vadd.f32 %v2587_v47, %v821_v17 }
 0x197   : > { %v1999_v53 = vpop.eup %1998  ;;  %1863 = vmatmul.mubr.msk.bf16.gmra.mxu1 %vm379_vm0, %v2666_v48  ;;  %v785_v3 = vmul.f32 %v1997_v63, %v2552_v62  ;;  %v817_v48 = vmul.f32 %v2580_v32, %v779_v5 }
 0x198   : > { %v2001_v55 = vpop.eup %2000  ;;  %1866 = vmatprep.mubr.msk.bf16.mxu1 %vm379_vm0, %v877_v21  ;;  %v822_v15 = vmul.f32 %v2580_v32, %v784_v52  ;;  %v782_v29 = vmul.f32 %v1999_v53, %v2525_v30 }
 0x199   : > { %v2003_v4 = vpop.eup %2002  ;;  %v823_v6 = vmul.f32 %v2580_v32, %v785_v3  ;;  %v781_v56 = vmul.f32 %v2001_v55, %v2522_v45  ;;  %v855_v0 = vadd.f32 %v2587_v47, %v817_v48 }
 0x19a   : > { %v2005_v49 = vpop.eup %2004  ;;  %1739 = vmatmul.mubr.msk.bf16.gmra.mxu0 %vm379_vm0, %v879_v12  ;;  %v860_v62 = vadd.f32 %v2587_v47, %v822_v15  ;;  %v786_v28 = vmul.f32 %v2003_v4, %v2555_v40  ;;  %v820_v40 = vmul.f32 %v2580_v32, %v782_v29 }
 0x19b   : > { %1075 = vmatprep.mubr.bf16.mxu0 %v2075_v14  ;;  %v861_v43 = vadd.f32 %v2587_v47, %v823_v6  ;;  %v787_v26 = vmul.f32 %v2005_v49, %v2564_v19  ;;  %v880_v45 = vpack.c.bf16 %v856_v18, %v855_v0  ;;  %v819_v31 = vmul.f32 %v2580_v32, %v781_v56 }
 0x19c   : > { %v882_v22 = vpack.c.bf16 %v860_v62, %v859_v20  ;;  %v824_v9 = vmul.f32 %v2580_v32, %v786_v28  ;;  %v858_v33 = vadd.f32 %v2587_v47, %v820_v40 }
 0x19d   : > { %v2007_v23 = vpop.eup %2006  ;;  %v825_v30 = vmul.f32 %v2580_v32, %v787_v26 }
 0x19e   : > { %v862_v60 = vadd.f32 %v2587_v47, %v824_v9  ;;  %v788_v21 = vmul.f32 %v2007_v23, %v2567_v57  ;;  %v857_v57 = vadd.f32 %v2587_v47, %v819_v31 }
 0x19f   : > { %1867 = vmatmul.mubr.msk.bf16.gmra.mxu1 %vm379_vm0, %v878_v54  ;;  %v863_v19 = vadd.f32 %v2587_v47, %v825_v30 }
 0x1a0   : > { %1870 = vmatprep.mubr.msk.bf16.mxu1 %vm379_vm0, %v879_v12  ;;  %v883_v37 = vpack.c.bf16 %v862_v60, %v861_v43  ;;  %v826_v61 = vmul.f32 %v2580_v32, %v788_v21  ;;  %v881_v38 = vpack.c.bf16 %v858_v33, %v857_v57  ;;  %v895_v32 = vlaneseq }
 0x1a2   : > { %1740 = vmatmul.mubr.msk.bf16.gmra.mxu0 %vm379_vm0, %v880_v45  ;;  %v864_v34 = vadd.f32 %v2587_v47, %v826_v61  ;;  %v896_v47 = vshrl.u32 %v895_v32, 7 }
 0x1a3   : > { %1085 = vmatprep.mubr.bf16.mxu0 %v2075_v14 }
 0x1a4   : > { %v884_v35 = vpack.c.bf16 %v864_v34, %v863_v19  ;;  %v901_v44 = vsub.s32 1, %v896_v47 }
 0x1a7   : > { %1871 = vmatmul.mubr.msk.bf16.gmra.mxu1 %vm379_vm0, %v880_v45 }
 0x1a8   : > { %1874 = vmatprep.mubr.msk.bf16.mxu1 %vm379_vm0, %v881_v38 }
 0x1aa   : > { %1741 = vmatmul.mubr.msk.bf16.gmra.mxu0 %vm379_vm0, %v881_v38 }
 0x1ab   : > { %1095 = vmatprep.mubr.bf16.mxu0 %v2075_v14 }
 0x1af   : > { %1875 = vmatmul.mubr.msk.bf16.gmra.mxu1 %vm379_vm0, %v882_v22 }
 0x1b0   : > { %1878 = vmatprep.mubr.msk.bf16.mxu1 %vm379_vm0, %v883_v37 }
 0x1b2   : > { %1742 = vmatmul.mubr.msk.bf16.gmra.mxu0 %vm379_vm0, %v882_v22 }
 0x1b3   : > { %1105 = vmatprep.mubr.bf16.mxu0 %v2075_v14 }
 0x1b7   : > { %1879 = vmatmul.mubr.msk.bf16.gmra.mxu1 %vm379_vm0, %v884_v35 }
 0x1b8   : > { %1882 = vmatprep.mubr.msk.bf16.mxu1 %vm379_vm0, %v2609_v24  ;;  %v897_v24 = vsub.s32 0, %v896_v47 }
 0x1ba   : > { %1743 = vmatmul.mubr.msk.bf16.gmra.mxu0 %vm379_vm0, %v883_v37 }
 0x1bb   : > { %1115 = vmatprep.mubr.bf16.mxu0 %v2075_v14  ;;  %v893_v14 = vld [vmem:[%s3073_s4] sm:$0x3] }
 0x1bf   : > { %1883 = vmatmul.mubr.msk.bf16.gmra.mxu1 %vm379_vm0, %v2635_v36  ;;  %v2772_v36 = vrot.slane %v893_v14, %v897_v24 }
 0x1c0   : > { %1886 = vmatprep.mubr.msk.bf16.mxu1 %vm379_vm0, %v2657_v7  ;;  %v2774_v7 = vrot.slane %v893_v14, %v901_v44 }
 0x1c2   : > { %1744 = vmatmul.mubr.msk.bf16.gmra.mxu0 %vm379_vm0, %v884_v35 }
 0x1c7   : > { %1887 = vmatmul.mubr.msk.bf16.gmra.mxu1 %vm379_vm0, %v2678_v16 }
 0x22a   : > { %v1007_v16 = vpop.f32.mrf.mxu0 }
 0x22b   : > { %v1008_v27 = vadd.f32 %v1007_v16, %v2772_v36 }
 0x22c   : > { %v1009_v59 = vpop.f32.mrf.mxu0 }
 0x22d   : > { %v1010_v39 = vadd.f32 %v1009_v59, %v2774_v7 }
 0x22e   : > { %v1011_v42 = vpop.f32.mrf.mxu0 }
 0x22f   : > { %v1804_v13 = vpack.c.bf16 %v1010_v39, %v1008_v27  ;;  %v1127_v46 = vpop.f32.mrf.mxu1  ;;  %v1012_v25 = vadd.f32 %v1011_v42, %v2772_v36 }
 0x230   : > { %v1013_v54 = vpop.f32.mrf.mxu0  ;;  %v1128_v50 = vadd.f32 %v1127_v46, %v2772_v36 }
 0x231   : > { %1361 = vst.msk [vmem:[%s2784_s24] sm:$0xff] %vm2786_vm3, %v1804_v13  ;;  %v1014_v10 = vadd.f32 %v1013_v54, %v2774_v7  ;;  %v1129_v51 = vpop.f32.mrf.mxu1 }
 0x232   : > { %v1130_v8 = vadd.f32 %v1129_v51, %v2774_v7  ;;  %v1017_v11 = vpop.f32.mrf.mxu0 }
 0x233   : > { %v1805_v1 = vpack.c.bf16 %v1014_v10, %v1012_v25  ;;  %v1131_v17 = vpop.f32.mrf.mxu1  ;;  %v1018_v5 = vadd.f32 %v1017_v11, %v2772_v36 }
 0x234   : > { %v1828_v63 = vpack.c.bf16 %v1130_v8, %v1128_v50  ;;  %v1019_v58 = vpop.f32.mrf.mxu0  ;;  %v1132_v20 = vadd.f32 %v1131_v17, %v2772_v36 }
 0x235   : > { %1362 = vst.msk [vmem:[%s2784_s24 + $0x8] sm:$0xff] %vm2786_vm3, %v1805_v1  ;;  %v1020_v52 = vadd.f32 %v1019_v58, %v2774_v7  ;;  %v1133_v53 = vpop.f32.mrf.mxu1 }
 0x236   : > { %1385 = vst.msk [vmem:[%s2784_s24 + $0xc0] sm:$0xff] %vm2786_vm3, %v1828_v63  ;;  %v1134_v3 = vadd.f32 %v1133_v53, %v2774_v7  ;;  %v1021_v55 = vpop.f32.mrf.mxu0  ;;  %v2865_v53 = vld [vmem:[%s3075_s6] ss:$0 sm:$0xff] }
 0x237   : > { %v1806_v12 = vpack.c.bf16 %v1020_v52, %v1018_v5  ;;  %v1137_v41 = vpop.f32.mrf.mxu1  ;;  %v1022_v6 = vadd.f32 %v1021_v55, %v2772_v36 }
 0x238   : > { %v1829_v15 = vpack.c.bf16 %v1134_v3, %v1132_v20  ;;  %v1023_v4 = vpop.f32.mrf.mxu0  ;;  %v1138_v29 = vadd.f32 %v1137_v41, %v2772_v36 }
 0x239   : > { %1363 = vst.msk [vmem:[%s2784_s24 + $0x10] sm:$0xff] %vm2786_vm3, %v1806_v12  ;;  %v1024_v49 = vadd.f32 %v1023_v4, %v2774_v7  ;;  %v1139_v48 = vpop.f32.mrf.mxu1 }
 0x23a   : > { %1386 = vst.msk [vmem:[%s2784_s24 + $0xc8] sm:$0xff] %vm2786_vm3, %v1829_v15  ;;  %v1140_v62 = vadd.f32 %v1139_v48, %v2774_v7  ;;  %v1027_v28 = vpop.f32.mrf.mxu0 }
 0x23b   : > { %v1807_v43 = vpack.c.bf16 %v1024_v49, %v1022_v6  ;;  %v1141_v26 = vpop.f32.mrf.mxu1  ;;  %v1028_v22 = vadd.f32 %v1027_v28, %v2772_v36 }
 0x23c   : > { %v1830_v18 = vpack.c.bf16 %v1140_v62, %v1138_v29  ;;  %v1029_v56 = vpop.f32.mrf.mxu0  ;;  %v1142_v30 = vadd.f32 %v1141_v26, %v2772_v36 }
 0x23d   : > { %1364 = vst.msk [vmem:[%s2784_s24 + $0x18] sm:$0xff] %vm2786_vm3, %v1807_v43  ;;  %v1030_v9 = vadd.f32 %v1029_v56, %v2774_v7  ;;  %v1143_v23 = vpop.f32.mrf.mxu1 }
 0x23e   : > { %1387 = vst.msk [vmem:[%s2784_s24 + $0xd0] sm:$0xff] %vm2786_vm3, %v1830_v18  ;;  %v1144_v0 = vadd.f32 %v1143_v23, %v2774_v7  ;;  %v1031_v40 = vpop.f32.mrf.mxu0 }
 0x23f   : > { %v1808_v60 = vpack.c.bf16 %v1030_v9, %v1028_v22  ;;  %v1147_v21 = vpop.f32.mrf.mxu1  ;;  %v1032_v31 = vadd.f32 %v1031_v40, %v2772_v36 }
 0x240   : > { %v1831_v19 = vpack.c.bf16 %v1144_v0, %v1142_v30  ;;  %v1033_v45 = vpop.f32.mrf.mxu0  ;;  %v1148_v33 = vadd.f32 %v1147_v21, %v2772_v36 }
 0x241   : > { %1365 = vst.msk [vmem:[%s2784_s24 + $0x20] sm:$0xff] %vm2786_vm3, %v1808_v60  ;;  %v1034_v37 = vadd.f32 %v1033_v45, %v2774_v7  ;;  %v1149_v61 = vpop.f32.mrf.mxu1 }
 0x242   : > { %1388 = vst.msk [vmem:[%s2784_s24 + $0xd8] sm:$0xff] %vm2786_vm3, %v1831_v19  ;;  %v1150_v34 = vadd.f32 %v1149_v61, %v2774_v7  ;;  %v1037_v57 = vpop.f32.mrf.mxu0 }
 0x243   : > { %v1809_v35 = vpack.c.bf16 %v1034_v37, %v1032_v31  ;;  %v1151_v38 = vpop.f32.mrf.mxu1  ;;  %v1038_v24 = vadd.f32 %v1037_v57, %v2772_v36 }
 0x244   : > { %v1832_v32 = vpack.c.bf16 %v1150_v34, %v1148_v33  ;;  %v1039_v47 = vpop.f32.mrf.mxu0  ;;  %v1152_v16 = vadd.f32 %v1151_v38, %v2772_v36 }
 0x245   : > { %1366 = vst.msk [vmem:[%s2784_s24 + $0x28] sm:$0xff] %vm2786_vm3, %v1809_v35  ;;  %v1040_v44 = vadd.f32 %v1039_v47, %v2774_v7  ;;  %v1153_v14 = vpop.f32.mrf.mxu1 }
 0x246   : > { %1389 = vst.msk [vmem:[%s2784_s24 + $0xe0] sm:$0xff] %vm2786_vm3, %v1832_v32  ;;  %v1154_v59 = vadd.f32 %v1153_v14, %v2774_v7  ;;  %v1041_v27 = vpop.f32.mrf.mxu0 }
 0x247   : > { %v1810_v39 = vpack.c.bf16 %v1040_v44, %v1038_v24  ;;  %v1157_v42 = vpop.f32.mrf.mxu1  ;;  %v1042_v54 = vadd.f32 %v1041_v27, %v2772_v36 }
 0x248   : > { %v1833_v13 = vpack.c.bf16 %v1154_v59, %v1152_v16  ;;  %v1043_v46 = vpop.f32.mrf.mxu0  ;;  %v1158_v51 = vadd.f32 %v1157_v42, %v2772_v36 }
 0x249   : > { %1367 = vst.msk [vmem:[%s2784_s24 + $0x30] sm:$0xff] %vm2786_vm3, %v1810_v39  ;;  %v1044_v25 = vadd.f32 %v1043_v46, %v2774_v7  ;;  %v1159_v10 = vpop.f32.mrf.mxu1 }
 0x24a   : > { %1390 = vst.msk [vmem:[%s2784_s24 + $0xe8] sm:$0xff] %vm2786_vm3, %v1833_v13  ;;  %v1160_v50 = vadd.f32 %v1159_v10, %v2774_v7  ;;  %v1047_v8 = vpop.f32.mrf.mxu0 }
 0x24b   : > { %v1811_v11 = vpack.c.bf16 %v1044_v25, %v1042_v54  ;;  %v1161_v1 = vpop.f32.mrf.mxu1  ;;  %v1048_v58 = vadd.f32 %v1047_v8, %v2772_v36 }
 0x24c   : > { %v1834_v17 = vpack.c.bf16 %v1160_v50, %v1158_v51  ;;  %v1049_v63 = vpop.f32.mrf.mxu0  ;;  %v1162_v20 = vadd.f32 %v1161_v1, %v2772_v36 }
 0x24d   : > { %1368 = vst.msk [vmem:[%s2784_s24 + $0x38] sm:$0xff] %vm2786_vm3, %v1811_v11  ;;  %v1050_v5 = vadd.f32 %v1049_v63, %v2774_v7  ;;  %v1163_v52 = vpop.f32.mrf.mxu1 }
 0x24e   : > { %1391 = vst.msk [vmem:[%s2784_s24 + $0xf0] sm:$0xff] %vm2786_vm3, %v1834_v17  ;;  %v1164_v3 = vadd.f32 %v1163_v52, %v2774_v7  ;;  %v1051_v55 = vpop.f32.mrf.mxu0 }
 0x24f   : > { %v1812_v12 = vpack.c.bf16 %v1050_v5, %v1048_v58  ;;  %v1860_v41 = vpop.f32.mrf.mxu1  ;;  %v1052_v49 = vadd.f32 %v1051_v55, %v2772_v36 }
 0x250   : > { %v1835_v15 = vpack.c.bf16 %v1164_v3, %v1162_v20  ;;  %v1459_v4 = vadd.f32 %v1860_v41, %v2865_v53  ;;  %v1053_v6 = vpop.f32.mrf.mxu0 }
 0x251   : > { %1369 = vst.msk [vmem:[%s2784_s24 + $0x40] sm:$0xff] %vm2786_vm3, %v1812_v12  ;;  %v1054_v48 = vadd.f32 %v1053_v6, %v2774_v7  ;;  %v1450_v29 = vpop.f32.mrf.mxu1 }
 0x252   : > { %1392 = vst.msk [vmem:[%s2784_s24 + $0xf8] sm:$0xff] %vm2786_vm3, %v1835_v15  ;;  %v1451_v62 = vadd.f32 %v2865_v53, %v1450_v29  ;;  %v1057_v28 = vpop.f32.mrf.mxu0 }
 0x253   : > { %1580 = vst.msk [vmem:[%s2877_s19 + $0x10] sm:$0xff] %vm1577_vm4, %v1459_v4  ;;  %v1813_v43 = vpack.c.bf16 %v1054_v48, %v1052_v49  ;;  %v1861_v26 = vpop.f32.mrf.mxu1  ;;  %v1058_v22 = vadd.f32 %v1057_v28, %v2772_v36 }
 0x254   : > { %1578 = vst.msk [vmem:[%s2877_s19] sm:$0xff] %vm1577_vm4, %v1451_v62  ;;  %v1462_v18 = vadd.f32 %v1861_v26, %v2865_v53  ;;  %v1059_v56 = vpop.f32.mrf.mxu0 }
 0x255   : > { %1370 = vst.msk [vmem:[%s2784_s24 + $0x48] sm:$0xff] %vm2786_vm3, %v1813_v43  ;;  %v1060_v9 = vadd.f32 %v1059_v56, %v2774_v7  ;;  %v1453_v23 = vpop.f32.mrf.mxu1 }
 0x256   : > { %1581 = vst.msk [vmem:[%s2877_s19 + $0x18] sm:$0xff] %vm1577_vm4, %v1462_v18  ;;  %v1454_v30 = vadd.f32 %v2865_v53, %v1453_v23  ;;  %v1061_v0 = vpop.f32.mrf.mxu0 }
 0x257   : > { %v1814_v40 = vpack.c.bf16 %v1060_v9, %v1058_v22  ;;  %v1864_v60 = vpop.f32.mrf.mxu1  ;;  %v1062_v45 = vadd.f32 %v1061_v0, %v2772_v36 }
 0x258   : > { %1579 = vst.msk [vmem:[%s2877_s19 + $0x8] sm:$0xff] %vm1577_vm4, %v1454_v30  ;;  %v1475_v21 = vadd.f32 %v1864_v60, %v2865_v53  ;;  %v1063_v19 = vpop.f32.mrf.mxu0 }
 0x259   : > { %1371 = vst.msk [vmem:[%s2784_s24 + $0x50] sm:$0xff] %vm2786_vm3, %v1814_v40  ;;  %v1064_v31 = vadd.f32 %v1063_v19, %v2774_v7  ;;  %v1466_v37 = vpop.f32.mrf.mxu1 }
 0x25a   : > { %1584 = vst.msk [vmem:[%s2877_s19 + $0x30] sm:$0xff] %vm1577_vm4, %v1475_v21  ;;  %v1467_v61 = vadd.f32 %v2865_v53, %v1466_v37  ;;  %v1067_v33 = vpop.f32.mrf.mxu0 }
 0x25b   : > { %v1815_v34 = vpack.c.bf16 %v1064_v31, %v1062_v45  ;;  %v1865_v57 = vpop.f32.mrf.mxu1  ;;  %v1068_v32 = vadd.f32 %v1067_v33, %v2772_v36 }
 0x25c   : > { %1582 = vst.msk [vmem:[%s2877_s19 + $0x20] sm:$0xff] %vm1577_vm4, %v1467_v61  ;;  %v1478_v35 = vadd.f32 %v1865_v57, %v2865_v53  ;;  %v1069_v38 = vpop.f32.mrf.mxu0 }
 0x25d   : > { %1372 = vst.msk [vmem:[%s2784_s24 + $0x58] sm:$0xff] %vm2786_vm3, %v1815_v34  ;;  %v1070_v47 = vadd.f32 %v1069_v38, %v2774_v7  ;;  %v1469_v24 = vpop.f32.mrf.mxu1 }
 0x25e   : > { %1585 = vst.msk [vmem:[%s2877_s19 + $0x38] sm:$0xff] %vm1577_vm4, %v1478_v35  ;;  %v1470_v44 = vadd.f32 %v2865_v53, %v1469_v24  ;;  %v1071_v14 = vpop.f32.mrf.mxu0 }
 0x25f   : > { %v1816_v16 = vpack.c.bf16 %v1070_v47, %v1068_v32  ;;  %v1868_v59 = vpop.f32.mrf.mxu1  ;;  %v1072_v42 = vadd.f32 %v1071_v14, %v2772_v36 }
 0x260   : > { %1583 = vst.msk [vmem:[%s2877_s19 + $0x28] sm:$0xff] %vm1577_vm4, %v1470_v44  ;;  %v1491_v27 = vadd.f32 %v1868_v59, %v2865_v53  ;;  %v1073_v39 = vpop.f32.mrf.mxu0 }
 0x261   : > { %1373 = vst.msk [vmem:[%s2784_s24 + $0x60] sm:$0xff] %vm2786_vm3, %v1816_v16  ;;  %v1074_v13 = vadd.f32 %v1073_v39, %v2774_v7  ;;  %v1482_v46 = vpop.f32.mrf.mxu1 }
 0x262   : > { %1588 = vst.msk [vmem:[%s2877_s19 + $0x50] sm:$0xff] %vm1577_vm4, %v1491_v27  ;;  %v1483_v54 = vadd.f32 %v2865_v53, %v1482_v46  ;;  %v1077_v25 = vpop.f32.mrf.mxu0 }
 0x263   : > { %v1817_v10 = vpack.c.bf16 %v1074_v13, %v1072_v42  ;;  %v1869_v51 = vpop.f32.mrf.mxu1  ;;  %v1078_v11 = vadd.f32 %v1077_v25, %v2772_v36 }
 0x264   : > { %1586 = vst.msk [vmem:[%s2877_s19 + $0x40] sm:$0xff] %vm1577_vm4, %v1483_v54  ;;  %v1494_v50 = vadd.f32 %v1869_v51, %v2865_v53  ;;  %v1079_v8 = vpop.f32.mrf.mxu0 }
 0x265   : > { %1374 = vst.msk [vmem:[%s2784_s24 + $0x68] sm:$0xff] %vm2786_vm3, %v1817_v10  ;;  %v1080_v1 = vadd.f32 %v1079_v8, %v2774_v7  ;;  %v1485_v17 = vpop.f32.mrf.mxu1 }
 0x266   : > { %1589 = vst.msk [vmem:[%s2877_s19 + $0x58] sm:$0xff] %vm1577_vm4, %v1494_v50  ;;  %v1486_v63 = vadd.f32 %v2865_v53, %v1485_v17  ;;  %v1081_v58 = vpop.f32.mrf.mxu0 }
 0x267   : > { %v1818_v5 = vpack.c.bf16 %v1080_v1, %v1078_v11  ;;  %v1872_v52 = vpop.f32.mrf.mxu1  ;;  %v1082_v55 = vadd.f32 %v1081_v58, %v2772_v36 }
 0x268   : > { %1587 = vst.msk [vmem:[%s2877_s19 + $0x48] sm:$0xff] %vm1577_vm4, %v1486_v63  ;;  %v1507_v20 = vadd.f32 %v1872_v52, %v2865_v53  ;;  %v1083_v3 = vpop.f32.mrf.mxu0 }
 0x269   : > { %1375 = vst.msk [vmem:[%s2784_s24 + $0x70] sm:$0xff] %vm2786_vm3, %v1818_v5  ;;  %v1084_v12 = vadd.f32 %v1083_v3, %v2774_v7  ;;  %v1498_v41 = vpop.f32.mrf.mxu1 }
 0x26a   : > { %1592 = vst.msk [vmem:[%s2877_s19 + $0x70] sm:$0xff] %vm1577_vm4, %v1507_v20  ;;  %v1499_v15 = vadd.f32 %v2865_v53, %v1498_v41  ;;  %v1087_v4 = vpop.f32.mrf.mxu0 }
 0x26b   : > { %v1819_v6 = vpack.c.bf16 %v1084_v12, %v1082_v55  ;;  %v1873_v49 = vpop.f32.mrf.mxu1  ;;  %v1088_v62 = vadd.f32 %v1087_v4, %v2772_v36 }
 0x26c   : > { %1590 = vst.msk [vmem:[%s2877_s19 + $0x60] sm:$0xff] %vm1577_vm4, %v1499_v15  ;;  %v1510_v48 = vadd.f32 %v1873_v49, %v2865_v53  ;;  %v1089_v29 = vpop.f32.mrf.mxu0 }
 0x26d   : > { %1376 = vst.msk [vmem:[%s2784_s24 + $0x78] sm:$0xff] %vm2786_vm3, %v1819_v6  ;;  %v1090_v28 = vadd.f32 %v1089_v29, %v2774_v7  ;;  %v1501_v43 = vpop.f32.mrf.mxu1 }
 0x26e   : > { %1593 = vst.msk [vmem:[%s2877_s19 + $0x78] sm:$0xff] %vm1577_vm4, %v1510_v48  ;;  %v1502_v26 = vadd.f32 %v2865_v53, %v1501_v43  ;;  %v1091_v18 = vpop.f32.mrf.mxu0 }
 0x26f   : > { %v1820_v56 = vpack.c.bf16 %v1090_v28, %v1088_v62  ;;  %v1876_v22 = vpop.f32.mrf.mxu1  ;;  %v1092_v30 = vadd.f32 %v1091_v18, %v2772_v36 }
 0x270   : > { %1591 = vst.msk [vmem:[%s2877_s19 + $0x68] sm:$0xff] %vm1577_vm4, %v1502_v26  ;;  %v1523_v9 = vadd.f32 %v1876_v22, %v2865_v53  ;;  %v1093_v23 = vpop.f32.mrf.mxu0 }
 0x271   : > { %1377 = vst.msk [vmem:[%s2784_s24 + $0x80] sm:$0xff] %vm2786_vm3, %v1820_v56  ;;  %v1094_v0 = vadd.f32 %v1093_v23, %v2774_v7  ;;  %v1514_v40 = vpop.f32.mrf.mxu1 }
 0x272   : > { %1596 = vst.msk [vmem:[%s2877_s19 + $0x90] sm:$0xff] %vm1577_vm4, %v1523_v9  ;;  %v1515_v60 = vadd.f32 %v2865_v53, %v1514_v40  ;;  %v1097_v21 = vpop.f32.mrf.mxu0 }
 0x273   : > { %v1821_v19 = vpack.c.bf16 %v1094_v0, %v1092_v30  ;;  %v1877_v45 = vpop.f32.mrf.mxu1  ;;  %v1098_v61 = vadd.f32 %v1097_v21, %v2772_v36 }
 0x274   : > { %1594 = vst.msk [vmem:[%s2877_s19 + $0x80] sm:$0xff] %vm1577_vm4, %v1515_v60  ;;  %v1526_v31 = vadd.f32 %v1877_v45, %v2865_v53  ;;  %v1099_v37 = vpop.f32.mrf.mxu0 }
 0x275   : > { %1378 = vst.msk [vmem:[%s2784_s24 + $0x88] sm:$0xff] %vm2786_vm3, %v1821_v19  ;;  %v1100_v33 = vadd.f32 %v1099_v37, %v2774_v7  ;;  %v1517_v34 = vpop.f32.mrf.mxu1 }
 0x276   : > { %1597 = vst.msk [vmem:[%s2877_s19 + $0x98] sm:$0xff] %vm1577_vm4, %v1526_v31  ;;  %v1518_v57 = vadd.f32 %v2865_v53, %v1517_v34  ;;  %v1101_v35 = vpop.f32.mrf.mxu0 }
 0x277   : > { %v1822_v38 = vpack.c.bf16 %v1100_v33, %v1098_v61  ;;  %v1880_v32 = vpop.f32.mrf.mxu1  ;;  %v1102_v44 = vadd.f32 %v1101_v35, %v2772_v36 }
 0x278   : > { %1595 = vst.msk [vmem:[%s2877_s19 + $0x88] sm:$0xff] %vm1577_vm4, %v1518_v57  ;;  %v1539_v47 = vadd.f32 %v1880_v32, %v2865_v53  ;;  %v1103_v24 = vpop.f32.mrf.mxu0 }
 0x279   : > { %1379 = vst.msk [vmem:[%s2784_s24 + $0x90] sm:$0xff] %vm2786_vm3, %v1822_v38  ;;  %v1104_v14 = vadd.f32 %v1103_v24, %v2774_v7  ;;  %v1530_v16 = vpop.f32.mrf.mxu1 }
 0x27a   : > { %1600 = vst.msk [vmem:[%s2877_s19 + $0xb0] sm:$0xff] %vm1577_vm4, %v1539_v47  ;;  %v1531_v59 = vadd.f32 %v2865_v53, %v1530_v16  ;;  %v1107_v27 = vpop.f32.mrf.mxu0 }
 0x27b   : > { %v1823_v39 = vpack.c.bf16 %v1104_v14, %v1102_v44  ;;  %v1881_v42 = vpop.f32.mrf.mxu1  ;;  %v1108_v54 = vadd.f32 %v1107_v27, %v2772_v36 }
 0x27c   : > { %1598 = vst.msk [vmem:[%s2877_s19 + $0xa0] sm:$0xff] %vm1577_vm4, %v1531_v59  ;;  %v1542_v13 = vadd.f32 %v1881_v42, %v2865_v53  ;;  %v1109_v46 = vpop.f32.mrf.mxu0 }
 0x27d   : > { %1380 = vst.msk [vmem:[%s2784_s24 + $0x98] sm:$0xff] %vm2786_vm3, %v1823_v39  ;;  %v1110_v25 = vadd.f32 %v1109_v46, %v2774_v7  ;;  %v1533_v10 = vpop.f32.mrf.mxu1 }
 0x27e   : > { %1601 = vst.msk [vmem:[%s2877_s19 + $0xb8] sm:$0xff] %vm1577_vm4, %v1542_v13  ;;  %v1534_v51 = vadd.f32 %v2865_v53, %v1533_v10  ;;  %v1111_v50 = vpop.f32.mrf.mxu0 }
 0x27f   : > { %v1824_v8 = vpack.c.bf16 %v1110_v25, %v1108_v54  ;;  %v1884_v11 = vpop.f32.mrf.mxu1  ;;  %v1112_v63 = vadd.f32 %v1111_v50, %v2772_v36 }
 0x280   : > { %1599 = vst.msk [vmem:[%s2877_s19 + $0xa8] sm:$0xff] %vm1577_vm4, %v1534_v51  ;;  %v1555_v1 = vadd.f32 %v1884_v11, %v2865_v53  ;;  %v1113_v17 = vpop.f32.mrf.mxu0 }
 0x281   : > { %1381 = vst.msk [vmem:[%s2784_s24 + $0xa0] sm:$0xff] %vm2786_vm3, %v1824_v8  ;;  %v1114_v58 = vadd.f32 %v1113_v17, %v2774_v7  ;;  %v1546_v5 = vpop.f32.mrf.mxu1 }
 0x282   : > { %1604 = vst.msk [vmem:[%s2877_s19 + $0xd0] sm:$0xff] %vm1577_vm4, %v1555_v1  ;;  %v1547_v52 = vadd.f32 %v2865_v53, %v1546_v5  ;;  %v1117_v20 = vpop.f32.mrf.mxu0 }
 0x283   : > { %v1825_v3 = vpack.c.bf16 %v1114_v58, %v1112_v63  ;;  %v1885_v55 = vpop.f32.mrf.mxu1  ;;  %v1118_v15 = vadd.f32 %v1117_v20, %v2772_v36 }
 0x284   : > { %1602 = vst.msk [vmem:[%s2877_s19 + $0xc0] sm:$0xff] %vm1577_vm4, %v1547_v52  ;;  %v1558_v12 = vadd.f32 %v1885_v55, %v2865_v53  ;;  %v1119_v41 = vpop.f32.mrf.mxu0 }
 0x285   : > { %1382 = vst.msk [vmem:[%s2784_s24 + $0xa8] sm:$0xff] %vm2786_vm3, %v1825_v3  ;;  %v1120_v4 = vadd.f32 %v1119_v41, %v2774_v7  ;;  %v1549_v6 = vpop.f32.mrf.mxu1 }
 0x286   : > { %1605 = vst.msk [vmem:[%s2877_s19 + $0xd8] sm:$0xff] %vm1577_vm4, %v1558_v12  ;;  %v1550_v49 = vadd.f32 %v2865_v53, %v1549_v6  ;;  %v1121_v48 = vpop.f32.mrf.mxu0 }
 0x287   : > { %v1826_v29 = vpack.c.bf16 %v1120_v4, %v1118_v15  ;;  %v1888_v62 = vpop.f32.mrf.mxu1  ;;  %v1122_v26 = vadd.f32 %v1121_v48, %v2772_v36 }
 0x288   : > { %1603 = vst.msk [vmem:[%s2877_s19 + $0xc8] sm:$0xff] %vm1577_vm4, %v1550_v49  ;;  %v1571_v28 = vadd.f32 %v1888_v62, %v2865_v53  ;;  %v1123_v43 = vpop.f32.mrf.mxu0 }
 0x289   : > { %1383 = vst.msk [vmem:[%s2784_s24 + $0xb0] sm:$0xff] %vm2786_vm3, %v1826_v29  ;;  %v1124_v18 = vadd.f32 %v1123_v43, %v2774_v7  ;;  %v1562_v56 = vpop.f32.mrf.mxu1 }
 0x28a   : > { %1608 = vst.msk [vmem:[%s2877_s19 + $0xf0] sm:$0xff] %vm1577_vm4, %v1571_v28  ;;  %v1563_v22 = vadd.f32 %v2865_v53, %v1562_v56 }
 0x28b   : > { %v1827_v9 = vpack.c.bf16 %v1124_v18, %v1122_v26  ;;  %v1889_v23 = vpop.f32.mrf.mxu1 }
 0x28c   : > { %1606 = vst.msk [vmem:[%s2877_s19 + $0xe0] sm:$0xff] %vm1577_vm4, %v1563_v22  ;;  %v1574_v30 = vadd.f32 %v1889_v23, %v2865_v53 }
 0x28d   : > { %1384 = vst.msk [vmem:[%s2784_s24 + $0xb8] sm:$0xff] %vm2786_vm3, %v1827_v9  ;;  %v1565_v0 = vpop.f32.mrf.mxu1 }
 0x28e   : > { %1609 = vst.msk [vmem:[%s2877_s19 + $0xf8] sm:$0xff] %vm1577_vm4, %v1574_v30  ;;  %v1566_v36 = vadd.f32 %v2865_v53, %v1565_v0 }
 0x290   : > { %1607 = vst.msk [vmem:[%s2877_s19 + $0xe8] sm:$0xff] %vm1577_vm4, %v1566_v36 }
 0x291 PF: > { %p19_p9 = scmp.ge.s32.totalorder %s2141_s10, 4   ;;  %s3085_s27 = smov %s2062_s28 }
 0x292   : > { %s3086_s28 = smov %s2066_s29  ;;  %s3087_s29 = smov %s2151_s13 }
 0x293   : > { %s3088_s30 = smov %s2141_s10  ;;  %21 = sbr.rel (!%p19_p9) target bundleno = 3 (0x3), region = 100 }
 0x298   :  { %1651 = vsyncpa [#allocation3], 1 }
 0x299   :  { %1653 = vsyncpa [#allocation3 + $0x1], 1 }

// kernel: multiscale_block.4
= control target key start
LH: loop header
LB: loop body
LE: loop exit
PB: predicated region body
PF: predicated region fallthrough
CT: control target
= control target key end

     0   :  { %s2743_s18 = smov 0   ;;  %s3137_s0 = inlined_call_operand.vmem [shape: bf16[8,2,16,32], index: 0, kind: input, shape index: {}]   ;;  %s3138_s1 = inlined_call_operand.vmem [shape: bf16[8,2,64,32], index: 1, kind: input, shape index: {}]   ;;  %s3139_s2 = inlined_call_operand.vmem [shape: bf16[8,2,64,32], index: 2, kind: input, shape index: {}]   ;;  %s3140_s3 = inlined_call_operand.vmem [shape: bf16[64,64], index: 3, kind: input, shape index: {}]   ;;  %s3141_s4 = inlined_call_operand.vmem [shape: f32[1,64], index: 4, kind: input, shape index: {}]   ;;  %s3142_s5 = inlined_call_operand.vmem [shape: f32[8,16,64], index: 5, kind: output, shape index: {}]  }
   0x1 LB: > { %s2121_s19 = sadd.s32 4294967295, %s2709_s18   ;;  %p2125_p0 = scmp.ge.s32.totalorder %s2709_s18, 1  ;;  %s2709_s18 = sphi %s2743_s18, %s15_s18  }
   0x2   : > { %p213_p1 = scmp.lt.s32.totalorder %s2709_s18, 3 }
   0x4   : > { %p214_p2 = pnand %p2125_p0, %p213_p1 }
   0x5   : > { %s2126_s20 = sshll.u32 (!%p214_p2), %s2121_s19, 2 }
   0x6   : > { %217 = sbr.rel (%p214_p2) target bundleno = 910 (0x38e), region = 40  ;;  %p256_p3 = scmp.lt.s32.totalorder (!%p214_p2), %s2126_s20, 7 }
   0xb   : > { %v2711_v0 = vmov 0.0   ;;  %vm2712_vm0 = vmmov 0   ;;  %s3144_s20 = smov (!%p256_p3, %s2126_s20), 7  ;;  %vm453_vm1 = vcmask 261120   ;;  %vm1093_vm2 = vcmask 523264  }
   0xc   : > { %2337 = vmatprep.subr.bf16.mxu0 %v2711_v0  ;;  %2349 = vmatprep.subr.bf16.mxu1 %v2711_v0  ;;  %s2242_s21 = sshll.u32 %s3144_s20, 6  ;;  %s2241_s25 = sshll.u32 %s3144_s20, 4 }
   0xd   : > { %2345 = vmatprep.mubr.msk.bf16.mxu0 %vm2712_vm0, %v2711_v0  ;;  %2357 = vmatprep.mubr.msk.bf16.mxu1 %vm2712_vm0, %v2711_v0  ;;  %s2765_s24 = scalar_lea.vmem %s3138_s1, %s2242_s21  ;;  %s2781_s28 = scalar_lea.vmem %s3137_s0, %s2241_s25 }
   0xe   : > { %v2563_v1 = vld [vmem:[%s2765_s24 + $0x18] sm:$0xff]   ;;  %v2565_v5 = vld [vmem:[%s2765_s24 + $0x10] sm:$0xff]   ;;  %v2567_v9 = vld [vmem:[%s2765_s24 + $0x8] sm:$0xff]   ;;  %s2828_s6 = scalar_lea.vmem %s3139_s2, %s2242_s21  ;;  %s3116_s21 = scalar_lea.vmem %s3142_s5, %s2241_s25 }
   0xf   : > { %v2564_v2 = vld [vmem:[%s2765_s24 + $0x38] sm:$0xff]   ;;  %v467_v3 = vsel %vm453_vm1, %v2563_v1, 0  ;;  %v2566_v6 = vld [vmem:[%s2765_s24 + $0x30] sm:$0xff]   ;;  %v464_v7 = vsel %vm453_vm1, %v2565_v5, 0  ;;  %v2568_v10 = vld [vmem:[%s2765_s24 + $0x28] sm:$0xff]   ;;  %v461_v11 = vsel %vm453_vm1, %v2567_v9, 0 }
  0x10   : > { %2338 = vmatpush3.bf16.xpose.msra.mxu0 %v467_v3  ;;  %v548_v4 = vsel %vm453_vm1, %v2564_v2, 0  ;;  %v545_v8 = vsel %vm453_vm1, %v2566_v6, 0  ;;  %v542_v12 = vsel %vm453_vm1, %v2568_v10, 0  ;;  %v2569_v13 = vld [vmem:[%s2765_s24] sm:$0xff]   ;;  %v2573_v18 = vld [vmem:[%s2765_s24 + $0x58] sm:$0xff]   ;;  %v2572_v20 = vld [vmem:[%s2781_s28 + $0x8] sm:$0xff]  }
  0x11   : > { %2350 = vmatpush3.bf16.xpose.msra.mxu1 %v548_v4  ;;  %2339 = vmatprep.subr.bf16.mxu0 %v2711_v0  ;;  %v2570_v14 = vld [vmem:[%s2765_s24 + $0x20] sm:$0xff]   ;;  %v458_v15 = vsel %vm453_vm1, %v2569_v13, 0  ;;  %v2574_v19 = vld [vmem:[%s2765_s24 + $0x78] sm:$0xff]   ;;  %v2575_v21 = vld [vmem:[%s2765_s24 + $0x50] sm:$0xff]   ;;  %v629_v23 = vsel %vm453_vm1, %v2573_v18, 0 }
  0x12   : > { %2351 = vmatprep.subr.bf16.mxu1 %v2711_v0  ;;  %v539_v16 = vsel %vm453_vm1, %v2570_v14, 0  ;;  %v2571_v17 = vld [vmem:[%s2781_s28] sm:$0xff]   ;;  %v2576_v22 = vld [vmem:[%s2765_s24 + $0x70] sm:$0xff]   ;;  %v2577_v24 = vld [vmem:[%s2765_s24 + $0x48] sm:$0xff]   ;;  %v710_v25 = vsel %vm453_vm1, %v2574_v19, 0  ;;  %v626_v29 = vsel %vm453_vm1, %v2575_v21, 0 }
  0x13   : > { %v2578_v26 = vld [vmem:[%s2765_s24 + $0x68] sm:$0xff]   ;;  %v2579_v27 = vld [vmem:[%s2765_s24 + $0x40] sm:$0xff]   ;;  %v707_v30 = vsel %vm453_vm1, %v2576_v22, 0  ;;  %v623_v31 = vsel %vm453_vm1, %v2577_v24, 0  ;;  %v2583_v35 = vld [vmem:[%s2765_s24 + $0x98] sm:$0xff]  }
  0x14   : > { %v2580_v28 = vld [vmem:[%s2765_s24 + $0x60] sm:$0xff]   ;;  %v704_v32 = vsel %vm453_vm1, %v2578_v26, 0  ;;  %v620_v33 = vsel %vm453_vm1, %v2579_v27, 0  ;;  %v2584_v36 = vld [vmem:[%s2765_s24 + $0xb8] sm:$0xff]   ;;  %v2581_v37 = vld [vmem:[%s2781_s28 + $0x10] sm:$0xff]   ;;  %v791_v39 = vsel %vm453_vm1, %v2583_v35, 0 }
  0x15   : > { %v701_v34 = vsel %vm453_vm1, %v2580_v28, 0  ;;  %v2582_v38 = vld [vmem:[%s2781_s28 + $0x18] sm:$0xff]   ;;  %v872_v40 = vsel %vm453_vm1, %v2584_v36, 0  ;;  %v2585_v41 = vld [vmem:[%s2765_s24 + $0x90] sm:$0xff]   ;;  %v2587_v45 = vld [vmem:[%s2765_s24 + $0x88] sm:$0xff]  }
  0x16   : > { %v2586_v42 = vld [vmem:[%s2765_s24 + $0xb0] sm:$0xff]   ;;  %v788_v43 = vsel %vm453_vm1, %v2585_v41, 0  ;;  %v2588_v46 = vld [vmem:[%s2765_s24 + $0xa8] sm:$0xff]   ;;  %v785_v47 = vsel %vm453_vm1, %v2587_v45, 0  ;;  %v2589_v49 = vld [vmem:[%s2765_s24 + $0x80] sm:$0xff]  }
  0x17   : > { %v869_v44 = vsel %vm453_vm1, %v2586_v42, 0  ;;  %v866_v48 = vsel %vm453_vm1, %v2588_v46, 0  ;;  %v2590_v50 = vld [vmem:[%s2765_s24 + $0xa0] sm:$0xff]   ;;  %v782_v51 = vsel %vm453_vm1, %v2589_v49, 0  ;;  %v2593_v53 = vld [vmem:[%s2765_s24 + $0xd8] sm:$0xff]   ;;  %v2592_v56 = vld [vmem:[%s2781_s28 + $0x28] sm:$0xff]  }
  0x18   : > { %2340 = vmatpush3.bf16.xpose.msra.mxu0 %v464_v7  ;;  %v863_v52 = vsel %vm453_vm1, %v2590_v50, 0  ;;  %v2594_v54 = vld [vmem:[%s2765_s24 + $0xf8] sm:$0xff]   ;;  %v2591_v55 = vld [vmem:[%s2781_s28 + $0x20] sm:$0xff]   ;;  %v953_v57 = vsel %vm453_vm1, %v2593_v53, 0  ;;  %v2595_v59 = vld [vmem:[%s2765_s24 + $0xd0] sm:$0xff]  }
  0x19   : > { %2352 = vmatpush3.bf16.xpose.msra.mxu1 %v545_v8  ;;  %2341 = vmatprep.subr.bf16.mxu0 %v2711_v0  ;;  %v1034_v58 = vsel %vm453_vm1, %v2594_v54, 0  ;;  %v2596_v60 = vld [vmem:[%s2765_s24 + $0xf0] sm:$0xff]   ;;  %v950_v61 = vsel %vm453_vm1, %v2595_v59, 0  ;;  %v2597_v63 = vld [vmem:[%s2765_s24 + $0xc8] sm:$0xff]   ;;  %v2599_v4 = vld [vmem:[%s2765_s24 + $0xc0] sm:$0xff]  }
  0x1a   : > { %2353 = vmatprep.subr.bf16.mxu1 %v2711_v0  ;;  %v1031_v62 = vsel %vm453_vm1, %v2596_v60, 0  ;;  %v2598_v1 = vld [vmem:[%s2765_s24 + $0xe8] sm:$0xff]   ;;  %v947_v2 = vsel %vm453_vm1, %v2597_v63, 0  ;;  %v2600_v5 = vld [vmem:[%s2765_s24 + $0xe0] sm:$0xff]   ;;  %v944_v6 = vsel %vm453_vm1, %v2599_v4, 0  ;;  %v2601_v8 = vld [vmem:[%s2781_s28 + $0x30] sm:$0xff]  }
  0x1b   : > { %v1028_v3 = vsel %vm453_vm1, %v2598_v1, 0  ;;  %v1025_v7 = vsel %vm453_vm1, %v2600_v5, 0  ;;  %v2602_v9 = vld [vmem:[%s2781_s28 + $0x38] sm:$0xff]   ;;  %v2605_v28 = vld [vmem:[%s2828_s6 + $0x10] sm:$0xff]   ;;  %v2609_v35 = vld [vmem:[%s2828_s6] sm:$0xff]  }
  0x1c   : > { %v2603_v26 = vld [vmem:[%s2828_s6 + $0x18] sm:$0xff]   ;;  %v2610_v36 = vld [vmem:[%s2828_s6 + $0x20] sm:$0xff]  }
  0x1d   : > { %v2604_v27 = vld [vmem:[%s2828_s6 + $0x38] sm:$0xff]  }
  0x20   : > { %2342 = vmatpush3.bf16.xpose.msra.mxu0 %v461_v11 }
  0x21   : > { %2354 = vmatpush3.bf16.xpose.msra.mxu1 %v542_v12  ;;  %2343 = vmatprep.subr.bf16.mxu0 %v2711_v0 }
  0x22   : > { %2355 = vmatprep.subr.bf16.mxu1 %v2711_v0 }
  0x28   : > { %2344 = vmatpush3.bf16.xpose.msra.mxu0 %v458_v15 }
  0x29   : > { %2356 = vmatpush3.bf16.xpose.msra.mxu1 %v539_v16  ;;  %2361 = vmatprep.subr.bf16.mxu0 %v2711_v0 }
  0x2a   : > { %2373 = vmatprep.subr.bf16.mxu1 %v2711_v0 }
  0x2f   : > { %2346 = vmatmul.mubr.msk.bf16.vlgmr.msra.gmra.mxu0 %vm453_vm1, %v2571_v17 }
  0x30   : > { %2358 = vmatmul.mubr.msk.bf16.vlgmr.msra.gmra.mxu1 %vm453_vm1, %v2572_v20  ;;  %2362 = vmatpush3.bf16.xpose.msra.mxu0 %v629_v23 }
  0x31   : > { %2374 = vmatpush3.bf16.xpose.msra.mxu1 %v710_v25  ;;  %2363 = vmatprep.subr.bf16.mxu0 %v2711_v0 }
  0x32   : > { %2375 = vmatprep.subr.bf16.mxu1 %v2711_v0  ;;  %2369 = vmatprep.mubr.msk.bf16.mxu0 %vm2712_vm0, %v2711_v0 }
  0x33   : > { %2381 = vmatprep.mubr.msk.bf16.mxu1 %vm2712_vm0, %v2711_v0 }
  0x38   : > { %2364 = vmatpush3.bf16.xpose.msra.mxu0 %v626_v29  ;;  %v2606_v29 = vld [vmem:[%s2828_s6 + $0x30] sm:$0xff]  }
  0x39   : > { %2376 = vmatpush3.bf16.xpose.msra.mxu1 %v707_v30  ;;  %2365 = vmatprep.subr.bf16.mxu0 %v2711_v0  ;;  %v2607_v30 = vld [vmem:[%s2828_s6 + $0x8] sm:$0xff]  }
  0x3a   : > { %2377 = vmatprep.subr.bf16.mxu1 %v2711_v0 }
  0x40   : > { %2366 = vmatpush3.bf16.xpose.msra.mxu0 %v623_v31  ;;  %v2608_v31 = vld [vmem:[%s2828_s6 + $0x28] sm:$0xff]  }
  0x41   : > { %2378 = vmatpush3.bf16.xpose.msra.mxu1 %v704_v32  ;;  %2367 = vmatprep.subr.bf16.mxu0 %v2711_v0 }
  0x42   : > { %2379 = vmatprep.subr.bf16.mxu1 %v2711_v0 }
  0x48   : > { %2368 = vmatpush3.bf16.xpose.msra.mxu0 %v620_v33 }
  0x49   : > { %2380 = vmatpush3.bf16.xpose.msra.mxu1 %v701_v34  ;;  %2385 = vmatprep.subr.bf16.mxu0 %v2711_v0 }
  0x4a   : > { %2397 = vmatprep.subr.bf16.mxu1 %v2711_v0 }
  0x4f   : > { %2370 = vmatmul.mubr.msk.bf16.vlgmr.msra.gmra.mxu0 %vm453_vm1, %v2581_v37 }
  0x50   : > { %2382 = vmatmul.mubr.msk.bf16.vlgmr.msra.gmra.mxu1 %vm453_vm1, %v2582_v38  ;;  %2386 = vmatpush3.bf16.xpose.msra.mxu0 %v791_v39 }
  0x51   : > { %2398 = vmatpush3.bf16.xpose.msra.mxu1 %v872_v40  ;;  %2387 = vmatprep.subr.bf16.mxu0 %v2711_v0 }
  0x52   : > { %2399 = vmatprep.subr.bf16.mxu1 %v2711_v0  ;;  %2393 = vmatprep.mubr.msk.bf16.mxu0 %vm2712_vm0, %v2711_v0 }
  0x53   : > { %2405 = vmatprep.mubr.msk.bf16.mxu1 %vm2712_vm0, %v2711_v0 }
  0x58   : > { %2388 = vmatpush3.bf16.xpose.msra.mxu0 %v788_v43 }
  0x59   : > { %2400 = vmatpush3.bf16.xpose.msra.mxu1 %v869_v44  ;;  %2389 = vmatprep.subr.bf16.mxu0 %v2711_v0 }
  0x5a   : > { %2401 = vmatprep.subr.bf16.mxu1 %v2711_v0 }
  0x60   : > { %2390 = vmatpush3.bf16.xpose.msra.mxu0 %v785_v47 }
  0x61   : > { %2402 = vmatpush3.bf16.xpose.msra.mxu1 %v866_v48  ;;  %2391 = vmatprep.subr.bf16.mxu0 %v2711_v0 }
  0x62   : > { %2403 = vmatprep.subr.bf16.mxu1 %v2711_v0 }
  0x68   : > { %2392 = vmatpush3.bf16.xpose.msra.mxu0 %v782_v51 }
  0x69   : > { %2404 = vmatpush3.bf16.xpose.msra.mxu1 %v863_v52  ;;  %2409 = vmatprep.subr.bf16.mxu0 %v2711_v0 }
  0x6a   : > { %2421 = vmatprep.subr.bf16.mxu1 %v2711_v0 }
  0x6f   : > { %2394 = vmatmul.mubr.msk.bf16.vlgmr.msra.gmra.mxu0 %vm453_vm1, %v2591_v55 }
  0x70   : > { %2406 = vmatmul.mubr.msk.bf16.vlgmr.msra.gmra.mxu1 %vm453_vm1, %v2592_v56  ;;  %2410 = vmatpush3.bf16.xpose.msra.mxu0 %v953_v57 }
  0x71   : > { %2422 = vmatpush3.bf16.xpose.msra.mxu1 %v1034_v58  ;;  %2411 = vmatprep.subr.bf16.mxu0 %v2711_v0 }
  0x72   : > { %2423 = vmatprep.subr.bf16.mxu1 %v2711_v0  ;;  %2417 = vmatprep.mubr.msk.bf16.mxu0 %vm2712_vm0, %v2711_v0 }
  0x73   : > { %2429 = vmatprep.mubr.msk.bf16.mxu1 %vm2712_vm0, %v2711_v0 }
  0x78   : > { %2412 = vmatpush3.bf16.xpose.msra.mxu0 %v950_v61 }
  0x79   : > { %2424 = vmatpush3.bf16.xpose.msra.mxu1 %v1031_v62  ;;  %2413 = vmatprep.subr.bf16.mxu0 %v2711_v0 }
  0x7a   : > { %2425 = vmatprep.subr.bf16.mxu1 %v2711_v0 }
  0x80   : > { %2414 = vmatpush3.bf16.xpose.msra.mxu0 %v947_v2 }
  0x81   : > { %2426 = vmatpush3.bf16.xpose.msra.mxu1 %v1028_v3  ;;  %2415 = vmatprep.subr.bf16.mxu0 %v2711_v0 }
  0x82   : > { %2427 = vmatprep.subr.bf16.mxu1 %v2711_v0 }
  0x88   : > { %2416 = vmatpush3.bf16.xpose.msra.mxu0 %v944_v6 }
  0x89   : > { %2428 = vmatpush3.bf16.xpose.msra.mxu1 %v1025_v7  ;;  %2433 = vmatprep.subr.bf16.mxu0 %v2711_v0 }
  0x8a   : > { %2445 = vmatprep.subr.bf16.mxu1 %v2711_v0 }
  0x8f   : > { %2418 = vmatmul.mubr.msk.bf16.vlgmr.msra.gmra.mxu0 %vm453_vm1, %v2601_v8 }
  0x90   : > { %2430 = vmatmul.mubr.msk.bf16.vlgmr.msra.gmra.mxu1 %vm453_vm1, %v2602_v9  ;;  %2441 = vmatprep.mubr.msk.bf16.mxu0 %vm2712_vm0, %v2711_v0 }
  0x91   : > { %2453 = vmatprep.mubr.msk.bf16.mxu1 %vm2712_vm0, %v2711_v0  ;;  %2434 = vmatpush3.bf16.msra.mxu0 %v2603_v26 }
  0x92   : > { %2446 = vmatpush3.bf16.msra.mxu1 %v2604_v27  ;;  %2435 = vmatprep.subr.bf16.mxu0 %v2711_v0 }
  0x93   : > { %2447 = vmatprep.subr.bf16.mxu1 %v2711_v0 }
  0x95   : > { %2436 = vmatpush3.bf16.msra.mxu0 %v2605_v28 }
  0x96   : > { %2448 = vmatpush3.bf16.msra.mxu1 %v2606_v29  ;;  %2437 = vmatprep.subr.bf16.mxu0 %v2711_v0 }
  0x97   : > { %2449 = vmatprep.subr.bf16.mxu1 %v2711_v0 }
  0x99   : > { %2438 = vmatpush3.bf16.msra.mxu0 %v2607_v30 }
  0x9a   : > { %2450 = vmatpush3.bf16.msra.mxu1 %v2608_v31  ;;  %2439 = vmatprep.subr.bf16.mxu0 %v2711_v0 }
  0x9b   : > { %2451 = vmatprep.subr.bf16.mxu1 %v2711_v0 }
  0x9d   : > { %2440 = vmatpush3.bf16.msra.mxu0 %v2609_v35 }
  0x9e   : > { %2452 = vmatpush3.bf16.msra.mxu1 %v2610_v36  ;;  %2457 = vmatprep.subr.bf16.mxu0 %v2711_v0 }
  0x9f   : > { %2469 = vmatprep.subr.bf16.mxu1 %v2711_v0 }
  0xef   : > { %v503_v10 = vpop.f32.mrf.mxu0 }
  0xf0   : > { %v2910_v11 = vmul.f32 0.17677669, %v503_v10  ;;  %v584_v12 = vpop.f32.mrf.mxu1 }
  0xf1   : > { %v2912_v13 = vmul.f32 0.17677669, %v584_v12  ;;  %v2347_v14 = vpop.f32.mrf.mxu0 }
  0xf2   : > { %v2359_v15 = vpop.f32.mrf.mxu1  ;;  %v1094_v16 = vsel %vm1093_vm2, %v2910_v11, -inf }
  0xf3   : > { %v1100_v17 = vsel %vm1093_vm2, %v2912_v13, -inf  ;;  %1095 = vmax.xlane.f32.xlu0 %v1094_v16  ;;  %v506_v18 = vpop.f32.mrf.mxu0 }
  0xf4   : > { %1101 = vmax.xlane.f32.xlu1 %v1100_v17  ;;  %v587_v19 = vpop.f32.mrf.mxu1  ;;  %v2918_v20 = vmul.f32 0.17677669, %v506_v18 }
  0xf5   : > { %v2920_v21 = vmul.f32 0.17677669, %v587_v19  ;;  %v2348_v22 = vpop.f32.mrf.mxu0 }
  0xf6   : > { %v2360_v23 = vpop.f32.mrf.mxu1  ;;  %v1097_v24 = vsel %vm1093_vm2, %v2918_v20, -inf }
  0xf7   : > { %v1103_v25 = vsel %vm1093_vm2, %v2920_v21, -inf  ;;  %1098 = vmax.xlane.f32.xlu0 %v1097_v24 }
  0xf8   : > { %1104 = vmax.xlane.f32.xlu1 %v1103_v25 }
 0x10f   : > { %v665_v32 = vpop.f32.mrf.mxu0 }
 0x110   : > { %v2936_v33 = vmul.f32 0.17677669, %v665_v32  ;;  %v746_v34 = vpop.f32.mrf.mxu1 }
 0x111   : > { %v2942_v37 = vmul.f32 0.17677669, %v746_v34  ;;  %v2371_v38 = vpop.f32.mrf.mxu0 }
 0x112   : > { %v2383_v39 = vpop.f32.mrf.mxu1  ;;  %v1106_v40 = vsel %vm1093_vm2, %v2936_v33, -inf }
 0x113   : > { %1107 = vmax.xlane.f32.xlu0 %v1106_v40  ;;  %v668_v41 = vpop.f32.mrf.mxu0  ;;  %v1112_v44 = vsel %vm1093_vm2, %v2942_v37, -inf  ;;  %v2611_v39 = vld [vmem:[%s2828_s6 + $0x58] sm:$0xff]  }
 0x114   : > { %v749_v42 = vpop.f32.mrf.mxu1  ;;  %v2946_v43 = vmul.f32 0.17677669, %v668_v41 }
 0x115   : > { %v2372_v45 = vpop.f32.mrf.mxu0  ;;  %v2952_v46 = vmul.f32 0.17677669, %v749_v42  ;;  %v2613_v42 = vld [vmem:[%s2828_s6 + $0x78] sm:$0xff]  }
 0x116   : > { %v2384_v47 = vpop.f32.mrf.mxu1  ;;  %v1109_v48 = vsel %vm1093_vm2, %v2946_v43, -inf  ;;  %v2612_v45 = vld [vmem:[%s2828_s6 + $0x50] sm:$0xff]  }
 0x117   : > { %1113 = vmax.xlane.f32.xlu0 %v1112_v44  ;;  %1110 = vmax.xlane.f32.xlu1 %v1109_v48  ;;  %v1115_v49 = vsel %vm1093_vm2, %v2952_v46, -inf  ;;  %v2615_v48 = vld [vmem:[%s2828_s6 + $0x70] sm:$0xff]  }
 0x11b   : > { %1116 = vmax.xlane.f32.xlu1 %v1115_v49  ;;  %v2614_v49 = vld [vmem:[%s2828_s6 + $0x48] sm:$0xff]  }
 0x12f   : > { %v827_v50 = vpop.f32.mrf.mxu0 }
 0x130   : > { %v2958_v51 = vmul.f32 0.17677669, %v827_v50  ;;  %v908_v52 = vpop.f32.mrf.mxu1  ;;  %v2617_v50 = vld [vmem:[%s2828_s6 + $0x68] sm:$0xff]  }
 0x131   : > { %v2960_v53 = vmul.f32 0.17677669, %v908_v52  ;;  %v2395_v54 = vpop.f32.mrf.mxu0 }
 0x132   : > { %v2407_v55 = vpop.f32.mrf.mxu1  ;;  %v1118_v56 = vsel %vm1093_vm2, %v2958_v51, -inf }
 0x133   : > { %1119 = vmax.xlane.f32.xlu0 %v1118_v56  ;;  %v830_v57 = vpop.f32.mrf.mxu0  ;;  %v1124_v60 = vsel %vm1093_vm2, %v2960_v53, -inf  ;;  %v2616_v55 = vld [vmem:[%s2828_s6 + $0x40] sm:$0xff]  }
 0x134   : > { %v911_v58 = vpop.f32.mrf.mxu1  ;;  %v2964_v59 = vmul.f32 0.17677669, %v830_v57  ;;  %v2618_v57 = vld [vmem:[%s2828_s6 + $0x60] sm:$0xff]  }
 0x135   : > { %v2396_v61 = vpop.f32.mrf.mxu0  ;;  %v2968_v62 = vmul.f32 0.17677669, %v911_v58 }
 0x136   : > { %v2408_v63 = vpop.f32.mrf.mxu1  ;;  %v1121_v1 = vsel %vm1093_vm2, %v2964_v59, -inf }
 0x137   : > { %1125 = vmax.xlane.f32.xlu0 %v1124_v60  ;;  %1122 = vmax.xlane.f32.xlu1 %v1121_v1  ;;  %v1127_v2 = vsel %vm1093_vm2, %v2968_v62, -inf }
 0x13b   : > { %1128 = vmax.xlane.f32.xlu1 %v1127_v2 }
 0x14f   : > { %v989_v3 = vpop.f32.mrf.mxu0 }
 0x150   : > { %v2974_v4 = vmul.f32 0.17677669, %v989_v3  ;;  %v1070_v5 = vpop.f32.mrf.mxu1 }
 0x151   : > { %v2976_v6 = vmul.f32 0.17677669, %v1070_v5  ;;  %v2419_v7 = vpop.f32.mrf.mxu0 }
 0x152   : > { %v2431_v8 = vpop.f32.mrf.mxu1  ;;  %v1130_v9 = vsel %vm1093_vm2, %v2974_v4, -inf }
 0x153   : > { %1131 = vmax.xlane.f32.xlu0 %v1130_v9  ;;  %v992_v10 = vpop.f32.mrf.mxu0  ;;  %v1136_v15 = vsel %vm1093_vm2, %v2976_v6, -inf }
 0x154   : > { %v1073_v12 = vpop.f32.mrf.mxu1  ;;  %v2980_v14 = vmul.f32 0.17677669, %v992_v10  ;;  %v2619_v10 = vld [vmem:[%s2828_s6 + $0x98] sm:$0xff]  }
 0x155   : > { %v2420_v16 = vpop.f32.mrf.mxu0  ;;  %v2984_v17 = vmul.f32 0.17677669, %v1073_v12 }
 0x156   : > { %v2432_v18 = vpop.f32.mrf.mxu1  ;;  %v1133_v19 = vsel %vm1093_vm2, %v2980_v14, -inf  ;;  %v2621_v16 = vld [vmem:[%s2828_s6 + $0xb8] sm:$0xff]  }
 0x157   : > { %1137 = vmax.xlane.f32.xlu0 %v1136_v15  ;;  %1134 = vmax.xlane.f32.xlu1 %v1133_v19  ;;  %v1139_v22 = vsel %vm1093_vm2, %v2984_v17, -inf }
 0x15b   : > { %1140 = vmax.xlane.f32.xlu1 %v1139_v22  ;;  %v2620_v22 = vld [vmem:[%s2828_s6 + $0x90] sm:$0xff]  }
 0x17c   : > { %v1096_v23 = vpop.xlane.xlu0 %1095 }
 0x17d   : > { %v1102_v24 = vpop.xlane.xlu1 %1101  ;;  %v1142_v25 = vsub.f32 %v2910_v11, %v1096_v23  ;;  %v2623_v23 = vld [vmem:[%s2828_s6 + $0xb0] sm:$0xff]  }
 0x17e   : > { %v1144_v26 = vsub.f32 %v2912_v13, %v1102_v24  ;;  %v2622_v24 = vld [vmem:[%s2828_s6 + $0x88] sm:$0xff]  }
 0x17f   : > { %v1158_v27 = vmul.f32 1.442695, %v1142_v25 }
 0x180   : > { %v1162_v28 = vmul.f32 1.442695, %v1144_v26  ;;  %v1099_v29 = vpop.xlane.xlu0 %1098 }
 0x181   : > { %2639 = vpow2.f32 %v1158_v27  ;;  %v1105_v30 = vpop.xlane.xlu1 %1104  ;;  %v1143_v31 = vsub.f32 %v2918_v20, %v1099_v29  ;;  %v2625_v27 = vld [vmem:[%s2828_s6 + $0xa8] sm:$0xff]   ;;  %v2624_v29 = vld [vmem:[%s2828_s6 + $0x80] sm:$0xff]  }
 0x182   : > { %v1145_v32 = vsub.f32 %v2920_v21, %v1105_v30  ;;  %2641 = vpow2.f32 %v1162_v28 }
 0x183   : > { %v1160_v34 = vmul.f32 1.442695, %v1143_v31 }
 0x184   : > { %v1164_v35 = vmul.f32 1.442695, %v1145_v32 }
 0x185   : > { %2643 = vpow2.f32 %v1160_v34 }
 0x186   : > { %2645 = vpow2.f32 %v1164_v35  ;;  %v2626_v35 = vld [vmem:[%s2828_s6 + $0xa0] sm:$0xff]  }
 0x18e   : > { %v2640_v36 = vpop.eup %2639 }
 0x18f   : > { %v1190_v11 = vsel %vm1093_vm2, %v2640_v36, 0.0  ;;  %v2642_v13 = vpop.eup %2641 }
 0x190   : > { %1191 = vadd.xlane.f32.xlu0 %v1190_v11  ;;  %v1196_v20 = vsel %vm1093_vm2, %v2642_v13, 0.0 }
 0x192   : > { %v2644_v38 = vpop.eup %2643 }
 0x193   : > { %v2646_v40 = vpop.eup %2645  ;;  %v1193_v21 = vsel %vm1093_vm2, %v2644_v38, 0.0  ;;  %v1238_v41 = vpack.c.bf16 %v2644_v38, %v2640_v36 }
 0x194   : > { %1197 = vadd.xlane.f32.xlu0 %v1196_v20  ;;  %1194 = vadd.xlane.f32.xlu1 %v1193_v21  ;;  %v1239_v44 = vpack.c.bf16 %v2646_v40, %v2642_v13  ;;  %v1199_v47 = vsel %vm1093_vm2, %v2646_v40, 0.0  ;;  %v2627_v21 = vld [vmem:[%s2828_s6 + $0xd8] sm:$0xff]  }
 0x195   : > { %2442 = vmatmul.mubr.msk.bf16.vlgmr.msra.gmra.mxu0 %vm1093_vm2, %v1238_v41 }
 0x196   : > { %2454 = vmatmul.mubr.msk.bf16.vlgmr.msra.gmra.mxu1 %vm1093_vm2, %v1239_v44  ;;  %2458 = vmatpush3.bf16.msra.mxu0 %v2611_v39  ;;  %v2629_v44 = vld [vmem:[%s2828_s6 + $0xf8] sm:$0xff]  }
 0x197   : > { %2459 = vmatprep.subr.bf16.mxu0 %v2711_v0  ;;  %2470 = vmatpush3.bf16.msra.mxu1 %v2613_v42 }
 0x198   : > { %1200 = vadd.xlane.f32.xlu1 %v1199_v47  ;;  %2471 = vmatprep.subr.bf16.mxu1 %v2711_v0 }
 0x199   : > { %2465 = vmatprep.mubr.msk.bf16.mxu0 %vm2712_vm0, %v2711_v0  ;;  %2477 = vmatprep.mubr.msk.bf16.mxu1 %vm2712_vm0, %v2711_v0 }
 0x19a   : > { %2460 = vmatpush3.bf16.msra.mxu0 %v2612_v45 }
 0x19b   : > { %2461 = vmatprep.subr.bf16.mxu0 %v2711_v0  ;;  %2472 = vmatpush3.bf16.msra.mxu1 %v2615_v48  ;;  %v2628_v48 = vld [vmem:[%s2828_s6 + $0xd0] sm:$0xff]  }
 0x19c   : > { %v1108_v52 = vpop.xlane.xlu0 %1107  ;;  %2473 = vmatprep.subr.bf16.mxu1 %v2711_v0 }
 0x19d   : > { %v1146_v54 = vsub.f32 %v2936_v33, %v1108_v52 }
 0x19e   : > { %2462 = vmatpush3.bf16.msra.mxu0 %v2614_v49  ;;  %v2631_v49 = vld [vmem:[%s2828_s6 + $0xf0] sm:$0xff]  }
 0x19f   : > { %v1166_v56 = vmul.f32 1.442695, %v1146_v54  ;;  %2463 = vmatprep.subr.bf16.mxu0 %v2711_v0  ;;  %2474 = vmatpush3.bf16.msra.mxu1 %v2617_v50  ;;  %v2630_v50 = vld [vmem:[%s2828_s6 + $0xc8] sm:$0xff]  }
 0x1a0   : > { %v1114_v58 = vpop.xlane.xlu0 %1113  ;;  %v1111_v60 = vpop.xlane.xlu1 %1110  ;;  %2475 = vmatprep.subr.bf16.mxu1 %v2711_v0 }
 0x1a1   : > { %2647 = vpow2.f32 %v1166_v56  ;;  %v1148_v61 = vsub.f32 %v2942_v37, %v1114_v58  ;;  %v1147_v63 = vsub.f32 %v2946_v43, %v1111_v60 }
 0x1a2   : > { %2464 = vmatpush3.bf16.msra.mxu0 %v2616_v55  ;;  %v2633_v55 = vld [vmem:[%s2828_s6 + $0xe8] sm:$0xff]  }
 0x1a3   : > { %v1170_v1 = vmul.f32 1.442695, %v1148_v61  ;;  %v1168_v2 = vmul.f32 1.442695, %v1147_v63  ;;  %2476 = vmatpush3.bf16.msra.mxu1 %v2618_v57  ;;  %2481 = vmatprep.subr.bf16.mxu0 %v2711_v0  ;;  %v2632_v57 = vld [vmem:[%s2828_s6 + $0xc0] sm:$0xff]  }
 0x1a4   : > { %v1117_v33 = vpop.xlane.xlu1 %1116  ;;  %2493 = vmatprep.subr.bf16.mxu1 %v2711_v0 }
 0x1a5   : > { %2649 = vpow2.f32 %v1170_v1  ;;  %v1149_v3 = vsub.f32 %v2952_v46, %v1117_v33  ;;  %v2634_v1 = vld [vmem:[%s2828_s6 + $0xe0] sm:$0xff]  }
 0x1a6   : > { %2651 = vpow2.f32 %v1168_v2 }
 0x1a7   : > { %v1172_v5 = vmul.f32 1.442695, %v1149_v3 }
 0x1a9   : > { %2653 = vpow2.f32 %v1172_v5 }
 0x1ae   : > { %v2648_v37 = vpop.eup %2647 }
 0x1af   : > { %v1202_v43 = vsel %vm1093_vm2, %v2648_v37, 0.0 }
 0x1b0   : > { %1203 = vadd.xlane.f32.xlu0 %v1202_v43 }
 0x1b2   : > { %v2650_v7 = vpop.eup %2649 }
 0x1b3   : > { %v2652_v8 = vpop.eup %2651  ;;  %v1208_v9 = vsel %vm1093_vm2, %v2650_v7, 0.0 }
 0x1b4   : > { %1209 = vadd.xlane.f32.xlu0 %v1208_v9  ;;  %v1205_v12 = vsel %vm1093_vm2, %v2652_v8, 0.0  ;;  %v1240_v15 = vpack.c.bf16 %v2652_v8, %v2648_v37 }
 0x1b5   : > { %1206 = vadd.xlane.f32.xlu1 %v1205_v12 }
 0x1b6   : > { %v2654_v46 = vpop.eup %2653  ;;  %2466 = vmatmul.mubr.msk.bf16.vlgmr.msra.gmra.mxu0 %vm1093_vm2, %v1240_v15  ;;  %v2636_v15 = vld [vmem:[%s3140_s3 + $0x18] sm:$0xff]  }
 0x1b7   : > { %v1211_v18 = vsel %vm1093_vm2, %v2654_v46, 0.0  ;;  %v1241_v19 = vpack.c.bf16 %v2654_v46, %v2650_v7  ;;  %2482 = vmatpush3.bf16.msra.mxu0 %v2619_v10  ;;  %2489 = vmatprep.mubr.msk.bf16.mxu0 %vm2712_vm0, %v2711_v0  ;;  %v2637_v46 = vld [vmem:[%s3140_s3] sm:$0xff]  }
 0x1b8   : > { %2483 = vmatprep.subr.bf16.mxu0 %v2711_v0 }
 0x1b9   : > { %1212 = vadd.xlane.f32.xlu1 %v1211_v18  ;;  %2478 = vmatmul.mubr.msk.bf16.vlgmr.msra.gmra.mxu1 %vm1093_vm2, %v1241_v19 }
 0x1ba   : > { %2494 = vmatpush3.bf16.msra.mxu1 %v2621_v16  ;;  %2501 = vmatprep.mubr.msk.bf16.mxu1 %vm2712_vm0, %v2711_v0  ;;  %v2638_v16 = vld [vmem:[%s3140_s3 + $0x10] sm:$0xff]  }
 0x1bb   : > { %2484 = vmatpush3.bf16.msra.mxu0 %v2620_v22  ;;  %2495 = vmatprep.subr.bf16.mxu1 %v2711_v0 }
 0x1bc   : > { %v1120_v25 = vpop.xlane.xlu0 %1119  ;;  %2485 = vmatprep.subr.bf16.mxu0 %v2711_v0 }
 0x1bd   : > { %v1150_v26 = vsub.f32 %v2958_v51, %v1120_v25 }
 0x1be   : > { %2496 = vmatpush3.bf16.msra.mxu1 %v2623_v23 }
 0x1bf   : > { %v1174_v28 = vmul.f32 1.442695, %v1150_v26  ;;  %2486 = vmatpush3.bf16.msra.mxu0 %v2622_v24  ;;  %2497 = vmatprep.subr.bf16.mxu1 %v2711_v0 }
 0x1c0   : > { %v1126_v30 = vpop.xlane.xlu0 %1125  ;;  %v1123_v31 = vpop.xlane.xlu1 %1122  ;;  %2487 = vmatprep.subr.bf16.mxu0 %v2711_v0 }
 0x1c1   : > { %2655 = vpow2.f32 %v1174_v28  ;;  %v1152_v32 = vsub.f32 %v2960_v53, %v1126_v30  ;;  %v1151_v34 = vsub.f32 %v2964_v59, %v1123_v31 }
 0x1c2   : > { %2498 = vmatpush3.bf16.msra.mxu1 %v2625_v27 }
 0x1c3   : > { %v1178_v36 = vmul.f32 1.442695, %v1152_v32  ;;  %v1176_v51 = vmul.f32 1.442695, %v1151_v34  ;;  %2488 = vmatpush3.bf16.msra.mxu0 %v2624_v29  ;;  %2499 = vmatprep.subr.bf16.mxu1 %v2711_v0 }
 0x1c4   : > { %v1129_v11 = vpop.xlane.xlu1 %1128  ;;  %2505 = vmatprep.subr.bf16.mxu0 %v2711_v0 }
 0x1c5   : > { %2657 = vpow2.f32 %v1178_v36  ;;  %v1153_v13 = vsub.f32 %v2968_v62, %v1129_v11 }
 0x1c6   : > { %2659 = vpow2.f32 %v1176_v51  ;;  %2500 = vmatpush3.bf16.msra.mxu1 %v2626_v35 }
 0x1c7   : > { %v1180_v38 = vmul.f32 1.442695, %v1153_v13  ;;  %2517 = vmatprep.subr.bf16.mxu1 %v2711_v0 }
 0x1c9   : > { %2661 = vpow2.f32 %v1180_v38 }
 0x1ce   : > { %v2656_v53 = vpop.eup %2655 }
 0x1cf   : > { %v1214_v59 = vsel %vm1093_vm2, %v2656_v53, 0.0 }
 0x1d0   : > { %1215 = vadd.xlane.f32.xlu0 %v1214_v59 }
 0x1d2   : > { %v2658_v39 = vpop.eup %2657 }
 0x1d3   : > { %v2660_v40 = vpop.eup %2659  ;;  %v1220_v20 = vsel %vm1093_vm2, %v2658_v39, 0.0 }
 0x1d4   : > { %1221 = vadd.xlane.f32.xlu0 %v1220_v20  ;;  %v1217_v62 = vsel %vm1093_vm2, %v2660_v40, 0.0  ;;  %v1242_v41 = vpack.c.bf16 %v2660_v40, %v2656_v53 }
 0x1d5   : > { %1218 = vadd.xlane.f32.xlu1 %v1217_v62 }
 0x1d6   : > { %v2662_v42 = vpop.eup %2661  ;;  %2490 = vmatmul.mubr.msk.bf16.vlgmr.msra.gmra.mxu0 %vm1093_vm2, %v1242_v41 }
 0x1d7   : > { %v1223_v45 = vsel %vm1093_vm2, %v2662_v42, 0.0  ;;  %v1243_v47 = vpack.c.bf16 %v2662_v42, %v2658_v39  ;;  %2506 = vmatpush3.bf16.msra.mxu0 %v2627_v21  ;;  %2513 = vmatprep.mubr.msk.bf16.mxu0 %vm2712_vm0, %v2711_v0 }
 0x1d8   : > { %2507 = vmatprep.subr.bf16.mxu0 %v2711_v0 }
 0x1d9   : > { %1224 = vadd.xlane.f32.xlu1 %v1223_v45  ;;  %2502 = vmatmul.mubr.msk.bf16.vlgmr.msra.gmra.mxu1 %vm1093_vm2, %v1243_v47 }
 0x1da   : > { %2518 = vmatpush3.bf16.msra.mxu1 %v2629_v44  ;;  %2525 = vmatprep.mubr.msk.bf16.mxu1 %vm2712_vm0, %v2711_v0 }
 0x1db   : > { %2508 = vmatpush3.bf16.msra.mxu0 %v2628_v48  ;;  %2519 = vmatprep.subr.bf16.mxu1 %v2711_v0 }
 0x1dc   : > { %v1132_v52 = vpop.xlane.xlu0 %1131  ;;  %2509 = vmatprep.subr.bf16.mxu0 %v2711_v0 }
 0x1dd   : > { %v1154_v54 = vsub.f32 %v2974_v4, %v1132_v52 }
 0x1de   : > { %2520 = vmatpush3.bf16.msra.mxu1 %v2631_v49 }
 0x1df   : > { %v1182_v56 = vmul.f32 1.442695, %v1154_v54  ;;  %2510 = vmatpush3.bf16.msra.mxu0 %v2630_v50  ;;  %2521 = vmatprep.subr.bf16.mxu1 %v2711_v0 }
 0x1e0   : > { %v1138_v58 = vpop.xlane.xlu0 %1137  ;;  %v1135_v60 = vpop.xlane.xlu1 %1134  ;;  %2511 = vmatprep.subr.bf16.mxu0 %v2711_v0 }
 0x1e1   : > { %2663 = vpow2.f32 %v1182_v56  ;;  %v1156_v61 = vsub.f32 %v2976_v6, %v1138_v58  ;;  %v1155_v63 = vsub.f32 %v2980_v14, %v1135_v60 }
 0x1e2   : > { %2522 = vmatpush3.bf16.msra.mxu1 %v2633_v55 }
 0x1e3   : > { %v1186_v2 = vmul.f32 1.442695, %v1156_v61  ;;  %v1184_v4 = vmul.f32 1.442695, %v1155_v63  ;;  %2512 = vmatpush3.bf16.msra.mxu0 %v2632_v57  ;;  %2523 = vmatprep.subr.bf16.mxu1 %v2711_v0 }
 0x1e4   : > { %v1141_v33 = vpop.xlane.xlu1 %1140  ;;  %2529 = vmatprep.subr.bf16.mxu0 %v2636_v15 }
 0x1e5   : > { %2665 = vpow2.f32 %v1186_v2  ;;  %v1157_v3 = vsub.f32 %v2984_v17, %v1141_v33  ;;  %v2635_v17 = vld [vmem:[%s3140_s3 + $0x8] sm:$0xff]  }
 0x1e6   : > { %2667 = vpow2.f32 %v1184_v4  ;;  %2524 = vmatpush3.bf16.msra.mxu1 %v2634_v1 }
 0x1e7   : > { %v1188_v5 = vmul.f32 1.442695, %v1157_v3  ;;  %2541 = vmatprep.subr.bf16.mxu1 %v2635_v17 }
 0x1e9   : > { %2669 = vpow2.f32 %v1188_v5 }
 0x1ee   : > { %v2664_v37 = vpop.eup %2663 }
 0x1ef   : > { %v1226_v6 = vsel %vm1093_vm2, %v2664_v37, 0.0 }
 0x1f0   : > { %1227 = vadd.xlane.f32.xlu0 %v1226_v6 }
 0x1f2   : > { %v2666_v14 = vpop.eup %2665 }
 0x1f3   : > { %v2668_v43 = vpop.eup %2667  ;;  %v1232_v7 = vsel %vm1093_vm2, %v2666_v14, 0.0 }
 0x1f4   : > { %1233 = vadd.xlane.f32.xlu0 %v1232_v7  ;;  %v1229_v8 = vsel %vm1093_vm2, %v2668_v43, 0.0  ;;  %v1244_v0 = vpack.c.bf16 %v2668_v43, %v2664_v37 }
 0x1f5   : > { %1230 = vadd.xlane.f32.xlu1 %v1229_v8 }
 0x1f6   : > { %v2670_v9 = vpop.eup %2669  ;;  %2514 = vmatmul.mubr.msk.bf16.vlgmr.msra.gmra.mxu0 %vm1093_vm2, %v1244_v0 }
 0x1f7   : > { %v1235_v10 = vsel %vm1093_vm2, %v2670_v9, 0.0  ;;  %v1245_v12 = vpack.c.bf16 %v2670_v9, %v2666_v14  ;;  %2530 = vmatpush3.bf16.msra.mxu0 %v2636_v15 }
 0x1f8   : > { %2531 = vmatprep.subr.bf16.mxu0 %v2638_v16 }
 0x1f9   : > { %1236 = vadd.xlane.f32.xlu1 %v1235_v10  ;;  %2526 = vmatmul.mubr.msk.bf16.vlgmr.msra.gmra.mxu1 %vm1093_vm2, %v1245_v12 }
 0x1fa   : > { %2542 = vmatpush3.bf16.msra.mxu1 %v2635_v17 }
 0x1fb   : > { %2543 = vmatprep.subr.bf16.mxu1 %v2637_v46  ;;  %2532 = vmatpush3.bf16.msra.mxu0 %v2638_v16 }
 0x1fe   : > { %2544 = vmatpush3.bf16.msra.mxu1 %v2637_v46 }
 0x219   : > { %v1192_v18 = vpop.xlane.xlu0 %1191 }
 0x21a   : > { %2671 = vrcp.f32 %v1192_v18 }
 0x21d   : > { %v1195_v19 = vpop.xlane.xlu1 %1194  ;;  %v1198_v22 = vpop.xlane.xlu0 %1197 }
 0x21e   : > { %2673 = vrcp.f32 %v1198_v22 }
 0x21f   : > { %2675 = vrcp.f32 %v1195_v19 }
 0x221   : > { %v1201_v23 = vpop.xlane.xlu1 %1200 }
 0x222   : > { %2677 = vrcp.f32 %v1201_v23 }
 0x227   : > { %v2672_v26 = vpop.eup %2671 }
 0x22b   : > { %v2674_v28 = vpop.eup %2673 }
 0x22c   : > { %v2676_v30 = vpop.eup %2675 }
 0x22f   : > { %v2678_v32 = vpop.eup %2677 }
 0x239   : > { %v1204_v39 = vpop.xlane.xlu0 %1203 }
 0x23a   : > { %2679 = vrcp.f32 %v1204_v39 }
 0x23d   : > { %v1210_v20 = vpop.xlane.xlu0 %1209 }
 0x23e   : > { %v1207_v40 = vpop.xlane.xlu1 %1206 }
 0x23f   : > { %2681 = vrcp.f32 %v1207_v40 }
 0x240   : > { %2683 = vrcp.f32 %v1210_v20 }
 0x242   : > { %v1213_v21 = vpop.xlane.xlu1 %1212 }
 0x243   : > { %2685 = vrcp.f32 %v1213_v21 }
 0x247   : > { %v2680_v42 = vpop.eup %2679 }
 0x24c   : > { %v2682_v45 = vpop.eup %2681 }
 0x24d   : > { %v2684_v52 = vpop.eup %2683 }
 0x250   : > { %v2686_v55 = vpop.eup %2685 }
 0x255   : > { %v1307_v24 = vpop.f32.mrf.mxu0 }
 0x256   : > { %v1375_v25 = vpop.f32.mrf.mxu1  ;;  %v1806_v34 = vmul.f32 %v2672_v26, %v1307_v24 }
 0x257   : > { %v2443_v27 = vpop.f32.mrf.mxu0  ;;  %v1808_v51 = vmul.f32 %v2674_v28, %v1375_v25 }
 0x258   : > { %v2455_v29 = vpop.f32.mrf.mxu1 }
 0x259   : > { %v1310_v31 = vpop.f32.mrf.mxu0  ;;  %v1216_v1 = vpop.xlane.xlu0 %1215 }
 0x25a   : > { %v1378_v35 = vpop.f32.mrf.mxu1  ;;  %v1807_v36 = vmul.f32 %v2676_v30, %v1310_v31  ;;  %2687 = vrcp.f32 %v1216_v1 }
 0x25b   : > { %v1809_v11 = vmul.f32 %v2678_v32, %v1378_v35  ;;  %v2444_v13 = vpop.f32.mrf.mxu0 }
 0x25c   : > { %v1830_v38 = vpack.c.bf16 %v1807_v36, %v1806_v34  ;;  %v2456_v53 = vpop.f32.mrf.mxu1 }
 0x25d   : > { %v1834_v59 = vpack.c.bf16 %v1809_v11, %v1808_v51  ;;  %v1222_v4 = vpop.xlane.xlu0 %1221 }
 0x25e   : > { %2545 = vmatprep.mubr.msk.bf16.mxu1 %vm453_vm1, %v1830_v38  ;;  %v1219_v2 = vpop.xlane.xlu1 %1218 }
 0x25f   : > { %2533 = vmatprep.mubr.msk.bf16.mxu0 %vm453_vm1, %v1834_v59  ;;  %2689 = vrcp.f32 %v1219_v2 }
 0x260   : > { %2691 = vrcp.f32 %v1222_v4 }
 0x262   : > { %v1225_v33 = vpop.xlane.xlu1 %1224 }
 0x263   : > { %2693 = vrcp.f32 %v1225_v33 }
 0x267   : > { %v2688_v37 = vpop.eup %2687 }
 0x26c   : > { %v2690_v14 = vpop.eup %2689 }
 0x26d   : > { %v2692_v17 = vpop.eup %2691 }
 0x270   : > { %v2694_v10 = vpop.eup %2693 }
 0x276   : > { %v1443_v62 = vpop.f32.mrf.mxu0 }
 0x277   : > { %v1810_v48 = vmul.f32 %v2680_v42, %v1443_v62 }
 0x278   : > { %v2467_v41 = vpop.f32.mrf.mxu0 }
 0x279   : > { %v1511_v44 = vpop.f32.mrf.mxu1  ;;  %v1228_v22 = vpop.xlane.xlu0 %1227 }
 0x27a   : > { %v1446_v47 = vpop.f32.mrf.mxu0  ;;  %v1812_v58 = vmul.f32 %v2684_v52, %v1511_v44  ;;  %2695 = vrcp.f32 %v1228_v22 }
 0x27b   : > { %v1811_v49 = vmul.f32 %v2682_v45, %v1446_v47  ;;  %v2479_v50 = vpop.f32.mrf.mxu1  ;;  %v2238_v45 = vld [vmem:[%s3141_s4] ss:$0 sm:$0xff] }
 0x27c   : > { %v2468_v54 = vpop.f32.mrf.mxu0 }
 0x27d   : > { %v1831_v56 = vpack.c.bf16 %v1811_v49, %v1810_v48  ;;  %v1514_v57 = vpop.f32.mrf.mxu1  ;;  %v1234_v24 = vpop.xlane.xlu0 %1233 }
 0x27e   : > { %v1813_v60 = vmul.f32 %v2686_v55, %v1514_v57  ;;  %v1231_v23 = vpop.xlane.xlu1 %1230 }
 0x27f   : > { %2546 = vmatmul.mubr.msk.bf16.vlgmr.msra.gmra.mxu1 %vm453_vm1, %v1831_v56  ;;  %v2480_v61 = vpop.f32.mrf.mxu1  ;;  %2697 = vrcp.f32 %v1231_v23 }
 0x280   : > { %v1835_v63 = vpack.c.bf16 %v1813_v60, %v1812_v58  ;;  %2699 = vrcp.f32 %v1234_v24 }
 0x282   : > { %2534 = vmatmul.mubr.msk.bf16.vlgmr.msra.gmra.mxu0 %vm453_vm1, %v1835_v63  ;;  %v1237_v25 = vpop.xlane.xlu1 %1236 }
 0x283   : > { %2701 = vrcp.f32 %v1237_v25 }
 0x287   : > { %v2696_v28 = vpop.eup %2695 }
 0x28c   : > { %v2698_v30 = vpop.eup %2697 }
 0x28d   : > { %v2700_v36 = vpop.eup %2699 }
 0x290   : > { %v2702_v11 = vpop.eup %2701 }
 0x296   : > { %v1579_v3 = vpop.f32.mrf.mxu0 }
 0x297   : > { %v1814_v7 = vmul.f32 %v2688_v37, %v1579_v3 }
 0x298   : > { %v2491_v5 = vpop.f32.mrf.mxu0 }
 0x299   : > { %v1647_v6 = vpop.f32.mrf.mxu1 }
 0x29a   : > { %v1582_v43 = vpop.f32.mrf.mxu0  ;;  %v1816_v46 = vmul.f32 %v2692_v17, %v1647_v6 }
 0x29b   : > { %v1815_v8 = vmul.f32 %v2690_v14, %v1582_v43  ;;  %v2503_v0 = vpop.f32.mrf.mxu1 }
 0x29c   : > { %v2492_v9 = vpop.f32.mrf.mxu0 }
 0x29d   : > { %v1832_v12 = vpack.c.bf16 %v1815_v8, %v1814_v7  ;;  %v1650_v15 = vpop.f32.mrf.mxu1 }
 0x29e   : > { %v1817_v16 = vmul.f32 %v2694_v10, %v1650_v15 }
 0x29f   : > { %2549 = vmatprep.mubr.msk.bf16.mxu1 %vm453_vm1, %v1832_v12  ;;  %v2504_v18 = vpop.f32.mrf.mxu1 }
 0x2a0   : > { %v1836_v19 = vpack.c.bf16 %v1817_v16, %v1816_v46 }
 0x2a2   : > { %2537 = vmatprep.mubr.msk.bf16.mxu0 %vm453_vm1, %v1836_v19 }
 0x2b6   : > { %v1715_v26 = vpop.f32.mrf.mxu0 }
 0x2b7   : > { %v1818_v32 = vmul.f32 %v2696_v28, %v1715_v26 }
 0x2b8   : > { %v2515_v27 = vpop.f32.mrf.mxu0 }
 0x2b9   : > { %v1783_v29 = vpop.f32.mrf.mxu1 }
 0x2ba   : > { %v1718_v31 = vpop.f32.mrf.mxu0  ;;  %v1820_v53 = vmul.f32 %v2700_v36, %v1783_v29 }
 0x2bb   : > { %v1819_v34 = vmul.f32 %v2698_v30, %v1718_v31  ;;  %v2527_v35 = vpop.f32.mrf.mxu1 }
 0x2bc   : > { %v2516_v51 = vpop.f32.mrf.mxu0 }
 0x2bd   : > { %v1833_v13 = vpack.c.bf16 %v1819_v34, %v1818_v32  ;;  %v1786_v38 = vpop.f32.mrf.mxu1 }
 0x2be   : > { %v1821_v59 = vmul.f32 %v2702_v11, %v1786_v38 }
 0x2bf   : > { %2550 = vmatmul.mubr.msk.bf16.gmra.mxu1 %vm453_vm1, %v1833_v13  ;;  %v2528_v39 = vpop.f32.mrf.mxu1 }
 0x2c0   : > { %v1837_v40 = vpack.c.bf16 %v1821_v59, %v1820_v53 }
 0x2c2   : > { %2538 = vmatmul.mubr.msk.bf16.gmra.mxu0 %vm453_vm1, %v1837_v40 }
 0x33f   : > { %v2547_v20 = vpop.f32.mrf.mxu1 }
 0x341   : > { %v1985_v21 = vpop.f32.mrf.mxu1 }
 0x342   : > { %v2535_v62 = vpop.f32.mrf.mxu0 }
 0x343   : > { %v1994_v41 = vadd.f32 %v2547_v20, %v2535_v62  ;;  %v2548_v42 = vpop.f32.mrf.mxu1 }
 0x344   : > { %v1896_v44 = vpop.f32.mrf.mxu0 }
 0x345   : > { %v1986_v47 = vadd.f32 %v1985_v21, %v1896_v44  ;;  %v2025_v50 = vadd.f32 %v2238_v45, %v1994_v41  ;;  %v1988_v52 = vpop.f32.mrf.mxu1 }
 0x346   : > { %v2536_v48 = vpop.f32.mrf.mxu0 }
 0x347   : > { %v2023_v49 = vadd.f32 %v2238_v45, %v1986_v47  ;;  %v1997_v54 = vadd.f32 %v2548_v42, %v2536_v48  ;;  %2033 = vst.msk [vmem:[%s3116_s21 + $0x10] sm:$0xff] %vm1093_vm2, %v2025_v50 }
 0x348   : > { %v1899_v55 = vpop.f32.mrf.mxu0 }
 0x349   : > { %2031 = vst.msk [vmem:[%s3116_s21] sm:$0xff] %vm1093_vm2, %v2023_v49  ;;  %v1989_v56 = vadd.f32 %v1988_v52, %v1899_v55  ;;  %v2026_v58 = vadd.f32 %v2238_v45, %v1997_v54 }
 0x34b   : > { %v2024_v57 = vadd.f32 %v2238_v45, %v1989_v56  ;;  %2034 = vst.msk [vmem:[%s3116_s21 + $0x18] sm:$0xff] %vm1093_vm2, %v2026_v58 }
 0x34d   : > { %2032 = vst.msk [vmem:[%s3116_s21 + $0x8] sm:$0xff] %vm1093_vm2, %v2024_v57 }
 0x37f   : > { %v2551_v60 = vpop.f32.mrf.mxu1 }
 0x381   : > { %v2001_v61 = vpop.f32.mrf.mxu1 }
 0x382   : > { %v2539_v63 = vpop.f32.mrf.mxu0 }
 0x383   : > { %v2010_v1 = vadd.f32 %v2551_v60, %v2539_v63  ;;  %v2552_v2 = vpop.f32.mrf.mxu1 }
 0x384   : > { %v1912_v4 = vpop.f32.mrf.mxu0 }
 0x385   : > { %v2002_v33 = vadd.f32 %v2001_v61, %v1912_v4  ;;  %v2029_v37 = vadd.f32 %v2238_v45, %v2010_v1  ;;  %v2004_v6 = vpop.f32.mrf.mxu1 }
 0x386   : > { %v2540_v3 = vpop.f32.mrf.mxu0 }
 0x387   : > { %v2027_v5 = vadd.f32 %v2238_v45, %v2002_v33  ;;  %v2013_v14 = vadd.f32 %v2552_v2, %v2540_v3  ;;  %2037 = vst.msk [vmem:[%s3116_s21 + $0x30] sm:$0xff] %vm1093_vm2, %v2029_v37 }
 0x388   : > { %v1915_v43 = vpop.f32.mrf.mxu0 }
 0x389   : > { %2035 = vst.msk [vmem:[%s3116_s21 + $0x20] sm:$0xff] %vm1093_vm2, %v2027_v5  ;;  %v2005_v7 = vadd.f32 %v2004_v6, %v1915_v43  ;;  %v2030_v0 = vadd.f32 %v2238_v45, %v2013_v14 }
 0x38b   : > { %v2028_v8 = vadd.f32 %v2238_v45, %v2005_v7  ;;  %2038 = vst.msk [vmem:[%s3116_s21 + $0x38] sm:$0xff] %vm1093_vm2, %v2030_v0 }
 0x38d   : > { %2036 = vst.msk [vmem:[%s3116_s21 + $0x28] sm:$0xff] %vm1093_vm2, %v2028_v8 }
 0x38e PF: > { %s15_s18 = sadd.s32 1, %s2709_s18  }
 0x38f   : > { %p12_p4 = scmp.ge.s32.totalorder %s15_s18, 4  }
 0x391   :  { %14 = sbr.rel (!%p12_p4) target bundleno = 1 (0x1), region = 76 }

// kernel: multiscale_block.5
= control target key start
LH: loop header
LB: loop body
LE: loop exit
PB: predicated region body
PF: predicated region fallthrough
CT: control target
= control target key end

     0   :  { %13 = vsyncpa [#allocation3], 0  ;;  %s2441_s0 = inlined_call_operand.vmem [shape: f32[128,64], index: 0, kind: input, shape index: {}]   ;;  %s2442_s1 = inlined_call_operand.vmem [shape: f32[128,64], index: 1, kind: input, shape index: {}]   ;;  %s2443_s2 = inlined_call_operand.vmem [shape: f32[1,64], index: 2, kind: input, shape index: {}]   ;;  %s2444_s3 = inlined_call_operand.vmem [shape: f32[1,64], index: 3, kind: input, shape index: {}]   ;;  %s2445_s4 = inlined_call_operand.vmem [shape: bf16[64,256], index: 4, kind: input, shape index: {}]   ;;  %s2446_s5 = inlined_call_operand.vmem [shape: f32[1,256], index: 5, kind: input, shape index: {}]   ;;  %s2447_s6 = inlined_call_operand.vmem [shape: bf16[256,64], index: 6, kind: input, shape index: {}]   ;;  %s2448_s7 = inlined_call_operand.vmem [shape: f32[1,64], index: 7, kind: input, shape index: {}]   ;;  %s2449_s8 = inlined_call_operand.hbm [shape: f32[128,64], index: 8, kind: output, shape index: {}]  }
   0x1   :  { %15 = vsyncpa [#allocation3 + $0x1], 0  ;;  %s1732_s27 = smov 0   ;;  %s1734_s28 = smov 0  }
   0x2   :  { %s1736_s29 = smov 0   ;;  %s1738_s30 = smov 0  }
   0x3 LB: > { %s1753_s9 = sadd.s32 4294967295, %s1680_s30   ;;  %s1367_s10 = sadd.s32 4294967294, %s1680_s30   ;;  %s1680_s30 = sphi %s1738_s30, %s2482_s30   ;;  %s1676_s29 = sphi %s1736_s29, %s2481_s29   ;;  %s1672_s28 = sphi %s1734_s28, %s2480_s28   ;;  %s1668_s27 = sphi %s1732_s27, %s2479_s27  }
   0x4   : > { %s1757_s11 = sadd.s32 1, %s1680_s30   ;;  %s206_s12 = sadd.s32 1, %s1676_s29 }
   0x5   : > { %s203_s13 = ssub.s32 %s1680_s30, %s1757_s11  ;;  %p216_p0 = scmp.ne.s32.totalorder %s1676_s29, %s1672_s28 }
   0x6   : > { %p204_p1 = scmp.eq.s32.totalorder %s203_s13, 0  ;;  %p217_p2 = scmp.eq.s32.totalorder %s1753_s9, 1 }
   0x7   : > { %p222_p3 = scmp.ne.s32.totalorder %s1672_s28, %s1668_s27  ;;  %p223_p4 = scmp.eq.s32.totalorder %s1367_s10, 1 }
   0x8   : > { %s1768_s14 = scalar_select %p204_p1, %s1676_s29, %s206_s12  }
   0x9   : > { %p1770_p5 = por %p217_p2, %p216_p0  ;;  %p1774_p6 = por %p223_p4, %p222_p3 }
   0xa   : > { %p1370_p7 = scmp.ge.s32.totalorder %s1680_s30, 1  ;;  %p277_p8 = scmp.lt.s32.totalorder %s1680_s30, 3 }
   0xc   : > { %p278_p9 = pnand %p1370_p7, %p277_p8 }
   0xe   : > { %281 = sbr.rel (%p278_p9) target bundleno = 884 (0x374), region = 52 }
  0x13   : > { %s1372_s17 = sshll.u32 %s1753_s9, 3  ;;  %vm356_vm0 = vcmask 523264   ;;  %s313_s10 = sand.u32 1, %s1672_s28  }
  0x14   : > { %p317_p10 = scmp.lt.s32.totalorder %s1372_s17, 15  ;;  %s1412_s19 = sshll.u32 %s1753_s9, 10 }
  0x15   : > { %s2392_s23 = scalar_lea.hbm %s2449_s8, %s1412_s19  ;;  %s2401_s9 = scalar_lea.sflag [#allocation3], %s313_s10 }
  0x16   : > { %s2484_s17 = smov (!%p317_p10, %s1372_s17), 15  ;;  %s1684_s25 = smov [#allocation2]  }
  0x17   : > { %s1373_s18 = sshll.u32 %s2484_s17, 3  ;;  %s1371_s17 = sshll.u32 %s313_s10, 6 }
  0x18   : > { %s320_s21 = scalar_lea.vmem %s2441_s0, %s1373_s18  ;;  %s326_s24 = scalar_lea.vmem %s2442_s1, %s1373_s18 }
  0x19   : > { %v330_v0 = vld [vmem:[%s320_s21] sm:$0xff]  ;;  %v332_v2 = vld [vmem:[%s320_s21 + $0x10] sm:$0xff]  ;;  %v331_v5 = vld [vmem:[%s320_s21 + $0x8] sm:$0xff]  ;;  %s2365_s18 = scalar_lea.vmem [#allocation2], %s1371_s17  ;;  %s1624_s26 = sshll.u32 %s1684_s25, 4  ;;  %s1625_s26 = int_to_ptr.vmem [resolvable:$false] %s1624_s26 }
  0x1a   : > { %v338_v1 = vld [vmem:[%s326_s24] sm:$0xff]  ;;  %v340_v4 = vld [vmem:[%s326_s24 + $0x10] sm:$0xff]  ;;  %v339_v6 = vld [vmem:[%s326_s24 + $0x8] sm:$0xff]  ;;  %s1293_s20 = sshll.u32 %s2365_s18, 4  ;;  %s1626_s12 = scalar_lea.vmem %s1625_s26, 2048  ;;  %s2394_s20 = int_to_ptr.vmem [resolvable:$true] %s1293_s20 }
  0x1b   : > { %v1787_v3 = vadd.f32 %v338_v1, %v330_v0  ;;  %v1789_v7 = vadd.f32 %v340_v4, %v332_v2  ;;  %v1791_v8 = vadd.f32 %v339_v6, %v331_v5  ;;  %v333_v9 = vld [vmem:[%s320_s21 + $0x18] sm:$0xff]  ;;  %v334_v11 = vld [vmem:[%s320_s21 + $0x20] sm:$0xff]  ;;  %v335_v15 = vld [vmem:[%s320_s21 + $0x28] sm:$0xff]  ;;  %p1627_p0 = scmp.lt.s32.totalorder %s2394_s20, %s1625_s26 }
  0x1c   : > { %v341_v10 = vld [vmem:[%s326_s24 + $0x18] sm:$0xff]  ;;  %v342_v14 = vld [vmem:[%s326_s24 + $0x20] sm:$0xff]  ;;  %v343_v16 = vld [vmem:[%s326_s24 + $0x28] sm:$0xff] }
  0x1d   : > { %2462 = vst [vmem:[#allocation5_spill] sm:$0xff] %v1787_v3  ;;  %2463 = vst [vmem:[#allocation6_spill] sm:$0xff] %v1789_v7  ;;  %v357_v12 = vsel %vm356_vm0, %v1787_v3, 0.0  ;;  %v1795_v13 = vadd.f32 %v341_v10, %v333_v9  ;;  %v363_v17 = vsel %vm356_vm0, %v1789_v7, 0.0  ;;  %v1799_v18 = vadd.f32 %v342_v14, %v334_v11  ;;  %v336_v20 = vld [vmem:[%s320_s21 + $0x30] sm:$0xff]  ;;  %v337_v24 = vld [vmem:[%s320_s21 + $0x38] sm:$0xff] }
  0x1e   : > { %2464 = vst [vmem:[#allocation7_spill] sm:$0xff] %v1791_v8  ;;  %358 = vadd.xlane.f32.xlu0 %v357_v12  ;;  %v1801_v19 = vadd.f32 %v343_v16, %v335_v15  ;;  %364 = vadd.xlane.f32.xlu1 %v363_v17  ;;  %v360_v21 = vsel %vm356_vm0, %v1791_v8, 0.0  ;;  %v344_v22 = vld [vmem:[%s326_s24 + $0x30] sm:$0xff]  ;;  %v345_v25 = vld [vmem:[%s326_s24 + $0x38] sm:$0xff]  ;;  %v1515_v14 = vld [vmem:[%s2445_s4 + $0x24] ss:$8 sps:$4 sm:$0xff]  }
  0x1f   : > { %2465 = vst [vmem:[#allocation8_spill] sm:$0xff] %v1795_v13  ;;  %2466 = vst [vmem:[#allocation9_spill] sm:$0xff] %v1799_v18  ;;  %v366_v23 = vsel %vm356_vm0, %v1795_v13, 0.0  ;;  %v369_v26 = vsel %vm356_vm0, %v1799_v18, 0.0  ;;  %v1811_v28 = vadd.f32 %v344_v22, %v336_v20  ;;  %v1813_v29 = vadd.f32 %v345_v25, %v337_v24  ;;  %v1512_v11 = vld [vmem:[%s2445_s4 + $0x34] ss:$8 sps:$4 sm:$0xff]  }
  0x20   : > { %2467 = vst [vmem:[#allocation10_spill] sm:$0xff] %v1801_v19  ;;  %v372_v27 = vsel %vm356_vm0, %v1801_v19, 0.0  ;;  %v1514_v12 = vld [vmem:[%s2445_s4 + $0x30] ss:$8 sps:$4 sm:$0xff]   ;;  %574 = vmatprep.subr.bf16.mxu0 %v1512_v11  ;;  %v1517_v15 = vld [vmem:[%s2445_s4 + $0x20] ss:$8 sps:$4 sm:$0xff]  }
  0x21   : > { %2468 = vst [vmem:[#allocation11_spill] sm:$0xff] %v1811_v28  ;;  %2469 = vst [vmem:[#allocation12_spill] sm:$0xff] %v1813_v29  ;;  %v375_v30 = vsel %vm356_vm0, %v1811_v28, 0.0  ;;  %v378_v31 = vsel %vm356_vm0, %v1813_v29, 0.0  ;;  %575 = vmatpush1.bf16.msra.mxu0 %v1514_v12  ;;  %v1518_v16 = vld [vmem:[%s2445_s4 + $0x14] ss:$8 sps:$4 sm:$0xff]  }
  0x22   : > { %361 = vadd.xlane.f32.xlu0 %v360_v21  ;;  %367 = vadd.xlane.f32.xlu1 %v366_v23  ;;  %v1520_v17 = vld [vmem:[%s2445_s4 + $0x10] ss:$8 sps:$4 sm:$0xff]   ;;  %v1521_v20 = vld [vmem:[%s2445_s4 + $0x4] ss:$8 sps:$4 sm:$0xff]   ;;  %v1682_v21 = vmov 0   ;;  %s1620_s24 = scalar_lea.vmem %s2394_s20, 1024 }
  0x23   : > { %576 = vmatprep.subr.bf16.mxu0 %v1515_v14  ;;  %598 = vmatprep.mubr.bf16.mxu0 %v1682_v21  ;;  %v1523_v22 = vld [vmem:[%s2445_s4] ss:$8 sps:$4 sm:$0xff]   ;;  %p1621_p11 = scmp.ne.s32.totalorder %s2394_s20, %s1620_s24  ;;  %p1628_p1 = scmp.lt.s32.totalorder %s1626_s12, %s1620_s24 }
  0x25   : > { %577 = vmatpush1.bf16.msra.mxu0 %v1517_v15  ;;  %p1622_p12 = pnand %p1621_p11, %p1770_p5  ;;  %p1629_p2 = por %p1628_p1, %p1627_p0 }
  0x26   : > { %370 = vadd.xlane.f32.xlu0 %v369_v26  ;;  %373 = vadd.xlane.f32.xlu1 %v372_v27 }
  0x27   : > { %578 = vmatprep.subr.bf16.mxu0 %v1518_v16  ;;  %p1623_p13 = pneg %p1622_p12 }
  0x29   : > { %579 = vmatpush1.bf16.msra.mxu0 %v1520_v17  ;;  %p1630_p3 = pnand %p1629_p2, %p1623_p13 }
  0x2a   : > { %376 = vadd.xlane.f32.xlu0 %v375_v30  ;;  %379 = vadd.xlane.f32.xlu1 %v378_v31 }
  0x2b   : > { %580 = vmatprep.subr.bf16.mxu0 %v1521_v20 }
  0x2d   : > { %581 = vmatpush1.bf16.msra.mxu0 %v1523_v22 }
  0xa7   : > { %v359_v32 = vpop.xlane.xlu0 %358  ;;  %v365_v34 = vpop.xlane.xlu1 %364 }
  0xa8   : > { %v382_v33 = vmul.f32 0.015625, %v359_v32  ;;  %v384_v35 = vmul.f32 0.015625, %v365_v34 }
  0xaa   : > { %v1820_v36 = vsub.f32 %v1787_v3, %v382_v33  ;;  %v1823_v37 = vsub.f32 %v1789_v7, %v384_v35 }
  0xab   : > { %v362_v38 = vpop.xlane.xlu0 %361  ;;  %v368_v40 = vpop.xlane.xlu1 %367 }
  0xac   : > { %v383_v39 = vmul.f32 0.015625, %v362_v38  ;;  %v398_v41 = vmul.f32 %v1820_v36, %v1820_v36  ;;  %v385_v42 = vmul.f32 0.015625, %v368_v40  ;;  %v400_v43 = vmul.f32 %v1823_v37, %v1823_v37 }
  0xae   : > { %v1830_v44 = vsub.f32 %v1791_v8, %v383_v39  ;;  %v406_v45 = vsel %vm356_vm0, %v398_v41, 0.0  ;;  %v1834_v46 = vsub.f32 %v1795_v13, %v385_v42  ;;  %v412_v50 = vsel %vm356_vm0, %v400_v43, 0.0 }
  0xaf   : > { %407 = vadd.xlane.f32.xlu0 %v406_v45  ;;  %v371_v47 = vpop.xlane.xlu0 %370  ;;  %v374_v49 = vpop.xlane.xlu1 %373 }
  0xb0   : > { %v386_v48 = vmul.f32 0.015625, %v371_v47  ;;  %v399_v51 = vmul.f32 %v1830_v44, %v1830_v44  ;;  %v387_v52 = vmul.f32 0.015625, %v374_v49  ;;  %v401_v53 = vmul.f32 %v1834_v46, %v1834_v46 }
  0xb2   : > { %v1842_v54 = vsub.f32 %v1799_v18, %v386_v48  ;;  %v409_v55 = vsel %vm356_vm0, %v399_v51, 0.0  ;;  %v1846_v56 = vsub.f32 %v1801_v19, %v387_v52  ;;  %v415_v60 = vsel %vm356_vm0, %v401_v53, 0.0  ;;  %v1376_v53 = vld [vmem:[%s2443_s2] ss:$0 sm:$0xff] }
  0xb3   : > { %413 = vadd.xlane.f32.xlu0 %v412_v50  ;;  %410 = vadd.xlane.f32.xlu1 %v409_v55  ;;  %v377_v57 = vpop.xlane.xlu0 %376  ;;  %v380_v59 = vpop.xlane.xlu1 %379 }
  0xb4   : > { %v388_v58 = vmul.f32 0.015625, %v377_v57  ;;  %v402_v61 = vmul.f32 %v1842_v54, %v1842_v54  ;;  %v389_v62 = vmul.f32 0.015625, %v380_v59  ;;  %v403_v63 = vmul.f32 %v1846_v56, %v1846_v56 }
  0xb6   : > { %v1854_v0 = vsub.f32 %v1811_v28, %v388_v58  ;;  %v418_v1 = vsel %vm356_vm0, %v402_v61, 0.0  ;;  %v1858_v2 = vsub.f32 %v1813_v29, %v389_v62  ;;  %v421_v4 = vsel %vm356_vm0, %v403_v63, 0.0  ;;  %v1377_v62 = vld [vmem:[%s2444_s3] ss:$0 sm:$0xff] }
  0xb7   : > { %416 = vadd.xlane.f32.xlu1 %v415_v60  ;;  %419 = vadd.xlane.f32.xlu0 %v418_v1 }
  0xb8   : > { %v404_v5 = vmul.f32 %v1854_v0, %v1854_v0  ;;  %v405_v6 = vmul.f32 %v1858_v2, %v1858_v2 }
  0xba   : > { %v424_v9 = vsel %vm356_vm0, %v404_v5, 0.0  ;;  %v427_v10 = vsel %vm356_vm0, %v405_v6, 0.0 }
  0xbb   : > { %422 = vadd.xlane.f32.xlu1 %v421_v4  ;;  %425 = vadd.xlane.f32.xlu0 %v424_v9 }
  0xbf   : > { %428 = vadd.xlane.f32.xlu1 %v427_v10 }
 0x138   : > { %v408_v23 = vpop.xlane.xlu0 %407 }
 0x139   : > { %v430_v24 = vmul.f32 0.015625, %v408_v23 }
 0x13b   : > { %v438_v25 = vadd.f32 1e-06, %v430_v24 }
 0x13c   : > { %v411_v26 = vpop.xlane.xlu1 %410  ;;  %v414_v27 = vpop.xlane.xlu0 %413 }
 0x13d   : > { %1540 = vrsqrt.f32 %v438_v25  ;;  %v431_v30 = vmul.f32 0.015625, %v411_v26  ;;  %v432_v31 = vmul.f32 0.015625, %v414_v27 }
 0x13f   : > { %v439_v32 = vadd.f32 1e-06, %v431_v30  ;;  %v440_v33 = vadd.f32 1e-06, %v432_v31 }
 0x140   : > { %v417_v34 = vpop.xlane.xlu1 %416  ;;  %v420_v35 = vpop.xlane.xlu0 %419 }
 0x141   : > { %1542 = vrsqrt.f32 %v439_v32  ;;  %v433_v38 = vmul.f32 0.015625, %v417_v34  ;;  %v434_v40 = vmul.f32 0.015625, %v420_v35  ;;  %v1524_v34 = vld [vmem:[%s2447_s6 + $0x78] sm:$0xff]   ;;  %v1528_v35 = vld [vmem:[%s2447_s6 + $0x68] sm:$0xff]  }
 0x142   : > { %1544 = vrsqrt.f32 %v440_v33  ;;  %1413 = vmatprep.subr.bf16.mxu0 %v1524_v34  ;;  %1453 = vmatprep.subr.bf16.mxu1 %v1524_v34 }
 0x143   : > { %v441_v39 = vadd.f32 1e-06, %v433_v38  ;;  %v442_v43 = vadd.f32 1e-06, %v434_v40  ;;  %v1529_v38 = vld [vmem:[%s2447_s6 + $0x28] sm:$0xff]   ;;  %v1531_v40 = vld [vmem:[%s2447_s6 + $0x20] sm:$0xff]  }
 0x144   : > { %v423_v41 = vpop.xlane.xlu1 %422  ;;  %v426_v47 = vpop.xlane.xlu0 %425 }
 0x145   : > { %1546 = vrsqrt.f32 %v441_v39  ;;  %v435_v42 = vmul.f32 0.015625, %v423_v41  ;;  %v436_v51 = vmul.f32 0.015625, %v426_v47  ;;  %v1530_v39 = vld [vmem:[%s2447_s6 + $0x60] sm:$0xff]   ;;  %v1532_v41 = vld [vmem:[%s2447_s6 + $0x58] sm:$0xff]   ;;  %v1536_v47 = vld [vmem:[%s2447_s6 + $0x48] sm:$0xff]  }
 0x147   : > { %v443_v45 = vadd.f32 1e-06, %v435_v42  ;;  %v444_v58 = vadd.f32 1e-06, %v436_v51  ;;  %v1533_v42 = vld [vmem:[%s2447_s6 + $0x18] sm:$0xff]   ;;  %v504_v51 = vlaneseq }
 0x148   : > { %v429_v48 = vpop.xlane.xlu1 %428 }
 0x149   : > { %1548 = vrsqrt.f32 %v443_v45  ;;  %v437_v49 = vmul.f32 0.015625, %v429_v48  ;;  %v1535_v45 = vld [vmem:[%s2447_s6 + $0x10] sm:$0xff]   ;;  %v1537_v48 = vld [vmem:[%s2447_s6 + $0x8] sm:$0xff]  }
 0x14a   : > { %v1541_v50 = vpop.eup %1540  ;;  %1550 = vrsqrt.f32 %v442_v43  ;;  %v1534_v43 = vld [vmem:[%s2447_s6 + $0x50] sm:$0xff]  }
 0x14b   : > { %v454_v52 = vmul.f32 %v1541_v50, %v1820_v36  ;;  %v445_v55 = vadd.f32 1e-06, %v437_v49  ;;  %v1538_v49 = vld [vmem:[%s2447_s6 + $0x40] sm:$0xff]  }
 0x14c   : > { %v1539_v50 = vld [vmem:[%s2447_s6] sm:$0xff]  }
 0x14d   : > { %v468_v60 = vmul.f32 %v1376_v53, %v454_v52  ;;  %1552 = vrsqrt.f32 %v445_v55  ;;  %v505_v52 = vshrl.u32 %v504_v51, 7  ;;  %v502_v55 = vld [vmem:[%s2446_s5] sm:$0x3] }
 0x14e   : > { %v1543_v57 = vpop.eup %1542  ;;  %1554 = vrsqrt.f32 %v444_v58 }
 0x14f   : > { %v455_v59 = vmul.f32 %v1543_v57, %v1830_v44  ;;  %v1545_v61 = vpop.eup %1544  ;;  %v482_v36 = vadd.f32 %v1377_v62, %v468_v60  ;;  %v510_v57 = vsub.s32 1, %v505_v52 }
 0x150   : > { %v456_v5 = vmul.f32 %v1545_v61, %v1823_v37 }
 0x151   : > { %v469_v63 = vmul.f32 %v1376_v53, %v455_v59  ;;  %v1966_v59 = vrot.slane %v502_v55, %v510_v57 }
 0x152   : > { %v1547_v1 = vpop.eup %1546  ;;  %v470_v44 = vmul.f32 %v1376_v53, %v456_v5 }
 0x153   : > { %v483_v4 = vadd.f32 %v1377_v62, %v469_v63  ;;  %v457_v6 = vmul.f32 %v1547_v1, %v1834_v46 }
 0x154   : > { %v484_v16 = vadd.f32 %v1377_v62, %v470_v44 }
 0x155   : > { %v490_v9 = vpack.c.bf16 %v483_v4, %v482_v36  ;;  %v471_v10 = vmul.f32 %v1376_v53, %v457_v6 }
 0x156   : > { %v1549_v11 = vpop.eup %1548 }
 0x157   : > { %1386 = vmatmul.mubr.msk.bf16.vlgmr.msra.gmra.mxu0 %vm356_vm0, %v490_v9  ;;  %v1551_v12 = vpop.eup %1550  ;;  %v485_v14 = vadd.f32 %v1377_v62, %v471_v10  ;;  %v459_v15 = vmul.f32 %v1549_v11, %v1846_v56 }
 0x158   : > { %608 = vmatprep.mubr.bf16.mxu0 %v1682_v21  ;;  %v458_v17 = vmul.f32 %v1551_v12, %v1842_v54 }
 0x159   : > { %v491_v20 = vpack.c.bf16 %v485_v14, %v484_v16  ;;  %v473_v22 = vmul.f32 %v1376_v53, %v459_v15 }
 0x15a   : > { %v1553_v37 = vpop.eup %1552  ;;  %v472_v46 = vmul.f32 %v1376_v53, %v458_v17 }
 0x15b   : > { %v1555_v23 = vpop.eup %1554  ;;  %v487_v24 = vadd.f32 %v1377_v62, %v473_v22  ;;  %v461_v25 = vmul.f32 %v1553_v37, %v1858_v2  ;;  %v1526_v2 = vld [vmem:[%s2447_s6 + $0x70] sm:$0xff]  }
 0x15c   : > { %v486_v26 = vadd.f32 %v1377_v62, %v472_v46  ;;  %v460_v27 = vmul.f32 %v1555_v23, %v1854_v0  ;;  %v1525_v0 = vld [vmem:[%s2447_s6 + $0x38] sm:$0xff]  }
 0x15d   : > { %v475_v56 = vmul.f32 %v1376_v53, %v461_v25  ;;  %1414 = vmatpush3.bf16.msra.mxu0 %v1525_v0  ;;  %1461 = vmatpush3.bf16.msra.mxu1 %v1525_v0 }
 0x15e   : > { %v492_v30 = vpack.c.bf16 %v487_v24, %v486_v26  ;;  %v474_v54 = vmul.f32 %v1376_v53, %v460_v27  ;;  %1415 = vmatprep.subr.bf16.mxu0 %v1526_v2  ;;  %1454 = vmatprep.subr.bf16.mxu1 %v1526_v2  ;;  %v506_v53 = vsub.s32 0, %v505_v52 }
 0x15f   : > { %1387 = vmatmul.mubr.msk.bf16.gmra.mxu0 %vm356_vm0, %v491_v20  ;;  %v489_v31 = vadd.f32 %v1377_v62, %v475_v56 }
 0x160   : > { %618 = vmatprep.mubr.bf16.mxu0 %v1682_v21  ;;  %v488_v32 = vadd.f32 %v1377_v62, %v474_v54  ;;  %v1964_v58 = vrot.slane %v502_v55, %v506_v53 }
 0x162   : > { %v493_v33 = vpack.c.bf16 %v489_v31, %v488_v32 }
 0x167   : > { %1388 = vmatmul.mubr.msk.bf16.gmra.mxu0 %vm356_vm0, %v492_v30 }
 0x168   : > { %628 = vmatprep.mubr.bf16.mxu0 %v1682_v21  ;;  %v1527_v21 = vld [vmem:[%s2447_s6 + $0x30] sm:$0xff]  }
 0x169   : > { %1416 = vmatpush3.bf16.msra.mxu0 %v1527_v21  ;;  %1462 = vmatpush3.bf16.msra.mxu1 %v1527_v21 }
 0x16a   : > { %1417 = vmatprep.subr.bf16.mxu0 %v1528_v35  ;;  %1455 = vmatprep.subr.bf16.mxu1 %v1528_v35 }
 0x16d   : > { %1418 = vmatpush3.bf16.msra.mxu0 %v1529_v38  ;;  %1463 = vmatpush3.bf16.msra.mxu1 %v1529_v38 }
 0x16e   : > { %1419 = vmatprep.subr.bf16.mxu0 %v1530_v39  ;;  %1456 = vmatprep.subr.bf16.mxu1 %v1530_v39 }
 0x16f   : > { %1389 = vmatmul.mubr.msk.bf16.gmra.mxu0 %vm356_vm0, %v493_v33 }
 0x171   : > { %1420 = vmatpush3.bf16.msra.mxu0 %v1531_v40  ;;  %1464 = vmatpush3.bf16.msra.mxu1 %v1531_v40 }
 0x172   : > { %1421 = vmatprep.subr.bf16.mxu0 %v1532_v41  ;;  %1457 = vmatprep.subr.bf16.mxu1 %v1532_v41 }
 0x175   : > { %1422 = vmatpush3.bf16.msra.mxu0 %v1533_v42  ;;  %1465 = vmatpush3.bf16.msra.mxu1 %v1533_v42 }
 0x176   : > { %1423 = vmatprep.subr.bf16.mxu0 %v1534_v43  ;;  %1458 = vmatprep.subr.bf16.mxu1 %v1534_v43 }
 0x179   : > { %1424 = vmatpush3.bf16.msra.mxu0 %v1535_v45  ;;  %1466 = vmatpush3.bf16.msra.mxu1 %v1535_v45 }
 0x17a   : > { %1425 = vmatprep.subr.bf16.mxu0 %v1536_v47  ;;  %1459 = vmatprep.subr.bf16.mxu1 %v1536_v47 }
 0x17d   : > { %1426 = vmatpush3.bf16.msra.mxu0 %v1537_v48  ;;  %1467 = vmatpush3.bf16.msra.mxu1 %v1537_v48 }
 0x17e   : > { %1427 = vmatprep.subr.bf16.mxu0 %v1538_v49  ;;  %1460 = vmatprep.subr.bf16.mxu1 %v1538_v49  ;;  %v2451_v49 = vmov -1.0  }
 0x181   : > { %1428 = vmatpush3.bf16.msra.mxu0 %v1539_v50  ;;  %1468 = vmatpush3.bf16.msra.mxu1 %v1539_v50 }
 0x217   : > { %v600_v60 = vpop.f32.mrf.mxu0 }
 0x218   : > { %v601_v61 = vadd.f32 %v600_v60, %v1964_v58 }
 0x219   : > { %v602_v62 = vpop.f32.mrf.mxu0 }
 0x21a   : > { %v655_v63 = vmul.f32 0.70710677, %v601_v61  ;;  %v603_v1 = vadd.f32 %v602_v62, %v1966_v59  ;;  %v2008_v43 = vmul.f32 0.5, %v601_v61 }
 0x21b   : > { %v604_v36 = vpop.f32.mrf.mxu0 }
 0x21c   : > { %v703_v4 = vand.u32 2147483647, %v655_v63  ;;  %v656_v5 = vmul.f32 0.70710677, %v603_v1  ;;  %v605_v6 = vadd.f32 %v604_v36, %v1964_v58  ;;  %vm671_vm1 = vcmp.ge.f32.partialorder %v655_v63, 0.0 }
 0x21d   : > { %v606_v9 = vpop.f32.mrf.mxu0  ;;  %v2011_v50 = vsel %vm671_vm1, 1.0, %v2451_v49  ;;  %v2013_v51 = vmul.f32 0.5, %v603_v1 }
 0x21e   : > { %v719_v10 = vmul.f32 0.3275911, %v703_v4  ;;  %v704_v11 = vand.u32 2147483647, %v656_v5  ;;  %v1971_v44 = vmul.f32 0.70710677, %v605_v6  ;;  %v607_v12 = vadd.f32 %v606_v9, %v1966_v59 }
 0x21f   : > { %v610_v14 = vpop.f32.mrf.mxu0  ;;  %v911_v2 = vsub.f32 0.0, %v703_v4  ;;  %vm672_vm2 = vcmp.ge.f32.partialorder %v656_v5, 0.0  ;;  %v2022_v63 = vmul.f32 0.5, %v605_v6 }
 0x220   : > { %v735_v15 = vadd.f32 1.0, %v719_v10  ;;  %v720_v16 = vmul.f32 0.3275911, %v704_v11  ;;  %v705_v17 = vand.u32 2147483647, %v1971_v44  ;;  %v1981_v25 = vadd.f32 %v610_v14, %v1964_v58 }
 0x221   : > { %v1975_v20 = vmul.f32 0.70710677, %v607_v12  ;;  %v612_v37 = vpop.f32.mrf.mxu0  ;;  %v912_v38 = vsub.f32 0.0, %v704_v11  ;;  %v927_v47 = vmul.f32 %v911_v2, %v703_v4  ;;  %v2020_v60 = vsel %vm672_vm2, 1.0, %v2451_v49 }
 0x222   : > { %1556 = vrcp.f32 %v735_v15  ;;  %v736_v22 = vadd.f32 1.0, %v720_v16  ;;  %v721_v23 = vmul.f32 0.3275911, %v705_v17  ;;  %v1985_v30 = vmul.f32 0.70710677, %v1981_v25 }
 0x223   : > { %v1978_v46 = vand.u32 2147483647, %v1975_v20  ;;  %v614_v27 = vpop.f32.mrf.mxu0  ;;  %v928_v53 = vmul.f32 %v912_v38, %v704_v11  ;;  %v913_v61 = vsub.f32 0.0, %v705_v17  ;;  %v943_v9 = vmul.f32 1.442695, %v927_v47 }
 0x224   : > { %1558 = vrcp.f32 %v736_v22  ;;  %v737_v24 = vadd.f32 1.0, %v721_v23  ;;  %v1988_v54 = vand.u32 2147483647, %v1985_v30  ;;  %v1991_v31 = vadd.f32 %v614_v27, %v1964_v58 }
 0x225   : > { %v722_v26 = vmul.f32 0.3275911, %v1978_v46  ;;  %v1997_v0 = vpop.f32.mrf.mxu0  ;;  %vm673_vm3 = vcmp.ge.f32.partialorder %v1971_v44, 0.0  ;;  %v2029_v10 = vmul.f32 0.5, %v607_v12  ;;  %v945_v15 = vmul.f32 1.442695, %v928_v53 }
 0x226   : > { %1560 = vrcp.f32 %v737_v24  ;;  %v723_v32 = vmul.f32 0.3275911, %v1988_v54  ;;  %v1995_v33 = vmul.f32 0.70710677, %v1991_v31  ;;  %v613_v6 = vadd.f32 %v612_v37, %v1966_v59 }
 0x227   : > { %v738_v56 = vadd.f32 1.0, %v722_v26  ;;  %v620_v41 = vpop.f32.mrf.mxu0  ;;  %v929_v22 = vmul.f32 %v913_v61, %v705_v17  ;;  %vm674_vm4 = vcmp.ge.f32.partialorder %v1975_v20, 0.0  ;;  %v914_v27 = vsub.f32 0.0, %v1978_v46 }
 0x228   : > { %v739_v34 = vadd.f32 1.0, %v723_v32  ;;  %v2000_v21 = vand.u32 2147483647, %v1995_v33  ;;  %v2026_v1 = vadd.f32 %v620_v41, %v1964_v58  ;;  %v2049_v17 = vsel %vm673_vm3, 1.0, %v2451_v49 }
 0x229   : > { %1562 = vrcp.f32 %v738_v56  ;;  %v622_v4 = vpop.f32.mrf.mxu0  ;;  %v2054_v2 = vmul.f32 0.70710677, %v613_v6  ;;  %v930_v44 = vmul.f32 %v914_v27, %v1978_v46  ;;  %vm675_vm5 = vcmp.ge.f32.partialorder %v1985_v30, 0.0 }
 0x22a   : > { %1564 = vrcp.f32 %v739_v34  ;;  %v725_v40 = vmul.f32 0.3275911, %v2000_v21  ;;  %v2038_v24 = vadd.f32 %v622_v4, %v1966_v59  ;;  %v2043_v56 = vmul.f32 0.70710677, %v2026_v1 }
 0x22b   : > { %v2052_v34 = vsel %vm674_vm4, 1.0, %v2451_v49  ;;  %v2076_v46 = vmul.f32 0.5, %v613_v6  ;;  %v708_v4 = vand.u32 2147483647, %v2054_v2  ;;  %v624_v27 = vpop.f32.mrf.mxu0  ;;  %vm677_vm6 = vcmp.ge.f32.partialorder %v1995_v33, 0.0 }
 0x22c   : > { %v741_v48 = vadd.f32 1.0, %v725_v40  ;;  %v947_v40 = vmul.f32 1.442695, %v929_v22  ;;  %v2102_v29 = vadd.f32 %v624_v27, %v1964_v58  ;;  %v2470_v33 = vmov -1.0  }
 0x22d   : > { %v626_v27 = vpop.f32.mrf.mxu0  ;;  %vm679_vm7 = vcmp.ge.f32.partialorder %v2043_v56, 0.0  ;;  %vm676_vm11 = vcmp.ge.f32.partialorder %v2054_v2, 0.0 }
 0x22e   : > { %1566 = vrcp.f32 %v741_v48  ;;  %v617_v48 = vadd.f32 %v1997_v0, %v1966_v59 }
 0x22f   : > { %v2002_v35 = vpop.eup %1556  ;;  %1568 = vpow2.f32 %v943_v9 }
 0x230   : > { %v767_v39 = vmul.f32 1.0614054, %v2002_v35  ;;  %1570 = vpow2.f32 %v945_v15 }
 0x231   : > { %v2006_v42 = vpop.eup %1558  ;;  %1572 = vpow2.f32 %v947_v40 }
 0x232   : > { %v783_v45 = vadd.f32 -1.4531521, %v767_v39  ;;  %v768_v52 = vmul.f32 1.0614054, %v2006_v42 }
 0x233   : > { %v2016_v55 = vpop.eup %1560 }
 0x234   : > { %v799_v57 = vmul.f32 %v2002_v35, %v783_v45  ;;  %v784_v62 = vadd.f32 -1.4531521, %v768_v52  ;;  %v769_v36 = vmul.f32 1.0614054, %v2016_v55  ;;  %v2061_v45 = vmul.f32 0.70710677, %v2038_v24 }
 0x235   : > { %v2068_v52 = vand.u32 2147483647, %v2043_v56 }
 0x236   : > { %v815_v5 = vadd.f32 1.4214138, %v799_v57  ;;  %v2031_v11 = vpop.eup %1562  ;;  %v800_v14 = vmul.f32 %v2006_v42, %v784_v62  ;;  %v785_v16 = vadd.f32 -1.4531521, %v769_v36  ;;  %v2072_v62 = vmul.f32 0.5, %v1981_v25 }
 0x237   : > { %v770_v23 = vmul.f32 1.0614054, %v2031_v11  ;;  %v2056_v38 = vpop.eup %1564  ;;  %v915_v36 = vsub.f32 0.0, %v1988_v54  ;;  %v2080_v9 = vand.u32 2147483647, %v2061_v45  ;;  %v919_v13 = vsub.f32 0.0, %v2068_v52 }
 0x238   : > { %v816_v26 = vadd.f32 1.4214138, %v800_v14  ;;  %v801_v12 = vmul.f32 %v2016_v55, %v785_v16  ;;  %v831_v32 = vmul.f32 %v2002_v35, %v815_v5  ;;  %v771_v47 = vmul.f32 1.0614054, %v2056_v38 }
 0x239   : > { %v786_v20 = vadd.f32 -1.4531521, %v770_v23  ;;  %v949_v25 = vmul.f32 1.442695, %v930_v44  ;;  %v2085_v16 = vmul.f32 0.70710677, %v617_v48 }
 0x23a   : > { %v817_v37 = vadd.f32 1.4214138, %v801_v12  ;;  %v832_v39 = vmul.f32 %v2006_v42, %v816_v26  ;;  %v847_v53 = vadd.f32 -0.28449672, %v831_v32  ;;  %v787_v0 = vadd.f32 -1.4531521, %v771_v47 }
 0x23b   : > { %v802_v41 = vmul.f32 %v2031_v11, %v786_v20  ;;  %v2082_v14 = vpop.eup %1566  ;;  %v727_v22 = vmul.f32 0.3275911, %v2068_v52  ;;  %v728_v12 = vmul.f32 0.3275911, %v2080_v9  ;;  %v2094_v32 = vsel %vm675_vm5, 1.0, %v2451_v49 }
 0x23c   : > { %v833_v57 = vmul.f32 %v2016_v55, %v817_v37  ;;  %v848_v5 = vadd.f32 -0.28449672, %v832_v39  ;;  %v863_v6 = vmul.f32 %v2002_v35, %v847_v53  ;;  %v773_v26 = vmul.f32 1.0614054, %v2082_v14 }
 0x23d   : > { %v818_v61 = vadd.f32 1.4214138, %v802_v41  ;;  %v931_v20 = vmul.f32 %v915_v36, %v1988_v54  ;;  %v724_v37 = vmul.f32 0.3275911, %v708_v4  ;;  %v916_v39 = vsub.f32 0.0, %v708_v4  ;;  %v1569_v36 = vpop.eup %1568 }
 0x23e   : > { %v849_v23 = vadd.f32 -0.28449672, %v833_v57  ;;  %v864_v40 = vmul.f32 %v2006_v42, %v848_v5  ;;  %v803_v41 = vmul.f32 %v2056_v38, %v787_v0  ;;  %v917_v44 = vsub.f32 0.0, %v2000_v21 }
 0x23f   : > { %v834_v15 = vmul.f32 %v2031_v11, %v818_v61  ;;  %v744_v47 = vadd.f32 1.0, %v728_v12  ;;  %v710_v57 = vand.u32 2147483647, %v2085_v16  ;;  %v743_v61 = vadd.f32 1.0, %v727_v22 }
 0x240   : > { %v879_v30 = vadd.f32 0.2548296, %v863_v6  ;;  %v865_v49 = vmul.f32 %v2016_v55, %v849_v23  ;;  %v789_v54 = vadd.f32 -1.4531521, %v773_v26  ;;  %v951_v5 = vmul.f32 1.442695, %v931_v20 }
 0x241   : > { %v850_v53 = vadd.f32 -0.28449672, %v834_v15  ;;  %1574 = vrcp.f32 %v744_v47  ;;  %v2106_v0 = vmul.f32 0.5, %v1991_v31  ;;  %v1571_v15 = vpop.eup %1570  ;;  %v880_v12 = vadd.f32 0.2548296, %v864_v40 }
 0x242   : > { %1576 = vpow2.f32 %v949_v25  ;;  %v819_v28 = vadd.f32 1.4214138, %v803_v41  ;;  %v740_v22 = vadd.f32 1.0, %v724_v37  ;;  %v932_v19 = vmul.f32 %v916_v39, %v708_v4 }
 0x243   : > { %v866_v6 = vmul.f32 %v2031_v11, %v850_v53  ;;  %v933_v23 = vmul.f32 %v917_v44, %v2000_v21  ;;  %v918_v26 = vsub.f32 0.0, %v710_v57  ;;  %1578 = vrcp.f32 %v743_v61 }
 0x244   : > { %v895_v25 = vmul.f32 %v2002_v35, %v879_v30  ;;  %v881_v20 = vadd.f32 0.2548296, %v865_v49  ;;  %v805_v31 = vmul.f32 %v2082_v14, %v789_v54  ;;  %v2114_v47 = vmul.f32 0.70710677, %v2102_v29  ;;  %v1573_v49 = vpop.eup %1572 }
 0x245   : > { %v2117_v40 = vsel %vm677_vm6, 1.0, %v2470_v33  ;;  %v2119_v37 = vmul.f32 0.5, %v617_v48  ;;  %v726_v4 = vmul.f32 0.3275911, %v710_v57  ;;  %v2122_v39 = vadd.f32 %v626_v27, %v1966_v59 }
 0x246   : > { %v896_v21 = vmul.f32 %v2006_v42, %v880_v12  ;;  %v835_v41 = vmul.f32 %v2056_v38, %v819_v28  ;;  %1580 = vpow2.f32 %v951_v5  ;;  %v953_v35 = vmul.f32 1.442695, %v932_v19 }
 0x247   : > { %v882_v44 = vadd.f32 0.2548296, %v866_v6  ;;  %1582 = vrcp.f32 %v740_v22  ;;  %v955_v53 = vmul.f32 1.442695, %v933_v23  ;;  %v934_v61 = vmul.f32 %v918_v26, %v710_v57 }
 0x248   : > { %v975_v30 = vmul.f32 %v1569_v36, %v895_v25  ;;  %v897_v54 = vmul.f32 %v2016_v55, %v881_v20  ;;  %v821_v48 = vadd.f32 1.4214138, %v805_v31  ;;  %v2128_v18 = vand.u32 2147483647, %v2114_v47  ;;  %v630_v36 = vpop.f32.mrf.mxu0 }
 0x249   : > { %v742_v27 = vadd.f32 1.0, %v726_v4  ;;  %v920_v42 = vsub.f32 0.0, %v2080_v9  ;;  %v2133_v28 = vmul.f32 0.70710677, %v2122_v39  ;;  %v976_v19 = vmul.f32 %v1571_v15, %v896_v21 }
 0x24a   : > { %v851_v5 = vadd.f32 -0.28449672, %v835_v41  ;;  %1584 = vpow2.f32 %v953_v35  ;;  %v729_v57 = vmul.f32 0.3275911, %v2128_v18  ;;  %v898_v55 = vmul.f32 %v2031_v11, %v882_v44  ;;  %v632_v35 = vpop.f32.mrf.mxu0 }
 0x24b   : > { %1586 = vpow2.f32 %v955_v53  ;;  %v957_v12 = vmul.f32 1.442695, %v934_v61  ;;  %v991_v22 = vsub.f32 1.0, %v975_v30  ;;  %v977_v6 = vmul.f32 %v1573_v49, %v897_v54 }
 0x24c   : > { %v837_v23 = vmul.f32 %v2082_v14, %v821_v48  ;;  %v745_v26 = vadd.f32 1.0, %v729_v57  ;;  %1588 = vrcp.f32 %v742_v27  ;;  %v935_v15 = vmul.f32 %v919_v13, %v2068_v52  ;;  %v634_v57 = vpop.f32.mrf.mxu0 }
 0x24d   : > { %v936_v20 = vmul.f32 %v920_v42, %v2080_v9  ;;  %v2144_v31 = vand.u32 2147483647, %v2133_v28  ;;  %v992_v4 = vsub.f32 1.0, %v976_v19  ;;  %v867_v21 = vmul.f32 %v2056_v38, %v851_v5 }
 0x24e   : > { %v2139_v25 = vpop.eup %1574  ;;  %1590 = vrcp.f32 %v745_v26  ;;  %v2151_v44 = vsel %vm679_vm7, 1.0, %v2470_v33  ;;  %v1007_v9 = vmul.f32 %v991_v22, %v2011_v50  ;;  %v993_v53 = vsub.f32 1.0, %v977_v6 }
 0x24f   : > { %v1577_v11 = vpop.eup %1576  ;;  %v776_v41 = vmul.f32 1.0614054, %v2139_v25  ;;  %1592 = vpow2.f32 %v957_v12  ;;  %v730_v13 = vmul.f32 0.3275911, %v2144_v31  ;;  %v853_v61 = vadd.f32 -0.28449672, %v837_v23 }
 0x250   : > { %v978_v49 = vmul.f32 %v1577_v11, %v898_v55  ;;  %v2154_v52 = vpop.eup %1578  ;;  %v2158_v30 = vadd.f32 %v630_v36, %v1964_v58  ;;  %v959_v54 = vmul.f32 1.442695, %v935_v15  ;;  %v2161_v48 = vmul.f32 0.5, %v2038_v24 }
 0x251   : > { %vm680_vm8 = vcmp.ge.f32.partialorder %v2061_v45, 0.0  ;;  %v746_v56 = vadd.f32 1.0, %v730_v13  ;;  %v1008_v27 = vmul.f32 %v992_v4, %v2020_v60  ;;  %v883_v42 = vadd.f32 0.2548296, %v867_v21 }
 0x252   : > { %v792_v19 = vadd.f32 -1.4531521, %v776_v41  ;;  %v961_v5 = vmul.f32 1.442695, %v936_v20  ;;  %v994_v50 = vsub.f32 1.0, %v978_v49  ;;  %v2169_v36 = vadd.f32 %v632_v35, %v1966_v59 }
 0x253   : > { %v1581_v55 = vpop.eup %1580  ;;  %1594 = vrcp.f32 %v746_v56  ;;  %v2166_v12 = vmul.f32 0.70710677, %v2158_v30  ;;  %v1023_v22 = vadd.f32 1.0, %v1007_v9  ;;  %v1009_v6 = vmul.f32 %v993_v53, %v2049_v17  ;;  %v636_v56 = vpop.f32.mrf.mxu0 }
 0x254   : > { %v2171_v24 = vpop.eup %1582  ;;  %v869_v60 = vmul.f32 %v2082_v14, %v853_v61  ;;  %v775_v23 = vmul.f32 1.0614054, %v2154_v52  ;;  %1596 = vpow2.f32 %v959_v54  ;;  %v2179_v26 = vsel %vm680_vm8, 1.0, %v2470_v33 }
 0x255   : > { %v2182_v15 = vand.u32 2147483647, %v2166_v12  ;;  %v2185_v20 = vadd.f32 %v634_v57, %v1964_v58  ;;  %v1024_v11 = vadd.f32 1.0, %v1008_v27  ;;  %v899_v4 = vmul.f32 %v2056_v38, %v883_v42 }
 0x256   : > { %v808_v17 = vmul.f32 %v2139_v25, %v792_v19  ;;  %1598 = vpow2.f32 %v961_v5  ;;  %v1010_v41 = vmul.f32 %v994_v50, %v2052_v34  ;;  %vm681_vm9 = vcmp.ge.f32.partialorder %v2114_v47, 0.0 }
 0x257   : > { %v2189_v21 = vpop.eup %1584  ;;  %v731_v45 = vmul.f32 0.3275911, %v2182_v15  ;;  %v2195_v35 = vmul.f32 0.70710677, %v2169_v36  ;;  %v2198_v58 = vmul.f32 %v1023_v22, %v2008_v43  ;;  %v1025_v13 = vadd.f32 1.0, %v1009_v6 }
 0x258   : > { %v1587_v49 = vpop.eup %1586  ;;  %v885_v38 = vadd.f32 0.2548296, %v869_v60  ;;  %v791_v9 = vadd.f32 -1.4531521, %v775_v23  ;;  %v922_v53 = vsub.f32 0.0, %v2144_v31  ;;  %v1040_v42 = vmul.f32 %v1024_v11, %v2013_v51 }
 0x259   : > { %v747_v61 = vadd.f32 1.0, %v731_v45  ;;  %v2202_v54 = vand.u32 2147483647, %v2195_v35  ;;  %v2205_v34 = vmul.f32 0.70710677, %v2185_v20  ;;  %v2207_v27 = vpop.eup %1588  ;;  %v979_v19 = vmul.f32 %v1581_v55, %v899_v4 }
 0x25a   : > { %v824_v43 = vadd.f32 1.4214138, %v808_v17  ;;  %v2213_v5 = vsel %vm681_vm9, 1.0, %v2470_v33  ;;  %v1026_v50 = vadd.f32 1.0, %v1010_v41  ;;  %v921_v22 = vsub.f32 0.0, %v2128_v18 }
 0x25b   : > { %v2215_v57 = vpop.eup %1590  ;;  %1600 = vrcp.f32 %v747_v61  ;;  %v732_v6 = vmul.f32 0.3275911, %v2202_v54  ;;  %v901_v23 = vmul.f32 %v2082_v14, %v885_v38  ;;  %v807_v51 = vmul.f32 %v2154_v52, %v791_v9 }
 0x25c   : > { %v2219_v60 = vpop.eup %1592  ;;  %v777_v55 = vmul.f32 1.0614054, %v2215_v57  ;;  %v2225_v47 = vadd.f32 %v636_v56, %v1966_v59  ;;  %v1041_v11 = vmul.f32 %v1025_v13, %v2022_v63  ;;  %v938_v4 = vmul.f32 %v922_v53, %v2144_v31 }
 0x25d   : > { %v748_v17 = vadd.f32 1.0, %v732_v6  ;;  %v2230_v41 = vand.u32 2147483647, %v2205_v34  ;;  %v995_v45 = vsub.f32 1.0, %v979_v19  ;;  %v840_v61 = vmul.f32 %v2139_v25, %v824_v43 }
 0x25e   : > { %v793_v7 = vadd.f32 -1.4531521, %v777_v55  ;;  %v2234_v14 = vmul.f32 0.5, %v2122_v39  ;;  %v1042_v38 = vmul.f32 %v1026_v50, %v2029_v10  ;;  %v937_v59 = vmul.f32 %v921_v22, %v2128_v18 }
 0x25f   : > { %1602 = vrcp.f32 %v748_v17  ;;  %v733_v63 = vmul.f32 0.3275911, %v2230_v41  ;;  %v981_v31 = vmul.f32 %v1587_v49, %v901_v23  ;;  %v823_v9 = vadd.f32 1.4214138, %v807_v51 }
 0x260   : > { %v2239_v13 = vpop.eup %1594  ;;  %v809_v53 = vmul.f32 %v2215_v57, %v793_v7  ;;  %v2243_v56 = vmul.f32 0.70710677, %v2225_v47  ;;  %v965_v39 = vmul.f32 1.442695, %v938_v4  ;;  %v923_v43 = vsub.f32 0.0, %v2182_v15 }
 0x261   : > { %v778_v19 = vmul.f32 1.0614054, %v2239_v13  ;;  %v749_v10 = vadd.f32 1.0, %v733_v63  ;;  %v2247_v50 = vpop.eup %1596  ;;  %v1055_v18 = vpack.c.bf16 %v1041_v11, %v2198_v58  ;;  %v856_v22 = vadd.f32 -0.28449672, %v840_v61 }
 0x262   : > { %v825_v6 = vadd.f32 1.4214138, %v809_v53  ;;  %v718_v49 = vand.u32 2147483647, %v2243_v56  ;;  %v963_v7 = vmul.f32 1.442695, %v937_v59  ;;  %v2255_v55 = vmul.f32 %v995_v45, %v2094_v32 }
 0x263   : > { %v2251_v23 = vpop.eup %1598  ;;  %vm682_vm10 = vcmp.ge.f32.partialorder %v2133_v28, 0.0  ;;  %v794_v51 = vadd.f32 -1.4531521, %v778_v19  ;;  %1604 = vrcp.f32 %v749_v10  ;;  %v997_v4 = vsub.f32 1.0, %v981_v31 }
 0x264   : > { %v839_v17 = vmul.f32 %v2154_v52, %v823_v9  ;;  %v734_v63 = vmul.f32 0.3275911, %v718_v49  ;;  %1606 = vpow2.f32 %v965_v39  ;;  %v939_v11 = vmul.f32 %v923_v43, %v2182_v15 }
 0x265   : > { %v810_v58 = vmul.f32 %v2239_v13, %v794_v51  ;;  %v1056_v61 = vpack.c.bf16 %v1042_v38, %v1040_v42  ;;  %v872_v53 = vmul.f32 %v2139_v25, %v856_v22  ;;  %v841_v59 = vmul.f32 %v2215_v57, %v825_v6 }
 0x266   : > { %v924_v19 = vsub.f32 0.0, %v2202_v54  ;;  %v750_v10 = vadd.f32 1.0, %v734_v63  ;;  %1608 = vpow2.f32 %v963_v7  ;;  %v2266_v32 = vsel %vm682_vm10, 1.0, %v2470_v33 }
 0x267   : > { %v826_v45 = vadd.f32 1.4214138, %v810_v58  ;;  %1230 = vmatprep.mubr.bf16.mxu0 %v1056_v61  ;;  %v772_v31 = vmul.f32 1.0614054, %v2171_v24  ;;  %v1013_v15 = vmul.f32 %v997_v4, %v2117_v40  ;;  %v855_v42 = vadd.f32 -0.28449672, %v839_v17 }
 0x268   : > { %v2269_v9 = vpop.eup %1600  ;;  %v925_v38 = vsub.f32 0.0, %v2230_v41  ;;  %1610 = vrcp.f32 %v750_v10  ;;  %1231 = vmatmul.mubr.bf16.vlgmr.msra.gmra.mxu0 %v1055_v18  ;;  %v774_v28 = vmul.f32 1.0614054, %v2207_v27  ;;  %v888_v6 = vadd.f32 0.2548296, %v872_v53 }
 0x269   : > { %v842_v39 = vmul.f32 %v2239_v13, %v826_v45  ;;  %v779_v43 = vmul.f32 1.0614054, %v2269_v9  ;;  %v788_v22 = vadd.f32 -1.4531521, %v772_v31  ;;  %v857_v7 = vadd.f32 -0.28449672, %v841_v59 }
 0x26a   : > { %v967_v51 = vmul.f32 1.442695, %v939_v11  ;;  %v940_v63 = vmul.f32 %v924_v19, %v2202_v54  ;;  %v790_v40 = vadd.f32 -1.4531521, %v774_v28  ;;  %v2280_v18 = vadd.f32 1.0, %v1013_v15 }
 0x26b   : > { %v858_v58 = vadd.f32 -0.28449672, %v842_v39  ;;  %v795_v61 = vadd.f32 -1.4531521, %v779_v43  ;;  %v804_v4 = vmul.f32 %v2171_v24, %v788_v22  ;;  %v871_v10 = vmul.f32 %v2154_v52, %v855_v42 }
 0x26c   : > { %v2278_v17 = vpop.eup %1602  ;;  %v941_v45 = vmul.f32 %v925_v38, %v2230_v41  ;;  %v926_v8 = vsub.f32 0.0, %v718_v49  ;;  %v806_v59 = vmul.f32 %v2207_v27, %v790_v40  ;;  %v904_v19 = vmul.f32 %v2139_v25, %v888_v6 }
 0x26d   : > { %v874_v53 = vmul.f32 %v2239_v13, %v858_v58  ;;  %v811_v11 = vmul.f32 %v2269_v9, %v795_v61  ;;  %v780_v54 = vmul.f32 1.0614054, %v2278_v17  ;;  %1612 = vpow2.f32 %v967_v51 }
 0x26e   : > { %v969_v31 = vmul.f32 1.442695, %v940_v63  ;;  %v820_v39 = vadd.f32 1.4214138, %v804_v4  ;;  %v873_v15 = vmul.f32 %v2215_v57, %v857_v7  ;;  %v971_v38 = vmul.f32 1.442695, %v941_v45 }
 0x26f   : > { %v890_v43 = vadd.f32 0.2548296, %v874_v53  ;;  %v827_v42 = vadd.f32 1.4214138, %v811_v11  ;;  %v796_v28 = vadd.f32 -1.4531521, %v780_v54  ;;  %v942_v22 = vmul.f32 %v926_v8, %v718_v49 }
 0x270   : > { %v2290_v41 = vpop.eup %1604  ;;  %v822_v58 = vadd.f32 1.4214138, %v806_v59  ;;  %v836_v61 = vmul.f32 %v2171_v24, %v820_v39  ;;  %v984_v7 = vmul.f32 %v2251_v23, %v904_v19  ;;  %1614 = vpow2.f32 %v969_v31 }
 0x271   : > { %v906_v3 = vmul.f32 %v2239_v13, %v890_v43  ;;  %v843_v40 = vmul.f32 %v2269_v9, %v827_v42  ;;  %v812_v25 = vmul.f32 %v2278_v17, %v796_v28  ;;  %v781_v6 = vmul.f32 1.0614054, %v2290_v41  ;;  %v1607_v51 = vpop.eup %1606 }
 0x272   : > { %v838_v63 = vmul.f32 %v2207_v27, %v822_v58  ;;  %v852_v8 = vadd.f32 -0.28449672, %v836_v61  ;;  %v889_v49 = vadd.f32 0.2548296, %v873_v15  ;;  %vm678_vm12 = vcmp.ge.f32.partialorder %v2085_v16, 0.0 }
 0x273   : > { %v986_v4 = vmul.f32 %v1607_v51, %v906_v3  ;;  %v828_v45 = vadd.f32 1.4214138, %v812_v25  ;;  %v797_v53 = vadd.f32 -1.4531521, %v781_v6  ;;  %v1609_v13 = vpop.eup %1608  ;;  %v887_v11 = vadd.f32 0.2548296, %v871_v10 }
 0x274   : > { %1616 = vpow2.f32 %v971_v38  ;;  %v854_v54 = vadd.f32 -0.28449672, %v838_v63  ;;  %v868_v59 = vmul.f32 %v2171_v24, %v852_v8  ;;  %v859_v43 = vadd.f32 -0.28449672, %v843_v40 }
 0x275   : > { %v2302_v39 = vpop.eup %1610  ;;  %v844_v23 = vmul.f32 %v2278_v17, %v828_v45  ;;  %v813_v19 = vmul.f32 %v2290_v41, %v797_v53  ;;  %v973_v31 = vmul.f32 1.442695, %v942_v22  ;;  %v1002_v15 = vsub.f32 1.0, %v986_v4 }
 0x276   : > { %v782_v3 = vmul.f32 1.0614054, %v2302_v39  ;;  %v870_v42 = vmul.f32 %v2207_v27, %v854_v54  ;;  %v884_v28 = vadd.f32 0.2548296, %v868_v59  ;;  %v1000_v58 = vsub.f32 1.0, %v984_v7 }
 0x277   : > { %v905_v10 = vmul.f32 %v2215_v57, %v889_v49  ;;  %v860_v38 = vadd.f32 -0.28449672, %v844_v23  ;;  %v829_v61 = vadd.f32 1.4214138, %v813_v19  ;;  %v903_v25 = vmul.f32 %v2154_v52, %v887_v11 }
 0x278   : > { %v798_v6 = vadd.f32 -1.4531521, %v782_v3  ;;  %v886_v40 = vadd.f32 0.2548296, %v870_v42  ;;  %v900_v51 = vmul.f32 %v2171_v24, %v884_v28  ;;  %v875_v63 = vmul.f32 %v2269_v9, %v859_v43 }
 0x279   : > { %v876_v22 = vmul.f32 %v2278_v17, %v860_v38  ;;  %v845_v8 = vmul.f32 %v2290_v41, %v829_v61  ;;  %1618 = vpow2.f32 %v973_v31  ;;  %v1018_v4 = vmul.f32 %v1002_v15, %v2266_v32 }
 0x27a   : > { %v814_v7 = vmul.f32 %v2302_v39, %v798_v6  ;;  %v902_v57 = vmul.f32 %v2207_v27, %v886_v40  ;;  %v980_v49 = vmul.f32 %v2189_v21, %v900_v51  ;;  %v1613_v52 = vpop.eup %1612  ;;  %v1016_v45 = vmul.f32 %v1000_v58, %v2179_v26 }
 0x27b   : > { %v985_v53 = vmul.f32 %v1609_v13, %v905_v10  ;;  %v892_v24 = vadd.f32 0.2548296, %v876_v22  ;;  %v861_v11 = vadd.f32 -0.28449672, %v845_v8  ;;  %v983_v54 = vmul.f32 %v2247_v50, %v903_v25 }
 0x27c   : > { %v830_v59 = vadd.f32 1.4214138, %v814_v7  ;;  %v982_v43 = vmul.f32 %v2219_v60, %v902_v57  ;;  %v996_v23 = vsub.f32 1.0, %v980_v49  ;;  %v891_v19 = vadd.f32 0.2548296, %v875_v63 }
 0x27d   : > { %v908_v32 = vmul.f32 %v2278_v17, %v892_v24  ;;  %v877_v31 = vmul.f32 %v2290_v41, %v861_v11  ;;  %v692_v21 = vsel %vm676_vm11, 1.0, %v2470_v33  ;;  %v1034_v27 = vadd.f32 1.0, %v1018_v4  ;;  %v1615_v3 = vpop.eup %1614 }
 0x27e   : > { %v846_v26 = vmul.f32 %v2302_v39, %v830_v59  ;;  %v998_v13 = vsub.f32 1.0, %v982_v43  ;;  %v1012_v15 = vmul.f32 %v996_v23, %v692_v21  ;;  %v1032_v50 = vadd.f32 1.0, %v1016_v45 }
 0x27f   : > { %v1001_v42 = vsub.f32 1.0, %v985_v53  ;;  %v893_v28 = vadd.f32 0.2548296, %v877_v31  ;;  %v694_v60 = vsel %vm678_vm12, 1.0, %v2470_v33  ;;  %v988_v17 = vmul.f32 %v1615_v3, %v908_v32 }
 0x280   : > { %v862_v58 = vadd.f32 -0.28449672, %v846_v26  ;;  %v1014_v10 = vmul.f32 %v998_v13, %v694_v60  ;;  %v1028_v38 = vadd.f32 1.0, %v1012_v15  ;;  %v1027_v2 = vadd.f32 1.0, %v2255_v55 }
 0x281   : > { %v1617_v61 = vpop.eup %1616  ;;  %v999_v25 = vsub.f32 1.0, %v983_v54  ;;  %v907_v6 = vmul.f32 %v2269_v9, %v891_v19  ;;  %v909_v40 = vmul.f32 %v2290_v41, %v893_v28  ;;  %v1045_v51 = vmul.f32 %v2280_v18, %v2106_v0 }
 0x282   : > { %v1050_v63 = vmul.f32 %v1034_v27, %v2234_v14  ;;  %v878_v16 = vmul.f32 %v2302_v39, %v862_v58  ;;  %v1030_v22 = vadd.f32 1.0, %v1014_v10  ;;  %v1048_v8 = vmul.f32 %v1032_v50, %v2161_v48 }
 0x283   : > { %v1017_v4 = vmul.f32 %v1001_v42, %v2213_v5  ;;  %vm684_vm13 = vcmp.ge.f32.partialorder %v2195_v35, 0.0  ;;  %v989_v55 = vmul.f32 %v1617_v61, %v909_v40  ;;  %v1004_v7 = vsub.f32 1.0, %v988_v17  ;;  %v1390_v17 = vld [vmem:[%s2448_s7] ss:$0 sm:$0xff]  ;;  %v2472_v40 = vld [vmem:[#allocation7_spill] sm:$0xff] }
 0x284   : > { %v894_v57 = vadd.f32 0.2548296, %v878_v16  ;;  %v1044_v9 = vmul.f32 %v1028_v38, %v2076_v46  ;;  %v1046_v41 = vmul.f32 %v1030_v22, %v2119_v37  ;;  %v1043_v0 = vmul.f32 %v1027_v2, %v2072_v62  ;;  %v2471_v2 = vld [vmem:[#allocation5_spill] sm:$0xff] }
 0x285   : > { %v1015_v14 = vmul.f32 %v999_v25, %v2151_v44  ;;  %v987_v18 = vmul.f32 %v1613_v52, %v907_v6  ;;  %v700_v45 = vsel %vm684_vm13, 1.0, %v2470_v33  ;;  %v1060_v53 = vpack.c.bf16 %v1050_v63, %v1048_v8 }
 0x286   : > { %v1619_v49 = vpop.eup %1618  ;;  %v910_v48 = vmul.f32 %v2302_v39, %v894_v57  ;;  %v1058_v5 = vpack.c.bf16 %v1046_v41, %v1044_v9  ;;  %v1033_v35 = vadd.f32 1.0, %v1017_v4  ;;  %vm685_vm14 = vcmp.ge.f32.partialorder %v2205_v34, 0.0 }
 0x287   : > { %v1005_v24 = vsub.f32 1.0, %v989_v55  ;;  %v1057_v11 = vpack.c.bf16 %v1045_v51, %v1043_v0  ;;  %v1020_v46 = vmul.f32 %v1004_v7, %v700_v45  ;;  %vm686_vm15 = vcmp.ge.f32.partialorder %v2243_v56, 0.0  ;;  %v2473_v7 = vld [vmem:[#allocation6_spill] sm:$0xff] }
 0x288   : > { %v990_v37 = vmul.f32 %v1619_v49, %v910_v48  ;;  %1238 = vmatprep.mubr.bf16.mxu1 %v1058_v5  ;;  %v1031_v62 = vadd.f32 1.0, %v1015_v14  ;;  %v649_v44 = vmul.f32 0.5, %v2102_v29  ;;  %vm683_vm1 = vcmp.ge.f32.partialorder %v2166_v12, 0.0 }
 0x289   : > { %v1003_v52 = vsub.f32 1.0, %v987_v18  ;;  %1239 = vmatmul.mubr.bf16.vlgmr.msra.gmra.mxu1 %v1057_v11  ;;  %v701_v39 = vsel %vm685_vm14, 1.0, %v2470_v33  ;;  %v647_v34 = vmul.f32 0.5, %v2026_v1  ;;  %v702_v23 = vsel %vm686_vm15, 1.0, %v2470_v33  ;;  %v2474_v18 = vld [vmem:[#allocation8_spill] sm:$0xff] }
 0x28a   : > { %v1006_v54 = vsub.f32 1.0, %v990_v37  ;;  %1246 = vmatprep.mubr.bf16.mxu1 %v1060_v53  ;;  %v1049_v59 = vmul.f32 %v1033_v35, %v649_v44  ;;  %v1021_v43 = vmul.f32 %v1005_v24, %v701_v39  ;;  %v699_v56 = vsel %vm683_vm1, 1.0, %v2470_v33  ;;  %v2475_v35 = vld [vmem:[#allocation9_spill] sm:$0xff]  ;;  %v2476_v44 = vld [vmem:[#allocation10_spill] sm:$0xff] }
 0x28b   : > { %v1036_v19 = vadd.f32 1.0, %v1020_v46  ;;  %v1047_v31 = vmul.f32 %v1031_v62, %v647_v34  ;;  %v1019_v29 = vmul.f32 %v1003_v52, %v699_v56  ;;  %v652_v12 = vmul.f32 0.5, %v2169_v36 }
 0x28c   : > { %v1022_v32 = vmul.f32 %v1006_v54, %v702_v23  ;;  %v654_v21 = vmul.f32 0.5, %v2225_v47  ;;  %v1037_v26 = vadd.f32 1.0, %v1021_v43  ;;  %v653_v50 = vmul.f32 0.5, %v2185_v20  ;;  %v2477_v43 = vld [vmem:[#allocation11_spill] sm:$0xff] }
 0x28d   : > { %v1059_v13 = vpack.c.bf16 %v1049_v59, %v1047_v31  ;;  %v1052_v15 = vmul.f32 %v1036_v19, %v652_v12  ;;  %v1035_v3 = vadd.f32 1.0, %v1019_v29  ;;  %v651_v42 = vmul.f32 0.5, %v2158_v30 }
 0x28e   : > { %v1038_v27 = vadd.f32 1.0, %v1022_v32  ;;  %v1053_v28 = vmul.f32 %v1037_v26, %v653_v50  ;;  %v2478_v32 = vld [vmem:[#allocation12_spill] sm:$0xff] }
 0x28f   : > { %v1051_v60 = vmul.f32 %v1035_v3, %v651_v42 }
 0x290   : > { %v1054_v1 = vmul.f32 %v1038_v27, %v654_v21 }
 0x291   : > { %1247 = vmatmul.mubr.bf16.gmra.mxu1 %v1059_v13  ;;  %v1061_v36 = vpack.c.bf16 %v1053_v28, %v1051_v60 }
 0x292   : > { %v1062_v33 = vpack.c.bf16 %v1054_v1, %v1052_v15 }
 0x294   : > { %1254 = vmatprep.mubr.bf16.mxu1 %v1062_v33 }
 0x299   : > { %1255 = vmatmul.mubr.bf16.gmra.mxu1 %v1061_v36 }
 0x328   : > { %v1429_v47 = vpop.f32.mrf.mxu0 }
 0x32a   : > { %v1430_v58 = vpop.f32.mrf.mxu0 }
 0x32b   : > { %v1431_v10 = vadd.f32 %v1430_v58, %v1429_v47 }
 0x32c   : > { %v1432_v20 = vpop.f32.mrf.mxu0 }
 0x32d   : > { %v1233_v38 = vadd.f32 %v1431_v10, %v1390_v17 }
 0x32e   : > { %v1433_v61 = vpop.f32.mrf.mxu0 }
 0x32f   : > { %v1263_v30 = vadd.f32 %v1233_v38, %v2471_v2  ;;  %v1434_v25 = vadd.f32 %v1433_v61, %v1432_v20 }
 0x331   : > { %1271 = vst.msk [vmem:[%s2365_s18] sm:$0xff] %vm356_vm0, %v1263_v30  ;;  %v1236_v6 = vadd.f32 %v1434_v25, %v1390_v17 }
 0x333   : > { %v1264_v51 = vadd.f32 %v1236_v6, %v2472_v40 }
 0x335   : > { %1272 = vst.msk [vmem:[%s2365_s18 + $0x8] sm:$0xff] %vm356_vm0, %v1264_v51 }
 0x349   : > { %v1435_v63 = vpop.f32.mrf.mxu1 }
 0x34b   : > { %v1436_v16 = vpop.f32.mrf.mxu1 }
 0x34c   : > { %v1437_v22 = vadd.f32 %v1436_v16, %v1435_v63 }
 0x34d   : > { %v1438_v8 = vpop.f32.mrf.mxu1 }
 0x34e   : > { %v1241_v4 = vadd.f32 %v1437_v22, %v1390_v17 }
 0x34f   : > { %v1439_v55 = vpop.f32.mrf.mxu1 }
 0x350   : > { %v1265_v57 = vadd.f32 %v1241_v4, %v2473_v7  ;;  %v1440_v9 = vadd.f32 %v1439_v55, %v1438_v8 }
 0x351   : > { %v1441_v41 = vpop.f32.mrf.mxu1 }
 0x352   : > { %1273 = vst.msk [vmem:[%s2365_s18 + $0x10] sm:$0xff] %vm356_vm0, %v1265_v57  ;;  %v1244_v0 = vadd.f32 %v1440_v9, %v1390_v17 }
 0x353   : > { %v1442_v14 = vpop.f32.mrf.mxu1 }
 0x354   : > { %v1266_v49 = vadd.f32 %v1244_v0, %v2474_v18  ;;  %v1443_v45 = vadd.f32 %v1442_v14, %v1441_v41 }
 0x355   : > { %v1444_v48 = vpop.f32.mrf.mxu1 }
 0x356   : > { %1274 = vst.msk [vmem:[%s2365_s18 + $0x18] sm:$0xff] %vm356_vm0, %v1266_v49  ;;  %v1249_v5 = vadd.f32 %v1443_v45, %v1390_v17 }
 0x357   : > { %v1445_v53 = vpop.f32.mrf.mxu1 }
 0x358   : > { %v1267_v24 = vadd.f32 %v1249_v5, %v2475_v35  ;;  %v1446_v11 = vadd.f32 %v1445_v53, %v1444_v48 }
 0x359   : > { %v1447_v46 = vpop.f32.mrf.mxu1 }
 0x35a   : > { %1275 = vst.msk [vmem:[%s2365_s18 + $0x20] sm:$0xff] %vm356_vm0, %v1267_v24  ;;  %v1252_v37 = vadd.f32 %v1446_v11, %v1390_v17 }
 0x35b   : > { %v1448_v62 = vpop.f32.mrf.mxu1 }
 0x35c   : > { %v1268_v52 = vadd.f32 %v1252_v37, %v2476_v44  ;;  %v1449_v39 = vadd.f32 %v1448_v62, %v1447_v46 }
 0x35d   : > { %v1450_v54 = vpop.f32.mrf.mxu1 }
 0x35e   : > { %1276 = vst.msk [vmem:[%s2365_s18 + $0x28] sm:$0xff] %vm356_vm0, %v1268_v52  ;;  %v1257_v34 = vadd.f32 %v1449_v39, %v1390_v17 }
 0x35f   : > { %v1451_v59 = vpop.f32.mrf.mxu1 }
 0x360   : > { %v1269_v23 = vadd.f32 %v1257_v34, %v2477_v43  ;;  %v1452_v56 = vadd.f32 %v1451_v59, %v1450_v54 }
 0x362   : > { %1277 = vst.msk [vmem:[%s2365_s18 + $0x30] sm:$0xff] %vm356_vm0, %v1269_v23  ;;  %v1260_v19 = vadd.f32 %v1452_v56, %v1390_v17 }
 0x364   : > { %v1270_v31 = vadd.f32 %v1260_v19, %v2478_v32 }
 0x366   : > { %1278 = vst.msk [vmem:[%s2365_s18 + $0x38] sm:$0xff] %vm356_vm0, %v1270_v31 }
 0x367   : > { %1633 = shalt.err (!%p1630_p3)
}
 0x368   : > { %s1634_s10 = scalar_lea.hbm %s2392_s23, 1024  ;;  %s1638_s18 = scalar_lea.hbm %s2449_s8, 2048 }
 0x369   : > { %p1635_p4 = scmp.ne.s32.totalorder %s2392_s23, %s1634_s10  ;;  %p1639_p9 = scmp.lt.s32.totalorder %s2392_s23, %s2449_s8 }
 0x36a   : > { %p1640_p10 = scmp.lt.s32.totalorder %s1638_s18, %s1634_s10 }
 0x36b   : > { %p1636_p7 = pnand %p1635_p4, %p1770_p5 }
 0x36c   : > { %p1641_p11 = por %p1640_p10, %p1639_p9 }
 0x36d   : > { %p1637_p8 = pneg %p1636_p7 }
 0x36f   : > { %p1642_p12 = pnand %p1641_p11, %p1637_p8 }
 0x371   : > { %1645 = shalt.err (!%p1642_p12)
}
 0x372   : > { %s1685_s22 = smov 128   ;;  %s1686_s24 = smov 8  }
 0x373   : > { %1469 = dma.vmem_to_hbm [thread:$0]  (%p1770_p5), %s2394_s20, 1024, %s2392_s23, %s2401_s9, %s1685_s22, %s1685_s22, %s1686_s24  }
 0x374 PF: > { %p1475_p13 = scmp.ge.s32.totalorder %s1680_s30, 2  ;;  %s1308_s25 = sand.u32 1, %s1668_s27  }
 0x375   : > { %s1309_s26 = scalar_lea.sflag [#allocation3], %s1308_s25 }
 0x376   : > { %p1472_p0 = pnand %p1475_p13, %p1774_p6 }
 0x378   : > { %p1473_p1 = pneg %p1472_p0 }
 0x37a   : > { %1663 = dma.done.wait (%p1473_p1), %s1309_s26, 1024  }
 0x37b   : > { %1665 = vsyncadd (%p1473_p1), %s1309_s26, 4294966272  ;;  %p18_p2 = scmp.ge.s32.totalorder %s1757_s11, 4   ;;  %s2479_s27 = smov %s1672_s28 }
 0x37c   : > { %s2480_s28 = smov %s1676_s29  ;;  %s2481_s29 = smov %s1768_s14 }
 0x37d   : > { %s2482_s30 = smov %s1757_s11  ;;  %20 = sbr.rel (!%p18_p2) target bundleno = 3 (0x3), region = 90 }
 0x382   :  { %1314 = vsyncpa [#allocation3], 1 }
 0x383   :  { %1316 = vsyncpa [#allocation3 + $0x1], 1 }

</bundles_post_ra>
